<compile_context>
chip_gen: v6e
topology: v6e:2x2x1
jax: 0.10.0
libtpu: 0.0.40
codegen_flags: <defaults>
</compile_context>

<pallas_src>
import functools

import jax
import jax.numpy as jnp
from jax.experimental import pallas as pl
from jax.experimental.pallas import tpu as pltpu

_VMEM_LIMIT_BYTES = 48 * 1024 * 1024   # safe on v5e/v6e (128 MiB) and v7x (64 MiB)
_CONV_K = 4                            # every conv in the model is 4x4
_HEAD_LANES = 128                      # Cout=1 head padded to a full lane group

# Layer configs: (stride, pad, instance_norm, leaky_relu)
_LAYER_CFGS = [
    (2, 1, False, True),
    (2, 1, True, True),
    (2, 1, True, True),
    (1, 1, True, True),
    (1, 1, False, False),
]


# ----------------------------------------------------------------------------
# Pallas kernels
# ----------------------------------------------------------------------------
def _conv_in_lrelu_kernel(p_ref, w_ref, o_ref, *, eps, inv_p):
    """Conv (as matmul) + InstanceNorm2d(affine=False) + LeakyReLU, one sample.

    p_ref: (1, P, K) bf16, w_ref: (K, C) bf16, o_ref: (1, P, C) bf16.
    The conv bias cancels exactly under InstanceNorm mean subtraction -> skipped.
    """
    x = p_ref[0]                                     # (P, K) bf16
    w = w_ref[...]                                   # (K, C) bf16
    y = jnp.dot(x, w, preferred_element_type=jnp.float32)     # (P, C) f32 acc
    # One-pass statistics (sum and sum-of-squares), f32 accumulation.
    mean = jnp.sum(y, axis=0, keepdims=True) * inv_p
    mean_sq = jnp.sum(y * y, axis=0, keepdims=True) * inv_p
    var = jnp.maximum(mean_sq - mean * mean, 0.0)    # clamp one-pass rounding
    y = (y - mean) * jax.lax.rsqrt(var + eps)        # rsqrt on the EUP
    y = jnp.where(y > 0, y, 0.2 * y)                 # LeakyReLU(0.2)
    o_ref[...] = y[None].astype(o_ref.dtype)


def _conv_bias_act_kernel(p_ref, w_ref, b_ref, o_ref, *, do_act):
    """Conv (as matmul) + bias (+ optional LeakyReLU) on one M tile.

    p_ref: (tm, K) bf16, w_ref: (K, C) bf16, b_ref: (1, C) f32,
    o_ref: (tm, C) bf16 (inner layers) / f32 (final head).
    """
    y = jnp.dot(p_ref[...], w_ref[...], preferred_element_type=jnp.float32)
    y = y + b_ref[...]
    if do_act:
        y = jnp.where(y > 0, y, 0.2 * y)
    o_ref[...] = y.astype(o_ref.dtype)


# ----------------------------------------------------------------------------
# pallas_call wrappers
# ----------------------------------------------------------------------------
def _pick_m_tile(m, max_tile=512):
    """Largest divisor of m that is a multiple of 8 and <= max_tile."""
    for d in range(min(m, max_tile), 7, -1):
        if m % d == 0 and d % 8 == 0:
            return d
    return m  # fall back to a single full-extent block (always legal)


def conv_in_lrelu_pallas(patches, w_kc, *, eps=1e-5):
    """patches: (N, P, K) bf16; w_kc: (K, C) bf16 -> (N, P, C) bf16."""
    n, p, k = patches.shape
    c = w_kc.shape[1]
    kernel = functools.partial(_conv_in_lrelu_kernel, eps=eps, inv_p=1.0 / p)
    # TODO(synk): for very large P (128-256 px inputs) switch to a P-tiled
    # two-pass scheme (stats pass + normalize pass) to bound VMEM on v7x.
    return pl.pallas_call(
        kernel,
        out_shape=jax.ShapeDtypeStruct((n, p, c), jnp.bfloat16),
        grid=(n,),
        in_specs=[
            pl.BlockSpec((1, p, k), lambda i: (i, 0, 0)),
            pl.BlockSpec((k, c), lambda i: (0, 0)),       # weight resident
        ],
        out_specs=pl.BlockSpec((1, p, c), lambda i: (i, 0, 0)),
        compiler_params=pltpu.CompilerParams(
            dimension_semantics=("parallel",),
            vmem_limit_bytes=_VMEM_LIMIT_BYTES,
        ),
    )(patches, w_kc)


def conv_bias_act_pallas(patches2d, w_kc, b2d, *, do_act, out_dtype):
    """patches2d: (M, K) bf16; w_kc: (K, C) bf16; b2d: (1, C) f32 -> (M, C)."""
    m, k = patches2d.shape
    c = w_kc.shape[1]
    tm = _pick_m_tile(m)
    kernel = functools.partial(_conv_bias_act_kernel, do_act=do_act)
    return pl.pallas_call(
        kernel,
        out_shape=jax.ShapeDtypeStruct((m, c), out_dtype),
        grid=(m // tm,),
        in_specs=[
            pl.BlockSpec((tm, k), lambda i: (i, 0)),      # M tile streamed
            pl.BlockSpec((k, c), lambda i: (0, 0)),       # weight resident
            pl.BlockSpec((1, c), lambda i: (0, 0)),       # bias resident
        ],
        out_specs=pl.BlockSpec((tm, c), lambda i: (i, 0)),
        compiler_params=pltpu.CompilerParams(
            dimension_semantics=("parallel",),
            vmem_limit_bytes=_VMEM_LIMIT_BYTES,
        ),
    )(patches2d, w_kc, b2d)


# ----------------------------------------------------------------------------
# Plain-JAX glue: im2col in NHWC (matches PyTorch Conv2d with OIHW weights)
# ----------------------------------------------------------------------------
def im2col_nhwc(x, k, stride, pad):
    """x: (N, H, W, C) -> patches (N, P, k*k*C) with K order (kh, kw, C)."""
    # TODO(synk): fuse im2col into the conv kernels (DMA the NHWC tile + halo
    # and accumulate 16 shifted matmuls) to remove the ~16x patch expansion.
    n, h, w, c = x.shape
    xp = jnp.pad(x, ((0, 0), (pad, pad), (pad, pad), (0, 0)))
    ho = (h + 2 * pad - k) // stride + 1
    wo = (w + 2 * pad - k) // stride + 1
    cols = []
    for i in range(k):
        for j in range(k):
            cols.append(
                xp[:, i : i + stride * ho : stride, j : j + stride * wo : stride, :]
            )  # (N, Ho, Wo, C)
    patches = jnp.concatenate(cols, axis=-1)              # (N, Ho, Wo, k*k*C)
    return patches.reshape(n, ho * wo, k * k * c), ho, wo


# ----------------------------------------------------------------------------
# One-time parameter packing (hoisted out of the per-forward graph)
# ----------------------------------------------------------------------------
def pack_params(params):
    """OIHW -> (K, Cout) bf16 matching the patch K order; head lane padding."""
    packed = []
    last = len(params) - 1
    for li, (w, b) in enumerate(params):
        cout = w.shape[0]
        w_kc = jnp.transpose(w, (2, 3, 1, 0)).reshape(-1, cout).astype(jnp.bfloat16)
        b2d = b.reshape(1, cout).astype(jnp.float32)
        if li == last and cout < _HEAD_LANES:
            # Zero-pad the Cout=1 head to a full 128-lane block so it runs on
            # the MXU with lane-dense stores; the wrapper slices column 0.
            w_kc = jnp.pad(w_kc, ((0, 0), (0, _HEAD_LANES - cout)))
            b2d = jnp.pad(b2d, ((0, 0), (0, _HEAD_LANES - cout)))
        packed.append((w_kc, b2d))
    return packed


def discriminator_forward(x_nchw, packed):
    """x_nchw: (N, C, H, W) f32; packed: pack_params(...). Returns NCHW f32."""
    n = x_nchw.shape[0]
    num_layers = len(packed)
    h = jnp.transpose(x_nchw, (0, 2, 3, 1)).astype(jnp.bfloat16)   # NHWC, once
    for li, ((w_kc, b2d), (stride, pad, do_norm, do_act)) in enumerate(
        zip(packed, _LAYER_CFGS)
    ):
        patches, ho, wo = im2col_nhwc(h, _CONV_K, stride, pad)
        p = ho * wo
        k = patches.shape[-1]
        is_head = li == num_layers - 1
        if do_norm:
            y = conv_in_lrelu_pallas(patches, w_kc)                # (N,P,C) bf16
            cout = w_kc.shape[1]
        else:
            y = conv_bias_act_pallas(
                patches.reshape(n * p, k),
                w_kc,
                b2d,
                do_act=do_act,
                out_dtype=jnp.float32 if is_head else jnp.bfloat16,
            )
            if is_head:
                y = y[:, :1]                                       # unpad head
                cout = 1
            else:
                cout = w_kc.shape[1]
            y = y.reshape(n, p, cout)
        h = y.reshape(n, ho, wo, cout)                             # stays NHWC
    return jnp.transpose(h, (0, 3, 1, 2)).astype(jnp.float32)      # NCHW


# ----------------------------------------------------------------------------
# Pure-JAX reference (for correctness check)
# ----------------------------------------------------------------------------
def discriminator_reference(x, params, operand_dtype=jnp.float32):
    h = x
    for (w, b), (stride, pad, do_norm, do_act) in zip(params, _LAYER_CFGS):
        h = jax.lax.conv_general_dilated(
            h.astype(operand_dtype),
            w.astype(operand_dtype),
            (stride, stride),
            [(pad, pad), (pad, pad)],
            dimension_numbers=("NCHW", "OIHW", "NCHW"),
            preferred_element_type=jnp.float32,
        ) + b[None, :, None, None]
        if do_norm:
            mean = h.mean(axis=(2, 3), keepdims=True)
            var = ((h - mean) ** 2).mean(axis=(2, 3), keepdims=True)
            h = (h - mean) * jax.lax.rsqrt(var + 1e-5)
        if do_act:
            h = jnp.where(h > 0, h, 0.2 * h)
    return h


# ----------------------------------------------------------------------------
# Deterministic parameter init (shapes from Discriminator.__init__)
# ----------------------------------------------------------------------------
def init_params(key, input_nc):
    chans = [(input_nc, 32), (32, 64), (64, 128), (128, 256), (256, 1)]
    params = []
    for cin, cout in chans:
        key, kw, kb = jax.random.split(key, 3)
        w = 0.05 * jax.random.normal(kw, (cout, cin, 4, 4), dtype=jnp.float32)
        b = 0.05 * jax.random.normal(kb, (cout,), dtype=jnp.float32)
        params.append((w, b))
    return params


if __name__ == "__main__":
    key = jax.random.PRNGKey(0)
    key, kx = jax.random.split(key)

    input_nc = 4
    # 32x32 spatial so the 5-layer PatchGAN stack yields a valid 2x2 patch map:
    # 32 -> 16 -> 8 -> 4 -> 3 -> 2
    x = jax.random.normal(kx, (2, input_nc, 32, 32), dtype=jnp.float32)
    params = init_params(key, input_nc)
    packed = pack_params(params)                       # one-time weight packing

    forward_fn = jax.jit(discriminator_forward)
    out = jax.block_until_ready(forward_fn(x, packed))
    assert out.shape == (2, 1, 2, 2), out.shape

    # Reference with the same bf16 operand quantization as the kernel path.
    ref_bf16 = jax.block_until_ready(
        discriminator_reference(x, params, operand_dtype=jnp.bfloat16)
    )
    assert jnp.allclose(out, ref_bf16, atol=3e-2, rtol=3e-2), float(
        jnp.max(jnp.abs(out - ref_bf16))
    )

    # Full-f32 reference: documented tolerance for the bf16 operand/activation
    # quantization accumulated across 5 layers (acceptable for a GAN critic).
    ref_f32 = jax.block_until_ready(
        discriminator_reference(x, params, operand_dtype=jnp.float32)
    )
    assert jnp.allclose(out, ref_f32, atol=1.5e-1, rtol=1.5e-1), float(
        jnp.max(jnp.abs(out - ref_f32))
    )

    print("KERNEL_OK")
</pallas_src>

<mosaic_0001>
module attributes {stable_mosaic.version = 11 : i64} {
  func.func @_conv_bias_act_kernel(%arg0: i32, %arg1: memref<512x64xbf16, #tpu.memory_space<vmem>>, %arg2: memref<64x32xbf16, #tpu.memory_space<vmem>>, %arg3: memref<1x32xf32, #tpu.memory_space<vmem>>, %arg4: memref<512x32xbf16, #tpu.memory_space<vmem>>) attributes {dimension_semantics = [#tpu.dimension_semantics<parallel>], iteration_bounds = array<i64: 1>, scalar_prefetch = 0 : i64, scratch_operands = 0 : i64, tpu.core_type = #tpu.core_type<tc>, window_params = [{transform_indices = @transform_0, window_bounds = array<i64: 512, 64>}, {pipeline_mode = #tpu.pipeline_mode<synchronous>, transform_indices = @transform_1, window_bounds = array<i64: 64, 32>}, {pipeline_mode = #tpu.pipeline_mode<synchronous>, transform_indices = @transform_2, window_bounds = array<i64: 1, 32>}, {transform_indices = @transform_3, window_bounds = array<i64: 512, 32>}]} {
    %c0 = arith.constant 0 : index
    %c0_0 = arith.constant 0 : index
    %0 = vector.load %arg1[%c0, %c0_0] : memref<512x64xbf16, #tpu.memory_space<vmem>>, vector<512x64xbf16>
    %c0_1 = arith.constant 0 : index
    %c0_2 = arith.constant 0 : index
    %1 = vector.load %arg2[%c0_1, %c0_2] : memref<64x32xbf16, #tpu.memory_space<vmem>>, vector<64x32xbf16>
    %cst = arith.constant dense<0.000000e+00> : vector<512x32xf32>
    %2 = tpu.matmul %0, %1, %cst {dimension_numbers = #tpu.dot_dimension_numbers<[1], [0], [0], [1], [0, 0, 1, 1], [], []>} : vector<512x64xbf16>, vector<64x32xbf16>, vector<512x32xf32> -> vector<512x32xf32>
    %c0_3 = arith.constant 0 : index
    %c0_4 = arith.constant 0 : index
    %3 = vector.load %arg3[%c0_3, %c0_4] : memref<1x32xf32, #tpu.memory_space<vmem>>, vector<1x32xf32>
    %4 = vector.broadcast %3 : vector<1x32xf32> to vector<512x32xf32>
    %5 = arith.addf %2, %4 : vector<512x32xf32>
    %cst_5 = arith.constant 0.000000e+00 : f32
    %6 = vector.broadcast %cst_5 : f32 to vector<512x32xf32>
    %7 = arith.cmpf ogt, %5, %6 : vector<512x32xf32>
    %cst_6 = arith.constant 2.000000e-01 : f32
    %8 = vector.broadcast %cst_6 : f32 to vector<512x32xf32>
    %9 = arith.mulf %8, %5 : vector<512x32xf32>
    %10 = arith.select %7, %5, %9 : vector<512x32xi1>, vector<512x32xf32>
    %11 = arith.truncf %10 : vector<512x32xf32> to vector<512x32xbf16>
    %c0_7 = arith.constant 0 : index
    %c0_8 = arith.constant 0 : index
    %12 = vector.load %arg4[%c0_7, %c0_8] : memref<512x32xbf16, #tpu.memory_space<vmem>>, vector<512x32xbf16>
    tpu.vector_store %arg4[%c0_7, %c0_8], %11 {strides = array<i32>} : memref<512x32xbf16, #tpu.memory_space<vmem>>, vector<512x32xbf16>,
    return
  }
  func.func @transform_0(%arg0: i32) -> (i32, i32) {
    %c0_i32 = arith.constant 0 : i32
    %c0_i32_0 = arith.constant 0 : i32
    return %arg0, %c0_i32 : i32, i32
  }
  func.func @transform_1(%arg0: i32) -> (i32, i32) {
    %c0_i32 = arith.constant 0 : i32
    %c0_i32_0 = arith.constant 0 : i32
    %c0_i32_1 = arith.constant 0 : i32
    return %c0_i32, %c0_i32_0 : i32, i32
  }
  func.func @transform_2(%arg0: i32) -> (i32, i32) {
    %c0_i32 = arith.constant 0 : i32
    %c0_i32_0 = arith.constant 0 : i32
    %c0_i32_1 = arith.constant 0 : i32
    return %c0_i32, %c0_i32_0 : i32, i32
  }
  func.func @transform_3(%arg0: i32) -> (i32, i32) {
    %c0_i32 = arith.constant 0 : i32
    %c0_i32_0 = arith.constant 0 : i32
    return %arg0, %c0_i32 : i32, i32
  }
}

module attributes {stable_mosaic.version = 11 : i64} {
  func.func @_conv_in_lrelu_kernel(%arg0: i32, %arg1: memref<1x64x512xbf16, #tpu.memory_space<vmem>>, %arg2: memref<512x64xbf16, #tpu.memory_space<vmem>>, %arg3: memref<1x64x64xbf16, #tpu.memory_space<vmem>>) attributes {dimension_semantics = [#tpu.dimension_semantics<parallel>], iteration_bounds = array<i64: 2>, scalar_prefetch = 0 : i64, scratch_operands = 0 : i64, tpu.core_type = #tpu.core_type<tc>, window_params = [{transform_indices = @transform_0, window_bounds = array<i64: 1, 64, 512>}, {pipeline_mode = #tpu.pipeline_mode<synchronous>, transform_indices = @transform_1, window_bounds = array<i64: 512, 64>}, {transform_indices = @transform_2, window_bounds = array<i64: 1, 64, 64>}]} {
    %c0 = arith.constant 0 : index
    %c0_0 = arith.constant 0 : index
    %c0_1 = arith.constant 0 : index
    %0 = vector.load %arg1[%c0, %c0_0, %c0_1] : memref<1x64x512xbf16, #tpu.memory_space<vmem>>, vector<1x64x512xbf16>
    %1 = vector.shape_cast %0 : vector<1x64x512xbf16> to vector<64x512xbf16>
    %c0_2 = arith.constant 0 : index
    %c0_3 = arith.constant 0 : index
    %2 = vector.load %arg2[%c0_2, %c0_3] : memref<512x64xbf16, #tpu.memory_space<vmem>>, vector<512x64xbf16>
    %cst = arith.constant dense<0.000000e+00> : vector<64x64xf32>
    %3 = tpu.matmul %1, %2, %cst {dimension_numbers = #tpu.dot_dimension_numbers<[1], [0], [0], [1], [0, 0, 1, 1], [], []>} : vector<64x512xbf16>, vector<512x64xbf16>, vector<64x64xf32> -> vector<64x64xf32>
    %cst_4 = arith.constant dense<0.000000e+00> : vector<64xf32>
    %4 = vector.multi_reduction <add>, %3, %cst_4 [0] : vector<64x64xf32> to vector<64xf32>
    %5 = vector.shape_cast %4 : vector<64xf32> to vector<1x64xf32>
    %cst_5 = arith.constant 1.562500e-02 : f32
    %6 = vector.broadcast %cst_5 : f32 to vector<1x64xf32>
    %7 = arith.mulf %5, %6 : vector<1x64xf32>
    %8 = arith.mulf %3, %3 : vector<64x64xf32>
    %cst_6 = arith.constant dense<0.000000e+00> : vector<64xf32>
    %9 = vector.multi_reduction <add>, %8, %cst_6 [0] : vector<64x64xf32> to vector<64xf32>
    %10 = vector.shape_cast %9 : vector<64xf32> to vector<1x64xf32>
    %cst_7 = arith.constant 1.562500e-02 : f32
    %11 = vector.broadcast %cst_7 : f32 to vector<1x64xf32>
    %12 = arith.mulf %10, %11 : vector<1x64xf32>
    %13 = arith.mulf %7, %7 : vector<1x64xf32>
    %14 = arith.subf %12, %13 : vector<1x64xf32>
    %cst_8 = arith.constant 0.000000e+00 : f32
    %15 = vector.broadcast %cst_8 : f32 to vector<1x64xf32>
    %16 = arith.maximumf %14, %15 : vector<1x64xf32>
    %17 = vector.broadcast %7 : vector<1x64xf32> to vector<64x64xf32>
    %18 = arith.subf %3, %17 : vector<64x64xf32>
    %cst_9 = arith.constant 9.99999974E-6 : f32
    %19 = vector.broadcast %cst_9 : f32 to vector<1x64xf32>
    %20 = arith.addf %16, %19 : vector<1x64xf32>
    %21 = math.rsqrt %20 : vector<1x64xf32>
    %22 = vector.broadcast %21 : vector<1x64xf32> to vector<64x64xf32>
    %23 = arith.mulf %18, %22 : vector<64x64xf32>
    %cst_10 = arith.constant 0.000000e+00 : f32
    %24 = vector.broadcast %cst_10 : f32 to vector<64x64xf32>
    %25 = arith.cmpf ogt, %23, %24 : vector<64x64xf32>
    %cst_11 = arith.constant 2.000000e-01 : f32
    %26 = vector.broadcast %cst_11 : f32 to vector<64x64xf32>
    %27 = arith.mulf %26, %23 : vector<64x64xf32>
    %28 = arith.select %25, %23, %27 : vector<64x64xi1>, vector<64x64xf32>
    %29 = vector.shape_cast %28 : vector<64x64xf32> to vector<1x64x64xf32>
    %30 = arith.truncf %29 : vector<1x64x64xf32> to vector<1x64x64xbf16>
    %c0_12 = arith.constant 0 : index
    %c0_13 = arith.constant 0 : index
    %c0_14 = arith.constant 0 : index
    %31 = vector.load %arg3[%c0_12, %c0_13, %c0_14] : memref<1x64x64xbf16, #tpu.memory_space<vmem>>, vector<1x64x64xbf16>
    tpu.vector_store %arg3[%c0_12, %c0_13, %c0_14], %30 {strides = array<i32>} : memref<1x64x64xbf16, #tpu.memory_space<vmem>>, vector<1x64x64xbf16>,
    return
  }
  func.func @transform_0(%arg0: i32) -> (i32, i32, i32) {
    %c0_i32 = arith.constant 0 : i32
    %c0_i32_0 = arith.constant 0 : i32
    %c0_i32_1 = arith.constant 0 : i32
    return %arg0, %c0_i32, %c0_i32_0 : i32, i32, i32
  }
  func.func @transform_1(%arg0: i32) -> (i32, i32) {
    %c0_i32 = arith.constant 0 : i32
    %c0_i32_0 = arith.constant 0 : i32
    %c0_i32_1 = arith.constant 0 : i32
    return %c0_i32, %c0_i32_0 : i32, i32
  }
  func.func @transform_2(%arg0: i32) -> (i32, i32, i32) {
    %c0_i32 = arith.constant 0 : i32
    %c0_i32_0 = arith.constant 0 : i32
    %c0_i32_1 = arith.constant 0 : i32
    return %arg0, %c0_i32, %c0_i32_0 : i32, i32, i32
  }
}

module attributes {stable_mosaic.version = 11 : i64} {
  func.func @_conv_in_lrelu_kernel(%arg0: i32, %arg1: memref<1x16x1024xbf16, #tpu.memory_space<vmem>>, %arg2: memref<1024x128xbf16, #tpu.memory_space<vmem>>, %arg3: memref<1x16x128xbf16, #tpu.memory_space<vmem>>) attributes {dimension_semantics = [#tpu.dimension_semantics<parallel>], iteration_bounds = array<i64: 2>, scalar_prefetch = 0 : i64, scratch_operands = 0 : i64, tpu.core_type = #tpu.core_type<tc>, window_params = [{transform_indices = @transform_0, window_bounds = array<i64: 1, 16, 1024>}, {pipeline_mode = #tpu.pipeline_mode<synchronous>, transform_indices = @transform_1, window_bounds = array<i64: 1024, 128>}, {transform_indices = @transform_2, window_bounds = array<i64: 1, 16, 128>}]} {
    %c0 = arith.constant 0 : index
    %c0_0 = arith.constant 0 : index
    %c0_1 = arith.constant 0 : index
    %0 = vector.load %arg1[%c0, %c0_0, %c0_1] : memref<1x16x1024xbf16, #tpu.memory_space<vmem>>, vector<1x16x1024xbf16>
    %1 = vector.shape_cast %0 : vector<1x16x1024xbf16> to vector<16x1024xbf16>
    %c0_2 = arith.constant 0 : index
    %c0_3 = arith.constant 0 : index
    %2 = vector.load %arg2[%c0_2, %c0_3] : memref<1024x128xbf16, #tpu.memory_space<vmem>>, vector<1024x128xbf16>
    %cst = arith.constant dense<0.000000e+00> : vector<16x128xf32>
    %3 = tpu.matmul %1, %2, %cst {dimension_numbers = #tpu.dot_dimension_numbers<[1], [0], [0], [1], [0, 0, 1, 1], [], []>} : vector<16x1024xbf16>, vector<1024x128xbf16>, vector<16x128xf32> -> vector<16x128xf32>
    %cst_4 = arith.constant dense<0.000000e+00> : vector<128xf32>
    %4 = vector.multi_reduction <add>, %3, %cst_4 [0] : vector<16x128xf32> to vector<128xf32>
    %5 = vector.shape_cast %4 : vector<128xf32> to vector<1x128xf32>
    %cst_5 = arith.constant 6.250000e-02 : f32
    %6 = vector.broadcast %cst_5 : f32 to vector<1x128xf32>
    %7 = arith.mulf %5, %6 : vector<1x128xf32>
    %8 = arith.mulf %3, %3 : vector<16x128xf32>
    %cst_6 = arith.constant dense<0.000000e+00> : vector<128xf32>
    %9 = vector.multi_reduction <add>, %8, %cst_6 [0] : vector<16x128xf32> to vector<128xf32>
    %10 = vector.shape_cast %9 : vector<128xf32> to vector<1x128xf32>
    %cst_7 = arith.constant 6.250000e-02 : f32
    %11 = vector.broadcast %cst_7 : f32 to vector<1x128xf32>
    %12 = arith.mulf %10, %11 : vector<1x128xf32>
    %13 = arith.mulf %7, %7 : vector<1x128xf32>
    %14 = arith.subf %12, %13 : vector<1x128xf32>
    %cst_8 = arith.constant 0.000000e+00 : f32
    %15 = vector.broadcast %cst_8 : f32 to vector<1x128xf32>
    %16 = arith.maximumf %14, %15 : vector<1x128xf32>
    %17 = vector.broadcast %7 : vector<1x128xf32> to vector<16x128xf32>
    %18 = arith.subf %3, %17 : vector<16x128xf32>
    %cst_9 = arith.constant 9.99999974E-6 : f32
    %19 = vector.broadcast %cst_9 : f32 to vector<1x128xf32>
    %20 = arith.addf %16, %19 : vector<1x128xf32>
    %21 = math.rsqrt %20 : vector<1x128xf32>
    %22 = vector.broadcast %21 : vector<1x128xf32> to vector<16x128xf32>
    %23 = arith.mulf %18, %22 : vector<16x128xf32>
    %cst_10 = arith.constant 0.000000e+00 : f32
    %24 = vector.broadcast %cst_10 : f32 to vector<16x128xf32>
    %25 = arith.cmpf ogt, %23, %24 : vector<16x128xf32>
    %cst_11 = arith.constant 2.000000e-01 : f32
    %26 = vector.broadcast %cst_11 : f32 to vector<16x128xf32>
    %27 = arith.mulf %26, %23 : vector<16x128xf32>
    %28 = arith.select %25, %23, %27 : vector<16x128xi1>, vector<16x128xf32>
    %29 = vector.shape_cast %28 : vector<16x128xf32> to vector<1x16x128xf32>
    %30 = arith.truncf %29 : vector<1x16x128xf32> to vector<1x16x128xbf16>
    %c0_12 = arith.constant 0 : index
    %c0_13 = arith.constant 0 : index
    %c0_14 = arith.constant 0 : index
    %31 = vector.load %arg3[%c0_12, %c0_13, %c0_14] : memref<1x16x128xbf16, #tpu.memory_space<vmem>>, vector<1x16x128xbf16>
    tpu.vector_store %arg3[%c0_12, %c0_13, %c0_14], %30 {strides = array<i32>} : memref<1x16x128xbf16, #tpu.memory_space<vmem>>, vector<1x16x128xbf16>,
    return
  }
  func.func @transform_0(%arg0: i32) -> (i32, i32, i32) {
    %c0_i32 = arith.constant 0 : i32
    %c0_i32_0 = arith.constant 0 : i32
    %c0_i32_1 = arith.constant 0 : i32
    return %arg0, %c0_i32, %c0_i32_0 : i32, i32, i32
  }
  func.func @transform_1(%arg0: i32) -> (i32, i32) {
    %c0_i32 = arith.constant 0 : i32
    %c0_i32_0 = arith.constant 0 : i32
    %c0_i32_1 = arith.constant 0 : i32
    return %c0_i32, %c0_i32_0 : i32, i32
  }
  func.func @transform_2(%arg0: i32) -> (i32, i32, i32) {
    %c0_i32 = arith.constant 0 : i32
    %c0_i32_0 = arith.constant 0 : i32
    %c0_i32_1 = arith.constant 0 : i32
    return %arg0, %c0_i32, %c0_i32_0 : i32, i32, i32
  }
}

module attributes {stable_mosaic.version = 11 : i64} {
  func.func @_conv_in_lrelu_kernel(%arg0: i32, %arg1: memref<1x9x2048xbf16, #tpu.memory_space<vmem>>, %arg2: memref<2048x256xbf16, #tpu.memory_space<vmem>>, %arg3: memref<1x9x256xbf16, #tpu.memory_space<vmem>>) attributes {dimension_semantics = [#tpu.dimension_semantics<parallel>], iteration_bounds = array<i64: 2>, scalar_prefetch = 0 : i64, scratch_operands = 0 : i64, tpu.core_type = #tpu.core_type<tc>, window_params = [{transform_indices = @transform_0, window_bounds = array<i64: 1, 9, 2048>}, {pipeline_mode = #tpu.pipeline_mode<synchronous>, transform_indices = @transform_1, window_bounds = array<i64: 2048, 256>}, {transform_indices = @transform_2, window_bounds = array<i64: 1, 9, 256>}]} {
    %c0 = arith.constant 0 : index
    %c0_0 = arith.constant 0 : index
    %c0_1 = arith.constant 0 : index
    %0 = vector.load %arg1[%c0, %c0_0, %c0_1] : memref<1x9x2048xbf16, #tpu.memory_space<vmem>>, vector<1x9x2048xbf16>
    %1 = vector.shape_cast %0 : vector<1x9x2048xbf16> to vector<9x2048xbf16>
    %c0_2 = arith.constant 0 : index
    %c0_3 = arith.constant 0 : index
    %2 = vector.load %arg2[%c0_2, %c0_3] : memref<2048x256xbf16, #tpu.memory_space<vmem>>, vector<2048x256xbf16>
    %cst = arith.constant dense<0.000000e+00> : vector<9x256xf32>
    %3 = tpu.matmul %1, %2, %cst {dimension_numbers = #tpu.dot_dimension_numbers<[1], [0], [0], [1], [0, 0, 1, 1], [], []>} : vector<9x2048xbf16>, vector<2048x256xbf16>, vector<9x256xf32> -> vector<9x256xf32>
    %cst_4 = arith.constant dense<0.000000e+00> : vector<256xf32>
    %4 = vector.multi_reduction <add>, %3, %cst_4 [0] : vector<9x256xf32> to vector<256xf32>
    %5 = vector.shape_cast %4 : vector<256xf32> to vector<1x256xf32>
    %cst_5 = arith.constant 0.111111112 : f32
    %6 = vector.broadcast %cst_5 : f32 to vector<1x256xf32>
    %7 = arith.mulf %5, %6 : vector<1x256xf32>
    %8 = arith.mulf %3, %3 : vector<9x256xf32>
    %cst_6 = arith.constant dense<0.000000e+00> : vector<256xf32>
    %9 = vector.multi_reduction <add>, %8, %cst_6 [0] : vector<9x256xf32> to vector<256xf32>
    %10 = vector.shape_cast %9 : vector<256xf32> to vector<1x256xf32>
    %cst_7 = arith.constant 0.111111112 : f32
    %11 = vector.broadcast %cst_7 : f32 to vector<1x256xf32>
    %12 = arith.mulf %10, %11 : vector<1x256xf32>
    %13 = arith.mulf %7, %7 : vector<1x256xf32>
    %14 = arith.subf %12, %13 : vector<1x256xf32>
    %cst_8 = arith.constant 0.000000e+00 : f32
    %15 = vector.broadcast %cst_8 : f32 to vector<1x256xf32>
    %16 = arith.maximumf %14, %15 : vector<1x256xf32>
    %17 = vector.broadcast %7 : vector<1x256xf32> to vector<9x256xf32>
    %18 = arith.subf %3, %17 : vector<9x256xf32>
    %cst_9 = arith.constant 9.99999974E-6 : f32
    %19 = vector.broadcast %cst_9 : f32 to vector<1x256xf32>
    %20 = arith.addf %16, %19 : vector<1x256xf32>
    %21 = math.rsqrt %20 : vector<1x256xf32>
    %22 = vector.broadcast %21 : vector<1x256xf32> to vector<9x256xf32>
    %23 = arith.mulf %18, %22 : vector<9x256xf32>
    %cst_10 = arith.constant 0.000000e+00 : f32
    %24 = vector.broadcast %cst_10 : f32 to vector<9x256xf32>
    %25 = arith.cmpf ogt, %23, %24 : vector<9x256xf32>
    %cst_11 = arith.constant 2.000000e-01 : f32
    %26 = vector.broadcast %cst_11 : f32 to vector<9x256xf32>
    %27 = arith.mulf %26, %23 : vector<9x256xf32>
    %28 = arith.select %25, %23, %27 : vector<9x256xi1>, vector<9x256xf32>
    %29 = vector.shape_cast %28 : vector<9x256xf32> to vector<1x9x256xf32>
    %30 = arith.truncf %29 : vector<1x9x256xf32> to vector<1x9x256xbf16>
    %c0_12 = arith.constant 0 : index
    %c0_13 = arith.constant 0 : index
    %c0_14 = arith.constant 0 : index
    %31 = vector.load %arg3[%c0_12, %c0_13, %c0_14] : memref<1x9x256xbf16, #tpu.memory_space<vmem>>, vector<1x9x256xbf16>
    tpu.vector_store %arg3[%c0_12, %c0_13, %c0_14], %30 {strides = array<i32>} : memref<1x9x256xbf16, #tpu.memory_space<vmem>>, vector<1x9x256xbf16>,
    return
  }
  func.func @transform_0(%arg0: i32) -> (i32, i32, i32) {
    %c0_i32 = arith.constant 0 : i32
    %c0_i32_0 = arith.constant 0 : i32
    %c0_i32_1 = arith.constant 0 : i32
    return %arg0, %c0_i32, %c0_i32_0 : i32, i32, i32
  }
  func.func @transform_1(%arg0: i32) -> (i32, i32) {
    %c0_i32 = arith.constant 0 : i32
    %c0_i32_0 = arith.constant 0 : i32
    %c0_i32_1 = arith.constant 0 : i32
    return %c0_i32, %c0_i32_0 : i32, i32
  }
  func.func @transform_2(%arg0: i32) -> (i32, i32, i32) {
    %c0_i32 = arith.constant 0 : i32
    %c0_i32_0 = arith.constant 0 : i32
    %c0_i32_1 = arith.constant 0 : i32
    return %arg0, %c0_i32, %c0_i32_0 : i32, i32, i32
  }
}

module attributes {stable_mosaic.version = 11 : i64} {
  func.func @_conv_bias_act_kernel(%arg0: i32, %arg1: memref<8x4096xbf16, #tpu.memory_space<vmem>>, %arg2: memref<4096x128xbf16, #tpu.memory_space<vmem>>, %arg3: memref<1x128xf32, #tpu.memory_space<vmem>>, %arg4: memref<8x128xf32, #tpu.memory_space<vmem>>) attributes {dimension_semantics = [#tpu.dimension_semantics<parallel>], iteration_bounds = array<i64: 1>, scalar_prefetch = 0 : i64, scratch_operands = 0 : i64, tpu.core_type = #tpu.core_type<tc>, window_params = [{transform_indices = @transform_0, window_bounds = array<i64: 8, 4096>}, {pipeline_mode = #tpu.pipeline_mode<synchronous>, transform_indices = @transform_1, window_bounds = array<i64: 4096, 128>}, {pipeline_mode = #tpu.pipeline_mode<synchronous>, transform_indices = @transform_2, window_bounds = array<i64: 1, 128>}, {transform_indices = @transform_3, window_bounds = array<i64: 8, 128>}]} {
    %c0 = arith.constant 0 : index
    %c0_0 = arith.constant 0 : index
    %0 = vector.load %arg1[%c0, %c0_0] : memref<8x4096xbf16, #tpu.memory_space<vmem>>, vector<8x4096xbf16>
    %c0_1 = arith.constant 0 : index
    %c0_2 = arith.constant 0 : index
    %1 = vector.load %arg2[%c0_1, %c0_2] : memref<4096x128xbf16, #tpu.memory_space<vmem>>, vector<4096x128xbf16>
    %cst = arith.constant dense<0.000000e+00> : vector<8x128xf32>
    %2 = tpu.matmul %0, %1, %cst {dimension_numbers = #tpu.dot_dimension_numbers<[1], [0], [0], [1], [0, 0, 1, 1], [], []>} : vector<8x4096xbf16>, vector<4096x128xbf16>, vector<8x128xf32> -> vector<8x128xf32>
    %c0_3 = arith.constant 0 : index
    %c0_4 = arith.constant 0 : index
    %3 = vector.load %arg3[%c0_3, %c0_4] : memref<1x128xf32, #tpu.memory_space<vmem>>, vector<1x128xf32>
    %4 = vector.broadcast %3 : vector<1x128xf32> to vector<8x128xf32>
    %5 = arith.addf %2, %4 : vector<8x128xf32>
    %c0_5 = arith.constant 0 : index
    %c0_6 = arith.constant 0 : index
    %6 = vector.load %arg4[%c0_5, %c0_6] : memref<8x128xf32, #tpu.memory_space<vmem>>, vector<8x128xf32>
    tpu.vector_store %arg4[%c0_5, %c0_6], %5 {strides = array<i32>} : memref<8x128xf32, #tpu.memory_space<vmem>>, vector<8x128xf32>,
    return
  }
  func.func @transform_0(%arg0: i32) -> (i32, i32) {
    %c0_i32 = arith.constant 0 : i32
    %c0_i32_0 = arith.constant 0 : i32
    return %arg0, %c0_i32 : i32, i32
  }
  func.func @transform_1(%arg0: i32) -> (i32, i32) {
    %c0_i32 = arith.constant 0 : i32
    %c0_i32_0 = arith.constant 0 : i32
    %c0_i32_1 = arith.constant 0 : i32
    return %c0_i32, %c0_i32_0 : i32, i32
  }
  func.func @transform_2(%arg0: i32) -> (i32, i32) {
    %c0_i32 = arith.constant 0 : i32
    %c0_i32_0 = arith.constant 0 : i32
    %c0_i32_1 = arith.constant 0 : i32
    return %c0_i32, %c0_i32_0 : i32, i32
  }
  func.func @transform_3(%arg0: i32) -> (i32, i32) {
    %c0_i32 = arith.constant 0 : i32
    %c0_i32_0 = arith.constant 0 : i32
    return %arg0, %c0_i32 : i32, i32
  }
}

</mosaic_0001>

<bundles_post_ra>
// kernel: discriminator_forward.5
= control target key start
LH: loop header
LB: loop body
LE: loop exit
PB: predicated region body
PF: predicated region fallthrough
CT: control target
= control target key end

     0   :  { %vm278_vm0 = vcmask 523264   ;;  %vm1112_vm3 = vcmask 257024   ;;  %s2042_s1 = inlined_call_operand.vmem [shape: bf16[64,32], index: 1, kind: input, shape index: {}]   ;;  %s2043_s0 = inlined_call_operand.vmem [shape: bf16[512,64], index: 0, kind: input, shape index: {}]   ;;  %s2044_s2 = inlined_call_operand.vmem [shape: f32[1,32], index: 2, kind: input, shape index: {}]   ;;  %s2045_s3 = inlined_call_operand.vmem [shape: bf16[512,32], index: 3, kind: output, shape index: {}]  }
   0x1   :  { %v1494_v0 = vld [vmem:[%s2042_s1 + $0x18] sm:$0xff]   ;;  %v1495_v1 = vld [vmem:[%s2042_s1 + $0x10] sm:$0xff]   ;;  %v1496_v2 = vld [vmem:[%s2042_s1 + $0x8] sm:$0xff]  }
   0x2   :  { %1414 = vmatprep.subr.bf16.mxu0 %v1494_v0  ;;  %1486 = vmatprep.subr.bf16.mxu1 %v1494_v0  ;;  %v1498_v3 = vld [vmem:[%s2043_s0] sm:$0xff]   ;;  %v1500_v6 = vld [vmem:[%s2043_s0 + $0x8] sm:$0xff]   ;;  %v1502_v8 = vld [vmem:[%s2043_s0 + $0x10] sm:$0xff]  }
   0x3   :  { %1415 = vmatpush3.bf16.msra.mxu0 %v1494_v0  ;;  %1490 = vmatpush3.bf16.msra.mxu1 %v1494_v0  ;;  %v1499_v4 = vld [vmem:[%s2043_s0 + $0x80] sm:$0xff]   ;;  %v1501_v7 = vld [vmem:[%s2043_s0 + $0x88] sm:$0xff]   ;;  %v1503_v9 = vld [vmem:[%s2043_s0 + $0x90] sm:$0xff]  }
   0x4   :  { %1416 = vmatprep.subr.bf16.mxu0 %v1495_v1  ;;  %1487 = vmatprep.subr.bf16.mxu1 %v1495_v1  ;;  %v1497_v5 = vld [vmem:[%s2042_s1] sm:$0xff]   ;;  %v1504_v10 = vld [vmem:[%s2043_s0 + $0x18] sm:$0xff]   ;;  %v1508_v14 = vld [vmem:[%s2043_s0 + $0x28] sm:$0xff]  }
   0x5   :  { %1422 = vmatprep.mubr.msk.bf16.mxu0 %vm278_vm0, %v1498_v3  ;;  %1454 = vmatprep.mubr.msk.bf16.mxu1 %vm278_vm0, %v1499_v4  ;;  %v1505_v11 = vld [vmem:[%s2043_s0 + $0x98] sm:$0xff]   ;;  %v1506_v12 = vld [vmem:[%s2043_s0 + $0x20] sm:$0xff]   ;;  %v1509_v15 = vld [vmem:[%s2043_s0 + $0xa8] sm:$0xff]  }
   0x6   :  { %v1507_v13 = vld [vmem:[%s2043_s0 + $0xa0] sm:$0xff]   ;;  %v1510_v16 = vld [vmem:[%s2043_s0 + $0x30] sm:$0xff]   ;;  %v1512_v18 = vld [vmem:[%s2043_s0 + $0x38] sm:$0xff]  }
   0x7   :  { %1417 = vmatpush3.bf16.msra.mxu0 %v1495_v1  ;;  %1491 = vmatpush3.bf16.msra.mxu1 %v1495_v1  ;;  %v1511_v17 = vld [vmem:[%s2043_s0 + $0xb0] sm:$0xff]   ;;  %v1513_v19 = vld [vmem:[%s2043_s0 + $0xb8] sm:$0xff]   ;;  %v1514_v20 = vld [vmem:[%s2043_s0 + $0x40] sm:$0xff]  }
   0x8   :  { %1418 = vmatprep.subr.bf16.mxu0 %v1496_v2  ;;  %1488 = vmatprep.subr.bf16.mxu1 %v1496_v2  ;;  %v1515_v21 = vld [vmem:[%s2043_s0 + $0xc0] sm:$0xff]   ;;  %v1516_v22 = vld [vmem:[%s2043_s0 + $0x48] sm:$0xff]   ;;  %v1518_v24 = vld [vmem:[%s2043_s0 + $0x50] sm:$0xff]  }
   0x9   :  { %v1517_v23 = vld [vmem:[%s2043_s0 + $0xc8] sm:$0xff]   ;;  %v1519_v25 = vld [vmem:[%s2043_s0 + $0xd0] sm:$0xff]   ;;  %v1520_v26 = vld [vmem:[%s2043_s0 + $0x58] sm:$0xff]  }
   0xa   :  { %v1521_v27 = vld [vmem:[%s2043_s0 + $0xd8] sm:$0xff]   ;;  %v1522_v28 = vld [vmem:[%s2043_s0 + $0x60] sm:$0xff]   ;;  %v1524_v30 = vld [vmem:[%s2043_s0 + $0x68] sm:$0xff]  }
   0xb   :  { %1419 = vmatpush3.bf16.msra.mxu0 %v1496_v2  ;;  %1492 = vmatpush3.bf16.msra.mxu1 %v1496_v2  ;;  %v1523_v29 = vld [vmem:[%s2043_s0 + $0xe0] sm:$0xff]   ;;  %v1525_v31 = vld [vmem:[%s2043_s0 + $0xe8] sm:$0xff]   ;;  %v1526_v32 = vld [vmem:[%s2043_s0 + $0x70] sm:$0xff]  }
   0xc   :  { %1420 = vmatprep.subr.bf16.mxu0 %v1497_v5  ;;  %1489 = vmatprep.subr.bf16.mxu1 %v1497_v5  ;;  %v1527_v33 = vld [vmem:[%s2043_s0 + $0xf0] sm:$0xff]   ;;  %v1528_v34 = vld [vmem:[%s2043_s0 + $0x78] sm:$0xff]   ;;  %v1693_v36 = vld [vmem:[%s2044_s2] ss:$0 sm:$0xff] }
   0xd   :  { %v1529_v35 = vld [vmem:[%s2043_s0 + $0xf8] sm:$0xff]  }
   0xf   :  { %1421 = vmatpush3.bf16.msra.mxu0 %v1497_v5  ;;  %1493 = vmatpush3.bf16.msra.mxu1 %v1497_v5 }
  0x12   :  { %1423 = vmatmul.mubr.msk.bf16.vlgmr.msra.gmra.mxu0 %vm278_vm0, %v1500_v6  ;;  %1455 = vmatmul.mubr.msk.bf16.vlgmr.msra.gmra.mxu1 %vm278_vm0, %v1501_v7 }
  0x13   :  { %1426 = vmatprep.mubr.msk.bf16.mxu0 %vm278_vm0, %v1502_v8  ;;  %1458 = vmatprep.mubr.msk.bf16.mxu1 %vm278_vm0, %v1503_v9 }
  0x1a   :  { %1427 = vmatmul.mubr.msk.bf16.gmra.mxu0 %vm278_vm0, %v1504_v10  ;;  %1459 = vmatmul.mubr.msk.bf16.gmra.mxu1 %vm278_vm0, %v1505_v11 }
  0x1b   :  { %1430 = vmatprep.mubr.msk.bf16.mxu0 %vm278_vm0, %v1506_v12  ;;  %1462 = vmatprep.mubr.msk.bf16.mxu1 %vm278_vm0, %v1507_v13 }
  0x22   :  { %1431 = vmatmul.mubr.msk.bf16.gmra.mxu0 %vm278_vm0, %v1508_v14  ;;  %1463 = vmatmul.mubr.msk.bf16.gmra.mxu1 %vm278_vm0, %v1509_v15 }
  0x23   :  { %1434 = vmatprep.mubr.msk.bf16.mxu0 %vm278_vm0, %v1510_v16  ;;  %1466 = vmatprep.mubr.msk.bf16.mxu1 %vm278_vm0, %v1511_v17 }
  0x2a   :  { %1435 = vmatmul.mubr.msk.bf16.gmra.mxu0 %vm278_vm0, %v1512_v18  ;;  %1467 = vmatmul.mubr.msk.bf16.gmra.mxu1 %vm278_vm0, %v1513_v19 }
  0x2b   :  { %1438 = vmatprep.mubr.msk.bf16.mxu0 %vm278_vm0, %v1514_v20  ;;  %1470 = vmatprep.mubr.msk.bf16.mxu1 %vm278_vm0, %v1515_v21 }
  0x32   :  { %1439 = vmatmul.mubr.msk.bf16.gmra.mxu0 %vm278_vm0, %v1516_v22  ;;  %1471 = vmatmul.mubr.msk.bf16.gmra.mxu1 %vm278_vm0, %v1517_v23 }
  0x33   :  { %1442 = vmatprep.mubr.msk.bf16.mxu0 %vm278_vm0, %v1518_v24  ;;  %1474 = vmatprep.mubr.msk.bf16.mxu1 %vm278_vm0, %v1519_v25 }
  0x3a   :  { %1443 = vmatmul.mubr.msk.bf16.gmra.mxu0 %vm278_vm0, %v1520_v26  ;;  %1475 = vmatmul.mubr.msk.bf16.gmra.mxu1 %vm278_vm0, %v1521_v27 }
  0x3b   :  { %1446 = vmatprep.mubr.msk.bf16.mxu0 %vm278_vm0, %v1522_v28  ;;  %1478 = vmatprep.mubr.msk.bf16.mxu1 %vm278_vm0, %v1523_v29 }
  0x42   :  { %1447 = vmatmul.mubr.msk.bf16.gmra.mxu0 %vm278_vm0, %v1524_v30  ;;  %1479 = vmatmul.mubr.msk.bf16.gmra.mxu1 %vm278_vm0, %v1525_v31 }
  0x43   :  { %1450 = vmatprep.mubr.msk.bf16.mxu0 %vm278_vm0, %v1526_v32  ;;  %1482 = vmatprep.mubr.msk.bf16.mxu1 %vm278_vm0, %v1527_v33 }
  0x4a   :  { %1451 = vmatmul.mubr.msk.bf16.gmra.mxu0 %vm278_vm0, %v1528_v34  ;;  %1483 = vmatmul.mubr.msk.bf16.gmra.mxu1 %vm278_vm0, %v1529_v35 }
  0xd2   :  { %v1424_v37 = vpop.f32.mrf.mxu0  ;;  %v1456_v38 = vpop.f32.mrf.mxu1 }
  0xd3   :  { %v418_v39 = vadd.f32 %v1424_v37, %v1693_v36  ;;  %v546_v40 = vadd.f32 %v1456_v38, %v1693_v36 }
  0xd4   :  { %v409_v41 = vpop.f32.mrf.mxu0  ;;  %v537_v42 = vpop.f32.mrf.mxu1 }
  0xd5   :  { %vm666_vm1 = vcmp.gt.f32.partialorder %v418_v39, 0.0  ;;  %v730_v43 = vmul.f32 0.2, %v418_v39  ;;  %vm698_vm2 = vcmp.gt.f32.partialorder %v546_v40, 0.0  ;;  %v762_v44 = vmul.f32 0.2, %v546_v40 }
  0xd6   :  { %v410_v45 = vadd.f32 %v1693_v36, %v409_v41  ;;  %v538_v46 = vadd.f32 %v1693_v36, %v537_v42  ;;  %v1425_v47 = vpop.f32.mrf.mxu0  ;;  %v1457_v48 = vpop.f32.mrf.mxu1 }
  0xd7   :  { %v794_v49 = vsel %vm666_vm1, %v418_v39, %v730_v43  ;;  %v826_v50 = vsel %vm698_vm2, %v546_v40, %v762_v44  ;;  %v421_v51 = vadd.f32 %v1425_v47, %v1693_v36  ;;  %v549_v52 = vadd.f32 %v1457_v48, %v1693_v36 }
  0xd8   :  { %v1316_v53 = vpack.c.bf16 %v794_v49, %v794_v49  ;;  %v1348_v54 = vpack.c.bf16 %v826_v50, %v826_v50  ;;  %vm664_vm4 = vcmp.gt.f32.partialorder %v410_v45, 0.0  ;;  %v728_v55 = vmul.f32 0.2, %v410_v45  ;;  %v412_v56 = vpop.f32.mrf.mxu0  ;;  %v540_v57 = vpop.f32.mrf.mxu1 }
  0xd9   :  { %vm696_vm5 = vcmp.gt.f32.partialorder %v538_v46, 0.0  ;;  %v760_v58 = vmul.f32 0.2, %v538_v46  ;;  %vm667_vm6 = vcmp.gt.f32.partialorder %v421_v51, 0.0  ;;  %v731_v59 = vmul.f32 0.2, %v421_v51 }
  0xda   :  { %1115 = vst.msk [vmem:[%s2045_s3 + $0x8] sm:$0xf] %vm1112_vm3, %v1316_v53  ;;  %1147 = vst.msk [vmem:[%s2045_s3 + $0x88] sm:$0xf] %vm1112_vm3, %v1348_v54  ;;  %v792_v60 = vsel %vm664_vm4, %v410_v45, %v728_v55  ;;  %vm699_vm7 = vcmp.gt.f32.partialorder %v549_v52, 0.0  ;;  %v413_v62 = vadd.f32 %v1693_v36, %v412_v56  ;;  %v1428_v63 = vpop.f32.mrf.mxu0  ;;  %v1460_v0 = vpop.f32.mrf.mxu1  ;;  %v541_v4 = vadd.f32 %v1693_v36, %v540_v57 }
  0xdb   :  { %v763_v61 = vmul.f32 0.2, %v549_v52  ;;  %v1314_v1 = vpack.c.bf16 %v792_v60, %v792_v60  ;;  %v824_v2 = vsel %vm696_vm5, %v538_v46, %v760_v58  ;;  %v795_v3 = vsel %vm667_vm6, %v421_v51, %v731_v59 }
  0xdc   :  { %v1346_v5 = vpack.c.bf16 %v824_v2, %v824_v2  ;;  %v1317_v6 = vpack.c.bf16 %v795_v3, %v795_v3  ;;  %vm665_vm8 = vcmp.gt.f32.partialorder %v413_v62, 0.0  ;;  %v425_v8 = vpop.f32.mrf.mxu0  ;;  %v553_v9 = vpop.f32.mrf.mxu1  ;;  %v729_v11 = vmul.f32 0.2, %v413_v62 }
  0xdd   :  { %v827_v7 = vsel %vm699_vm7, %v549_v52, %v763_v61  ;;  %1113 = vst.msk [vmem:[%s2045_s3] sm:$0xf] %vm1112_vm3, %v1314_v1  ;;  %vm697_vm9 = vcmp.gt.f32.partialorder %v541_v4, 0.0  ;;  %v761_v12 = vmul.f32 0.2, %v541_v4  ;;  %v434_v13 = vadd.f32 %v1428_v63, %v1693_v36 }
  0xde   :  { %v1349_v10 = vpack.c.bf16 %v827_v7, %v827_v7  ;;  %1145 = vst.msk [vmem:[%s2045_s3 + $0x80] sm:$0xf] %vm1112_vm3, %v1346_v5  ;;  %1116 = vst.msk [vmem:[%s2045_s3 + $0xc] sm:$0xf] %vm1112_vm3, %v1317_v6  ;;  %v562_v14 = vadd.f32 %v1460_v0, %v1693_v36  ;;  %v426_v15 = vadd.f32 %v1693_v36, %v425_v8  ;;  %v1429_v17 = vpop.f32.mrf.mxu0  ;;  %v1461_v18 = vpop.f32.mrf.mxu1 }
  0xdf   :  { %v554_v16 = vadd.f32 %v1693_v36, %v553_v9  ;;  %v793_v19 = vsel %vm665_vm8, %v413_v62, %v729_v11  ;;  %v825_v20 = vsel %vm697_vm9, %v541_v4, %v761_v12  ;;  %v437_v21 = vadd.f32 %v1429_v17, %v1693_v36 }
  0xe0   :  { %1148 = vst.msk [vmem:[%s2045_s3 + $0x8c] sm:$0xf] %vm1112_vm3, %v1349_v10  ;;  %v565_v22 = vadd.f32 %v1461_v18, %v1693_v36  ;;  %v1315_v23 = vpack.c.bf16 %v793_v19, %v793_v19  ;;  %v1347_v24 = vpack.c.bf16 %v825_v20, %v825_v20  ;;  %vm670_vm10 = vcmp.gt.f32.partialorder %v434_v13, 0.0  ;;  %v428_v26 = vpop.f32.mrf.mxu0  ;;  %v556_v27 = vpop.f32.mrf.mxu1 }
  0xe1   :  { %v734_v25 = vmul.f32 0.2, %v434_v13  ;;  %vm702_vm11 = vcmp.gt.f32.partialorder %v562_v14, 0.0  ;;  %v766_v28 = vmul.f32 0.2, %v562_v14  ;;  %vm668_vm12 = vcmp.gt.f32.partialorder %v426_v15, 0.0 }
  0xe2   :  { %v732_v29 = vmul.f32 0.2, %v426_v15  ;;  %1114 = vst.msk [vmem:[%s2045_s3 + $0x4] sm:$0xf] %vm1112_vm3, %v1315_v23  ;;  %1146 = vst.msk [vmem:[%s2045_s3 + $0x84] sm:$0xf] %vm1112_vm3, %v1347_v24  ;;  %v1432_v32 = vpop.f32.mrf.mxu0  ;;  %v1464_v33 = vpop.f32.mrf.mxu1  ;;  %v429_v47 = vadd.f32 %v1693_v36, %v428_v26  ;;  %v557_v49 = vadd.f32 %v1693_v36, %v556_v27 }
  0xe3   :  { %v798_v30 = vsel %vm670_vm10, %v434_v13, %v734_v25  ;;  %vm700_vm13 = vcmp.gt.f32.partialorder %v554_v16, 0.0  ;;  %v764_v31 = vmul.f32 0.2, %v554_v16  ;;  %vm671_vm14 = vcmp.gt.f32.partialorder %v437_v21, 0.0 }
  0xe4   :  { %v1320_v34 = vpack.c.bf16 %v798_v30, %v798_v30  ;;  %v830_v35 = vsel %vm702_vm11, %v562_v14, %v766_v28  ;;  %v796_v37 = vsel %vm668_vm12, %v426_v15, %v732_v29  ;;  %v735_v38 = vmul.f32 0.2, %v437_v21  ;;  %v441_v42 = vpop.f32.mrf.mxu0  ;;  %v569_v43 = vpop.f32.mrf.mxu1 }
  0xe5   :  { %v1352_v39 = vpack.c.bf16 %v830_v35, %v830_v35  ;;  %v1318_v40 = vpack.c.bf16 %v796_v37, %v796_v37  ;;  %v828_v41 = vsel %vm700_vm13, %v554_v16, %v764_v31  ;;  %vm703_vm15 = vcmp.gt.f32.partialorder %v565_v22, 0.0 }
  0xe6   :  { %1119 = vst.msk [vmem:[%s2045_s3 + $0x18] sm:$0xf] %vm1112_vm3, %v1320_v34  ;;  %v1350_v44 = vpack.c.bf16 %v828_v41, %v828_v41  ;;  %v799_v45 = vsel %vm671_vm14, %v437_v21, %v735_v38  ;;  %v767_v46 = vmul.f32 0.2, %v565_v22  ;;  %v450_v50 = vadd.f32 %v1432_v32, %v1693_v36  ;;  %v1433_v52 = vpop.f32.mrf.mxu0  ;;  %v1465_v53 = vpop.f32.mrf.mxu1 }
  0xe7   :  { %1151 = vst.msk [vmem:[%s2045_s3 + $0x98] sm:$0xf] %vm1112_vm3, %v1352_v39  ;;  %1117 = vst.msk [vmem:[%s2045_s3 + $0x10] sm:$0xf] %vm1112_vm3, %v1318_v40  ;;  %v1321_v48 = vpack.c.bf16 %v799_v45, %v799_v45  ;;  %v578_v51 = vadd.f32 %v1464_v33, %v1693_v36  ;;  %vm669_vm0 = vcmp.gt.f32.partialorder %v429_v47, 0.0  ;;  %v442_v56 = vadd.f32 %v1693_v36, %v441_v42 }
  0xe8   :  { %1149 = vst.msk [vmem:[%s2045_s3 + $0x90] sm:$0xf] %vm1112_vm3, %v1350_v44  ;;  %v831_v54 = vsel %vm703_vm15, %v565_v22, %v767_v46  ;;  %v733_v55 = vmul.f32 0.2, %v429_v47  ;;  %vm701_vm1 = vcmp.gt.f32.partialorder %v557_v49, 0.0  ;;  %vm674_vm2 = vcmp.gt.f32.partialorder %v450_v50, 0.0  ;;  %v444_v59 = vpop.f32.mrf.mxu0  ;;  %v572_v60 = vpop.f32.mrf.mxu1 }
  0xe9   :  { %1120 = vst.msk [vmem:[%s2045_s3 + $0x1c] sm:$0xf] %vm1112_vm3, %v1321_v48  ;;  %v1353_v57 = vpack.c.bf16 %v831_v54, %v831_v54  ;;  %v765_v58 = vmul.f32 0.2, %v557_v49  ;;  %v738_v62 = vmul.f32 0.2, %v450_v50  ;;  %v570_v8 = vadd.f32 %v1693_v36, %v569_v43 }
  0xea   :  { %v797_v61 = vsel %vm669_vm0, %v429_v47, %v733_v55  ;;  %vm706_vm4 = vcmp.gt.f32.partialorder %v578_v51, 0.0  ;;  %v770_v63 = vmul.f32 0.2, %v578_v51  ;;  %vm672_vm5 = vcmp.gt.f32.partialorder %v442_v56, 0.0  ;;  %v1436_v3 = vpop.f32.mrf.mxu0  ;;  %v1468_v4 = vpop.f32.mrf.mxu1 }
  0xeb   :  { %1152 = vst.msk [vmem:[%s2045_s3 + $0x9c] sm:$0xf] %vm1112_vm3, %v1353_v57  ;;  %v1319_v0 = vpack.c.bf16 %v797_v61, %v797_v61  ;;  %v829_v1 = vsel %vm701_vm1, %v557_v49, %v765_v58  ;;  %v736_v2 = vmul.f32 0.2, %v442_v56  ;;  %v802_v6 = vsel %vm674_vm2, %v450_v50, %v738_v62 }
  0xec   :  { %v1351_v5 = vpack.c.bf16 %v829_v1, %v829_v1  ;;  %v834_v7 = vsel %vm706_vm4, %v578_v51, %v770_v63  ;;  %v1324_v9 = vpack.c.bf16 %v802_v6, %v802_v6  ;;  %v453_v12 = vadd.f32 %v1433_v52, %v1693_v36  ;;  %v457_v13 = vpop.f32.mrf.mxu0  ;;  %v585_v14 = vpop.f32.mrf.mxu1 }
  0xed   :  { %1118 = vst.msk [vmem:[%s2045_s3 + $0x14] sm:$0xf] %vm1112_vm3, %v1319_v0  ;;  %v1356_v10 = vpack.c.bf16 %v834_v7, %v834_v7  ;;  %v800_v11 = vsel %vm672_vm5, %v442_v56, %v736_v2  ;;  %vm704_vm6 = vcmp.gt.f32.partialorder %v570_v8, 0.0  ;;  %v768_v16 = vmul.f32 0.2, %v570_v8 }
  0xee   :  { %1150 = vst.msk [vmem:[%s2045_s3 + $0x94] sm:$0xf] %vm1112_vm3, %v1351_v5  ;;  %v1322_v15 = vpack.c.bf16 %v800_v11, %v800_v11  ;;  %v581_v17 = vadd.f32 %v1465_v53, %v1693_v36  ;;  %1123 = vst.msk [vmem:[%s2045_s3 + $0x28] sm:$0xf] %vm1112_vm3, %v1324_v9  ;;  %vm675_vm7 = vcmp.gt.f32.partialorder %v453_v12, 0.0  ;;  %v445_v19 = vadd.f32 %v1693_v36, %v444_v59  ;;  %v1437_v21 = vpop.f32.mrf.mxu0  ;;  %v1469_v22 = vpop.f32.mrf.mxu1 }
  0xef   :  { %1155 = vst.msk [vmem:[%s2045_s3 + $0xa8] sm:$0xf] %vm1112_vm3, %v1356_v10  ;;  %v739_v18 = vmul.f32 0.2, %v453_v12  ;;  %v573_v20 = vadd.f32 %v1693_v36, %v572_v60  ;;  %v832_v23 = vsel %vm704_vm6, %v570_v8, %v768_v16  ;;  %v466_v25 = vadd.f32 %v1436_v3, %v1693_v36 }
  0xf0   :  { %1121 = vst.msk [vmem:[%s2045_s3 + $0x20] sm:$0xf] %vm1112_vm3, %v1322_v15  ;;  %vm707_vm8 = vcmp.gt.f32.partialorder %v581_v17, 0.0  ;;  %v771_v24 = vmul.f32 0.2, %v581_v17  ;;  %v1354_v26 = vpack.c.bf16 %v832_v23, %v832_v23  ;;  %vm673_vm9 = vcmp.gt.f32.partialorder %v445_v19, 0.0  ;;  %v460_v29 = vpop.f32.mrf.mxu0  ;;  %v588_v30 = vpop.f32.mrf.mxu1 }
  0xf1   :  { %v803_v27 = vsel %vm675_vm7, %v453_v12, %v739_v18  ;;  %v737_v28 = vmul.f32 0.2, %v445_v19  ;;  %vm705_vm10 = vcmp.gt.f32.partialorder %v573_v20, 0.0  ;;  %v769_v33 = vmul.f32 0.2, %v573_v20 }
  0xf2   :  { %v1325_v31 = vpack.c.bf16 %v803_v27, %v803_v27  ;;  %v835_v32 = vsel %vm707_vm8, %v581_v17, %v771_v24  ;;  %1153 = vst.msk [vmem:[%s2045_s3 + $0xa0] sm:$0xf] %vm1112_vm3, %v1354_v26  ;;  %vm678_vm11 = vcmp.gt.f32.partialorder %v466_v25, 0.0  ;;  %v742_v37 = vmul.f32 0.2, %v466_v25  ;;  %v1440_v38 = vpop.f32.mrf.mxu0  ;;  %v1472_v39 = vpop.f32.mrf.mxu1 }
  0xf3   :  { %v1357_v34 = vpack.c.bf16 %v835_v32, %v835_v32  ;;  %v801_v35 = vsel %vm673_vm9, %v445_v19, %v737_v28  ;;  %v833_v41 = vsel %vm705_vm10, %v573_v20, %v769_v33  ;;  %v594_v42 = vadd.f32 %v1468_v4, %v1693_v36 }
  0xf4   :  { %1124 = vst.msk [vmem:[%s2045_s3 + $0x2c] sm:$0xf] %vm1112_vm3, %v1325_v31  ;;  %v1323_v40 = vpack.c.bf16 %v801_v35, %v801_v35  ;;  %v458_v43 = vadd.f32 %v1693_v36, %v457_v13  ;;  %v1355_v44 = vpack.c.bf16 %v833_v41, %v833_v41  ;;  %v806_v45 = vsel %vm678_vm11, %v466_v25, %v742_v37  ;;  %v473_v48 = vpop.f32.mrf.mxu0  ;;  %v601_v49 = vpop.f32.mrf.mxu1 }
  0xf5   :  { %1156 = vst.msk [vmem:[%s2045_s3 + $0xac] sm:$0xf] %vm1112_vm3, %v1357_v34  ;;  %v586_v46 = vadd.f32 %v1693_v36, %v585_v14  ;;  %v469_v47 = vadd.f32 %v1437_v21, %v1693_v36  ;;  %v1328_v50 = vpack.c.bf16 %v806_v45, %v806_v45  ;;  %vm710_vm12 = vcmp.gt.f32.partialorder %v594_v42, 0.0 }
  0xf6   :  { %1122 = vst.msk [vmem:[%s2045_s3 + $0x24] sm:$0xf] %vm1112_vm3, %v1323_v40  ;;  %v774_v51 = vmul.f32 0.2, %v594_v42  ;;  %vm676_vm13 = vcmp.gt.f32.partialorder %v458_v43, 0.0  ;;  %v1441_v54 = vpop.f32.mrf.mxu0  ;;  %v1473_v55 = vpop.f32.mrf.mxu1  ;;  %v597_v58 = vadd.f32 %v1469_v22, %v1693_v36  ;;  %v461_v59 = vadd.f32 %v1693_v36, %v460_v29 }
  0xf7   :  { %1154 = vst.msk [vmem:[%s2045_s3 + $0xa4] sm:$0xf] %vm1112_vm3, %v1355_v44  ;;  %v740_v52 = vmul.f32 0.2, %v458_v43  ;;  %vm708_vm14 = vcmp.gt.f32.partialorder %v586_v46, 0.0  ;;  %vm679_vm15 = vcmp.gt.f32.partialorder %v469_v47, 0.0  ;;  %v589_v63 = vadd.f32 %v1693_v36, %v588_v30 }
  0xf8   :  { %v772_v53 = vmul.f32 0.2, %v586_v46  ;;  %1127 = vst.msk [vmem:[%s2045_s3 + $0x38] sm:$0xf] %vm1112_vm3, %v1328_v50  ;;  %v838_v56 = vsel %vm710_vm12, %v594_v42, %v774_v51  ;;  %v743_v57 = vmul.f32 0.2, %v469_v47  ;;  %v1829_v0 = vpop.f32.mrf.mxu0  ;;  %v1831_v1 = vpop.f32.mrf.mxu1  ;;  %v482_v11 = vadd.f32 %v1440_v38, %v1693_v36 }
  0xf9   :  { %v1360_v60 = vpack.c.bf16 %v838_v56, %v838_v56  ;;  %v804_v61 = vsel %vm676_vm13, %v458_v43, %v740_v52  ;;  %vm711_vm0 = vcmp.gt.f32.partialorder %v597_v58, 0.0  ;;  %v775_v6 = vmul.f32 0.2, %v597_v58 }
  0xfa   :  { %v836_v62 = vsel %vm708_vm14, %v586_v46, %v772_v53  ;;  %v1326_v2 = vpack.c.bf16 %v804_v61, %v804_v61  ;;  %v807_v4 = vsel %vm679_vm15, %v469_v47, %v743_v57  ;;  %vm677_vm1 = vcmp.gt.f32.partialorder %v461_v59, 0.0  ;;  %v1444_v8 = vpop.f32.mrf.mxu0  ;;  %v1476_v9 = vpop.f32.mrf.mxu1 }
  0xfb   :  { %v1358_v3 = vpack.c.bf16 %v836_v62, %v836_v62  ;;  %1159 = vst.msk [vmem:[%s2045_s3 + $0xb8] sm:$0xf] %vm1112_vm3, %v1360_v60  ;;  %v1329_v5 = vpack.c.bf16 %v807_v4, %v807_v4  ;;  %v741_v7 = vmul.f32 0.2, %v461_v59  ;;  %vm709_vm2 = vcmp.gt.f32.partialorder %v589_v63, 0.0 }
  0xfc   :  { %1125 = vst.msk [vmem:[%s2045_s3 + $0x30] sm:$0xf] %vm1112_vm3, %v1326_v2  ;;  %v773_v10 = vmul.f32 0.2, %v589_v63  ;;  %v610_v12 = vadd.f32 %v1472_v39, %v1693_v36  ;;  %v839_v13 = vsel %vm711_vm0, %v597_v58, %v775_v6  ;;  %v474_v15 = vadd.f32 %v1693_v36, %v473_v48  ;;  %v489_v17 = vpop.f32.mrf.mxu0  ;;  %v1854_v18 = vpop.f32.mrf.mxu1 }
  0xfd   :  { %1157 = vst.msk [vmem:[%s2045_s3 + $0xb0] sm:$0xf] %vm1112_vm3, %v1358_v3  ;;  %1128 = vst.msk [vmem:[%s2045_s3 + $0x3c] sm:$0xf] %vm1112_vm3, %v1329_v5  ;;  %v805_v14 = vsel %vm677_vm1, %v461_v59, %v741_v7  ;;  %v602_v16 = vadd.f32 %v1693_v36, %v601_v49  ;;  %v1361_v19 = vpack.c.bf16 %v839_v13, %v839_v13  ;;  %vm682_vm4 = vcmp.gt.f32.partialorder %v482_v11, 0.0 }
  0xfe   :  { %v1327_v20 = vpack.c.bf16 %v805_v14, %v805_v14  ;;  %v837_v21 = vsel %vm709_vm2, %v589_v63, %v773_v10  ;;  %v746_v23 = vmul.f32 0.2, %v482_v11  ;;  %vm714_vm5 = vcmp.gt.f32.partialorder %v610_v12, 0.0  ;;  %v1856_v25 = vpop.f32.mrf.mxu0  ;;  %v1858_v26 = vpop.f32.mrf.mxu1 }
  0xff   :  { %v1359_v22 = vpack.c.bf16 %v837_v21, %v837_v21  ;;  %v778_v24 = vmul.f32 0.2, %v610_v12  ;;  %1160 = vst.msk [vmem:[%s2045_s3 + $0xbc] sm:$0xf] %vm1112_vm3, %v1361_v19  ;;  %vm680_vm6 = vcmp.gt.f32.partialorder %v474_v15, 0.0  ;;  %vm712_vm7 = vcmp.gt.f32.partialorder %v602_v16, 0.0 }
 0x100   :  { %1126 = vst.msk [vmem:[%s2045_s3 + $0x34] sm:$0xf] %vm1112_vm3, %v1327_v20  ;;  %v744_v27 = vmul.f32 0.2, %v474_v15  ;;  %v776_v28 = vmul.f32 0.2, %v602_v16  ;;  %v810_v29 = vsel %vm682_vm4, %v482_v11, %v746_v23  ;;  %v485_v31 = vadd.f32 %v1441_v54, %v1693_v36  ;;  %v1874_v33 = vpop.f32.mrf.mxu0  ;;  %v1876_v34 = vpop.f32.mrf.mxu1 }
 0x101   :  { %1158 = vst.msk [vmem:[%s2045_s3 + $0xb4] sm:$0xf] %vm1112_vm3, %v1359_v22  ;;  %v842_v30 = vsel %vm714_vm5, %v610_v12, %v778_v24  ;;  %v613_v32 = vadd.f32 %v1473_v55, %v1693_v36  ;;  %v1332_v35 = vpack.c.bf16 %v810_v29, %v810_v29  ;;  %v477_v46 = vadd.f32 %v1693_v36, %v1829_v0 }
 0x102   :  { %v1364_v37 = vpack.c.bf16 %v842_v30, %v842_v30  ;;  %v808_v38 = vsel %vm680_vm6, %v474_v15, %v744_v27  ;;  %v840_v39 = vsel %vm712_vm7, %v602_v16, %v776_v28  ;;  %vm683_vm8 = vcmp.gt.f32.partialorder %v485_v31, 0.0  ;;  %v1448_v43 = vpop.f32.mrf.mxu0  ;;  %v1878_v44 = vpop.f32.mrf.mxu1 }
 0x103   :  { %v1330_v40 = vpack.c.bf16 %v808_v38, %v808_v38  ;;  %v1362_v41 = vpack.c.bf16 %v840_v39, %v840_v39  ;;  %v747_v42 = vmul.f32 0.2, %v485_v31  ;;  %1131 = vst.msk [vmem:[%s2045_s3 + $0x48] sm:$0xf] %vm1112_vm3, %v1332_v35  ;;  %vm715_vm9 = vcmp.gt.f32.partialorder %v613_v32, 0.0 }
 0x104   :  { %1163 = vst.msk [vmem:[%s2045_s3 + $0xc8] sm:$0xf] %vm1112_vm3, %v1364_v37  ;;  %v779_v45 = vmul.f32 0.2, %v613_v32  ;;  %v605_v47 = vadd.f32 %v1693_v36, %v1831_v1  ;;  %v498_v49 = vadd.f32 %v1444_v8, %v1693_v36  ;;  %v626_v50 = vadd.f32 %v1476_v9, %v1693_v36  ;;  %v505_v57 = vpop.f32.mrf.mxu0  ;;  %v633_v58 = vpop.f32.mrf.mxu1 }
 0x105   :  { %1129 = vst.msk [vmem:[%s2045_s3 + $0x40] sm:$0xf] %vm1112_vm3, %v1330_v40  ;;  %1161 = vst.msk [vmem:[%s2045_s3 + $0xc0] sm:$0xf] %vm1112_vm3, %v1362_v41  ;;  %v811_v48 = vsel %vm683_vm8, %v485_v31, %v747_v42  ;;  %v490_v51 = vadd.f32 %v1693_v36, %v489_v17  ;;  %vm681_vm10 = vcmp.gt.f32.partialorder %v477_v46, 0.0  ;;  %v618_v4 = vadd.f32 %v1693_v36, %v1854_v18 }
 0x106   :  { %v1333_v52 = vpack.c.bf16 %v811_v48, %v811_v48  ;;  %v843_v53 = vsel %vm715_vm9, %v613_v32, %v779_v45  ;;  %v745_v54 = vmul.f32 0.2, %v477_v46  ;;  %vm713_vm11 = vcmp.gt.f32.partialorder %v605_v47, 0.0  ;;  %v1449_v9 = vpop.f32.mrf.mxu0  ;;  %v1481_v10 = vpop.f32.mrf.mxu1 }
 0x107   :  { %v1365_v55 = vpack.c.bf16 %v843_v53, %v843_v53  ;;  %v777_v56 = vmul.f32 0.2, %v605_v47  ;;  %vm686_vm12 = vcmp.gt.f32.partialorder %v498_v49, 0.0  ;;  %v750_v60 = vmul.f32 0.2, %v498_v49 }
 0x108   :  { %1132 = vst.msk [vmem:[%s2045_s3 + $0x4c] sm:$0xf] %vm1112_vm3, %v1333_v52  ;;  %v809_v59 = vsel %vm681_vm10, %v477_v46, %v745_v54  ;;  %vm718_vm13 = vcmp.gt.f32.partialorder %v626_v50, 0.0  ;;  %v782_v61 = vmul.f32 0.2, %v626_v50  ;;  %vm684_vm14 = vcmp.gt.f32.partialorder %v490_v51, 0.0  ;;  %v508_v23 = vpop.f32.mrf.mxu0  ;;  %v636_v24 = vpop.f32.mrf.mxu1 }
 0x109   :  { %1164 = vst.msk [vmem:[%s2045_s3 + $0xcc] sm:$0xf] %vm1112_vm3, %v1365_v55  ;;  %v1331_v62 = vpack.c.bf16 %v809_v59, %v809_v59  ;;  %v841_v63 = vsel %vm713_vm11, %v605_v47, %v777_v56  ;;  %v748_v0 = vmul.f32 0.2, %v490_v51  ;;  %v814_v2 = vsel %vm686_vm12, %v498_v49, %v750_v60 }
 0x10a   :  { %v1363_v1 = vpack.c.bf16 %v841_v63, %v841_v63  ;;  %v846_v3 = vsel %vm718_vm13, %v626_v50, %v782_v61  ;;  %v1336_v5 = vpack.c.bf16 %v814_v2, %v814_v2  ;;  %v501_v8 = vadd.f32 %v1856_v25, %v1693_v36  ;;  %v1452_v40 = vpop.f32.mrf.mxu0  ;;  %v1484_v41 = vpop.f32.mrf.mxu1 }
 0x10b   :  { %1130 = vst.msk [vmem:[%s2045_s3 + $0x44] sm:$0xf] %vm1112_vm3, %v1331_v62  ;;  %v1368_v6 = vpack.c.bf16 %v846_v3, %v846_v3  ;;  %v812_v7 = vsel %vm684_vm14, %v490_v51, %v748_v0  ;;  %vm716_vm15 = vcmp.gt.f32.partialorder %v618_v4, 0.0  ;;  %v780_v12 = vmul.f32 0.2, %v618_v4 }
 0x10c   :  { %1162 = vst.msk [vmem:[%s2045_s3 + $0xc4] sm:$0xf] %vm1112_vm3, %v1363_v1  ;;  %v1334_v11 = vpack.c.bf16 %v812_v7, %v812_v7  ;;  %v629_v13 = vadd.f32 %v1858_v26, %v1693_v36  ;;  %1135 = vst.msk [vmem:[%s2045_s3 + $0x58] sm:$0xf] %vm1112_vm3, %v1336_v5  ;;  %vm687_vm0 = vcmp.gt.f32.partialorder %v501_v8, 0.0  ;;  %v493_v15 = vadd.f32 %v1693_v36, %v1874_v33  ;;  %v521_v54 = vpop.f32.mrf.mxu0  ;;  %v649_v55 = vpop.f32.mrf.mxu1 }
 0x10d   :  { %1167 = vst.msk [vmem:[%s2045_s3 + $0xd8] sm:$0xf] %vm1112_vm3, %v1368_v6  ;;  %v751_v14 = vmul.f32 0.2, %v501_v8  ;;  %v621_v16 = vadd.f32 %v1693_v36, %v1876_v34  ;;  %v844_v17 = vsel %vm716_vm15, %v618_v4, %v780_v12  ;;  %v514_v19 = vadd.f32 %v1448_v43, %v1693_v36 }
 0x10e   :  { %1133 = vst.msk [vmem:[%s2045_s3 + $0x50] sm:$0xf] %vm1112_vm3, %v1334_v11  ;;  %vm719_vm1 = vcmp.gt.f32.partialorder %v629_v13, 0.0  ;;  %v783_v18 = vmul.f32 0.2, %v629_v13  ;;  %v1366_v20 = vpack.c.bf16 %v844_v17, %v844_v17  ;;  %vm685_vm2 = vcmp.gt.f32.partialorder %v493_v15, 0.0  ;;  %v1453_v5 = vpop.f32.mrf.mxu0  ;;  %v1485_v6 = vpop.f32.mrf.mxu1 }
 0x10f   :  { %v815_v21 = vsel %vm687_vm0, %v501_v8, %v751_v14  ;;  %v749_v22 = vmul.f32 0.2, %v493_v15  ;;  %vm717_vm4 = vcmp.gt.f32.partialorder %v621_v16, 0.0  ;;  %v781_v27 = vmul.f32 0.2, %v621_v16 }
 0x110   :  { %v1337_v25 = vpack.c.bf16 %v815_v21, %v815_v21  ;;  %v847_v26 = vsel %vm719_vm1, %v629_v13, %v783_v18  ;;  %1165 = vst.msk [vmem:[%s2045_s3 + $0xd0] sm:$0xf] %vm1112_vm3, %v1366_v20  ;;  %vm690_vm5 = vcmp.gt.f32.partialorder %v514_v19, 0.0  ;;  %v754_v30 = vmul.f32 0.2, %v514_v19  ;;  %v652_v20 = vpop.f32.mrf.mxu1 }
 0x111   :  { %v1369_v28 = vpack.c.bf16 %v847_v26, %v847_v26  ;;  %v813_v29 = vsel %vm685_vm2, %v493_v15, %v749_v22  ;;  %v845_v32 = vsel %vm717_vm4, %v621_v16, %v781_v27  ;;  %v642_v33 = vadd.f32 %v1878_v44, %v1693_v36 }
 0x112   :  { %1136 = vst.msk [vmem:[%s2045_s3 + $0x5c] sm:$0xf] %vm1112_vm3, %v1337_v25  ;;  %v1335_v31 = vpack.c.bf16 %v813_v29, %v813_v29  ;;  %v506_v34 = vadd.f32 %v1693_v36, %v505_v57  ;;  %v1367_v35 = vpack.c.bf16 %v845_v32, %v845_v32  ;;  %v818_v37 = vsel %vm690_vm5, %v514_v19, %v754_v30  ;;  %v524_v19 = vpop.f32.mrf.mxu0 }
 0x113   :  { %1168 = vst.msk [vmem:[%s2045_s3 + $0xdc] sm:$0xf] %vm1112_vm3, %v1369_v28  ;;  %v634_v38 = vadd.f32 %v1693_v36, %v633_v58  ;;  %v517_v39 = vadd.f32 %v1449_v9, %v1693_v36  ;;  %v1340_v42 = vpack.c.bf16 %v818_v37, %v818_v37  ;;  %vm722_vm6 = vcmp.gt.f32.partialorder %v642_v33, 0.0 }
 0x114   :  { %1134 = vst.msk [vmem:[%s2045_s3 + $0x54] sm:$0xf] %vm1112_vm3, %v1335_v31  ;;  %v786_v43 = vmul.f32 0.2, %v642_v33  ;;  %vm688_vm7 = vcmp.gt.f32.partialorder %v506_v34, 0.0  ;;  %v645_v48 = vadd.f32 %v1481_v10, %v1693_v36  ;;  %v509_v49 = vadd.f32 %v1693_v36, %v508_v23 }
 0x115   :  { %1166 = vst.msk [vmem:[%s2045_s3 + $0xd4] sm:$0xf] %vm1112_vm3, %v1367_v35  ;;  %v752_v44 = vmul.f32 0.2, %v506_v34  ;;  %vm720_vm8 = vcmp.gt.f32.partialorder %v634_v38, 0.0  ;;  %vm691_vm9 = vcmp.gt.f32.partialorder %v517_v39, 0.0  ;;  %v637_v53 = vadd.f32 %v1693_v36, %v636_v24 }
 0x116   :  { %v784_v45 = vmul.f32 0.2, %v634_v38  ;;  %1139 = vst.msk [vmem:[%s2045_s3 + $0x68] sm:$0xf] %vm1112_vm3, %v1340_v42  ;;  %v850_v46 = vsel %vm722_vm6, %v642_v33, %v786_v43  ;;  %v755_v47 = vmul.f32 0.2, %v517_v39  ;;  %v530_v63 = vadd.f32 %v1452_v40, %v1693_v36 }
 0x117   :  { %v1372_v50 = vpack.c.bf16 %v850_v46, %v850_v46  ;;  %v816_v51 = vsel %vm688_vm7, %v506_v34, %v752_v44  ;;  %vm723_vm10 = vcmp.gt.f32.partialorder %v645_v48, 0.0  ;;  %v787_v60 = vmul.f32 0.2, %v645_v48 }
 0x118   :  { %v848_v52 = vsel %vm720_vm8, %v634_v38, %v784_v45  ;;  %v1338_v56 = vpack.c.bf16 %v816_v51, %v816_v51  ;;  %v819_v58 = vsel %vm691_vm9, %v517_v39, %v755_v47  ;;  %vm689_vm11 = vcmp.gt.f32.partialorder %v509_v49, 0.0 }
 0x119   :  { %v1370_v57 = vpack.c.bf16 %v848_v52, %v848_v52  ;;  %1171 = vst.msk [vmem:[%s2045_s3 + $0xe8] sm:$0xf] %vm1112_vm3, %v1372_v50  ;;  %v1341_v59 = vpack.c.bf16 %v819_v58, %v819_v58  ;;  %v753_v61 = vmul.f32 0.2, %v509_v49  ;;  %vm721_vm12 = vcmp.gt.f32.partialorder %v637_v53, 0.0 }
 0x11a   :  { %1137 = vst.msk [vmem:[%s2045_s3 + $0x60] sm:$0xf] %vm1112_vm3, %v1338_v56  ;;  %v785_v62 = vmul.f32 0.2, %v637_v53  ;;  %v658_v0 = vadd.f32 %v1484_v41, %v1693_v36  ;;  %v851_v1 = vsel %vm723_vm10, %v645_v48, %v787_v60  ;;  %v522_v3 = vadd.f32 %v1693_v36, %v521_v54 }
 0x11b   :  { %1169 = vst.msk [vmem:[%s2045_s3 + $0xe0] sm:$0xf] %vm1112_vm3, %v1370_v57  ;;  %1140 = vst.msk [vmem:[%s2045_s3 + $0x6c] sm:$0xf] %vm1112_vm3, %v1341_v59  ;;  %v817_v2 = vsel %vm689_vm11, %v509_v49, %v753_v61  ;;  %v650_v4 = vadd.f32 %v1693_v36, %v649_v55  ;;  %v1373_v7 = vpack.c.bf16 %v851_v1, %v851_v1  ;;  %vm694_vm13 = vcmp.gt.f32.partialorder %v530_v63, 0.0 }
 0x11c   :  { %v1339_v8 = vpack.c.bf16 %v817_v2, %v817_v2  ;;  %v849_v9 = vsel %vm721_vm12, %v637_v53, %v785_v62  ;;  %v758_v11 = vmul.f32 0.2, %v530_v63  ;;  %vm726_vm14 = vcmp.gt.f32.partialorder %v658_v0, 0.0 }
 0x11d   :  { %v1371_v10 = vpack.c.bf16 %v849_v9, %v849_v9  ;;  %v790_v12 = vmul.f32 0.2, %v658_v0  ;;  %1172 = vst.msk [vmem:[%s2045_s3 + $0xec] sm:$0xf] %vm1112_vm3, %v1373_v7  ;;  %vm692_vm15 = vcmp.gt.f32.partialorder %v522_v3, 0.0  ;;  %vm724_vm0 = vcmp.gt.f32.partialorder %v650_v4, 0.0 }
 0x11e   :  { %1138 = vst.msk [vmem:[%s2045_s3 + $0x64] sm:$0xf] %vm1112_vm3, %v1339_v8  ;;  %v756_v13 = vmul.f32 0.2, %v522_v3  ;;  %v788_v14 = vmul.f32 0.2, %v650_v4  ;;  %v822_v15 = vsel %vm694_vm13, %v530_v63, %v758_v11  ;;  %v533_v17 = vadd.f32 %v1453_v5, %v1693_v36 }
 0x11f   :  { %1170 = vst.msk [vmem:[%s2045_s3 + $0xe4] sm:$0xf] %vm1112_vm3, %v1371_v10  ;;  %v854_v16 = vsel %vm726_vm14, %v658_v0, %v790_v12  ;;  %v661_v18 = vadd.f32 %v1485_v6, %v1693_v36  ;;  %v1344_v21 = vpack.c.bf16 %v822_v15, %v822_v15  ;;  %v525_v29 = vadd.f32 %v1693_v36, %v524_v19 }
 0x120   :  { %v1376_v22 = vpack.c.bf16 %v854_v16, %v854_v16  ;;  %v820_v23 = vsel %vm692_vm15, %v522_v3, %v756_v13  ;;  %v852_v24 = vsel %vm724_vm0, %v650_v4, %v788_v14  ;;  %vm695_vm1 = vcmp.gt.f32.partialorder %v533_v17, 0.0 }
 0x121   :  { %v1342_v25 = vpack.c.bf16 %v820_v23, %v820_v23  ;;  %v1374_v26 = vpack.c.bf16 %v852_v24, %v852_v24  ;;  %v759_v27 = vmul.f32 0.2, %v533_v17  ;;  %1143 = vst.msk [vmem:[%s2045_s3 + $0x78] sm:$0xf] %vm1112_vm3, %v1344_v21  ;;  %vm727_vm2 = vcmp.gt.f32.partialorder %v661_v18, 0.0 }
 0x122   :  { %1175 = vst.msk [vmem:[%s2045_s3 + $0xf8] sm:$0xf] %vm1112_vm3, %v1376_v22  ;;  %v791_v28 = vmul.f32 0.2, %v661_v18  ;;  %v653_v30 = vadd.f32 %v1693_v36, %v652_v20  ;;  %vm693_vm4 = vcmp.gt.f32.partialorder %v525_v29, 0.0 }
 0x123   :  { %1141 = vst.msk [vmem:[%s2045_s3 + $0x70] sm:$0xf] %vm1112_vm3, %v1342_v25  ;;  %1173 = vst.msk [vmem:[%s2045_s3 + $0xf0] sm:$0xf] %vm1112_vm3, %v1374_v26  ;;  %v823_v31 = vsel %vm695_vm1, %v533_v17, %v759_v27  ;;  %v757_v34 = vmul.f32 0.2, %v525_v29 }
 0x124   :  { %v1345_v32 = vpack.c.bf16 %v823_v31, %v823_v31  ;;  %v855_v33 = vsel %vm727_vm2, %v661_v18, %v791_v28  ;;  %vm725_vm5 = vcmp.gt.f32.partialorder %v653_v30, 0.0  ;;  %v789_v37 = vmul.f32 0.2, %v653_v30 }
 0x125   :  { %v1377_v35 = vpack.c.bf16 %v855_v33, %v855_v33  ;;  %v821_v36 = vsel %vm693_vm4, %v525_v29, %v757_v34 }
 0x126   :  { %1144 = vst.msk [vmem:[%s2045_s3 + $0x7c] sm:$0xf] %vm1112_vm3, %v1345_v32  ;;  %v1343_v38 = vpack.c.bf16 %v821_v36, %v821_v36  ;;  %v853_v39 = vsel %vm725_vm5, %v653_v30, %v789_v37 }
 0x127   :  { %1176 = vst.msk [vmem:[%s2045_s3 + $0xfc] sm:$0xf] %vm1112_vm3, %v1377_v35  ;;  %v1375_v40 = vpack.c.bf16 %v853_v39, %v853_v39 }
 0x128   :  { %1142 = vst.msk [vmem:[%s2045_s3 + $0x74] sm:$0xf] %vm1112_vm3, %v1343_v38 }
 0x129   :  { %1174 = vst.msk [vmem:[%s2045_s3 + $0xf4] sm:$0xf] %vm1112_vm3, %v1375_v40 }

// kernel: discriminator_forward.6
= control target key start
LH: loop header
LB: loop body
LE: loop exit
PB: predicated region body
PF: predicated region fallthrough
CT: control target
= control target key end

     0   :  { %s1067_s9 = smov 0   ;;  %s1274_s0 = inlined_call_operand.vmem [shape: bf16[2,64,512], index: 0, kind: input, shape index: {}]   ;;  %s1275_s1 = inlined_call_operand.vmem [shape: bf16[512,64], index: 1, kind: input, shape index: {}]   ;;  %s1276_s2 = inlined_call_operand.vmem [shape: bf16[2,64,64], index: 2, kind: output, shape index: {}]  }
   0x1 LB: > { %s821_s10 = sadd.s32 4294967295, %s1050_s9   ;;  %p825_p0 = scmp.ge.s32.totalorder %s1050_s9, 1  ;;  %s1050_s9 = sphi %s1067_s9, %s12_s9  }
   0x2   : > { %p112_p1 = scmp.lt.s32.totalorder %s1050_s9, 3 }
   0x4   : > { %p113_p2 = pnand %p825_p0, %p112_p1 }
   0x5   : > { %p134_p3 = scmp.lt.s32.totalorder (!%p113_p2), %s821_s10, 1 }
   0x6   : > { %116 = sbr.rel (%p113_p2) target bundleno = 326 (0x146), region = 28 }
   0xb   : > { %v986_v0 = vld [vmem:[%s1275_s1 + $0x78] sm:$0xff]   ;;  %v990_v4 = vld [vmem:[%s1275_s1 + $0x70] sm:$0xff]   ;;  %v994_v8 = vld [vmem:[%s1275_s1 + $0x68] sm:$0xff]   ;;  %s1278_s10 = smov (!%p134_p3, %s821_s10), 1  ;;  %vm627_vm0 = vcmask 523264   ;;  %vm757_vm1 = vcmask 519168  }
   0xc   : > { %v987_v1 = vld [vmem:[%s1275_s1 + $0xf8] sm:$0xff]   ;;  %898 = vmatprep.subr.bf16.mxu0 %v986_v0  ;;  %v991_v5 = vld [vmem:[%s1275_s1 + $0xf0] sm:$0xff]   ;;  %v995_v9 = vld [vmem:[%s1275_s1 + $0xe8] sm:$0xff]   ;;  %s888_s13 = sshll.u32 %s1278_s10, 7  ;;  %s889_s27 = sshll.u32 %s1278_s10, 5 }
   0xd   : > { %v988_v2 = vld [vmem:[%s1275_s1 + $0x38] sm:$0xff]   ;;  %938 = vmatprep.subr.bf16.mxu1 %v987_v1  ;;  %v992_v6 = vld [vmem:[%s1275_s1 + $0x30] sm:$0xff]   ;;  %v996_v10 = vld [vmem:[%s1275_s1 + $0x28] sm:$0xff]   ;;  %s1175_s22 = scalar_lea.vmem %s1274_s0, %s888_s13  ;;  %s143_s10 = scalar_lea.vmem %s1276_s2, %s889_s27 }
   0xe   : > { %v989_v3 = vld [vmem:[%s1275_s1 + $0xb8] sm:$0xff]   ;;  %899 = vmatpush3.bf16.msra.mxu0 %v988_v2  ;;  %v993_v7 = vld [vmem:[%s1275_s1 + $0xb0] sm:$0xff]   ;;  %v997_v11 = vld [vmem:[%s1275_s1 + $0xa8] sm:$0xff]  }
   0xf   : > { %939 = vmatpush3.bf16.msra.mxu1 %v989_v3  ;;  %900 = vmatprep.subr.bf16.mxu0 %v990_v4  ;;  %v998_v12 = vld [vmem:[%s1275_s1 + $0x60] sm:$0xff]   ;;  %v1002_v16 = vld [vmem:[%s1275_s1 + $0x58] sm:$0xff]   ;;  %v1006_v20 = vld [vmem:[%s1275_s1 + $0x50] sm:$0xff]  }
  0x10   : > { %940 = vmatprep.subr.bf16.mxu1 %v991_v5  ;;  %v999_v13 = vld [vmem:[%s1275_s1 + $0xe0] sm:$0xff]   ;;  %v1003_v17 = vld [vmem:[%s1275_s1 + $0xd8] sm:$0xff]   ;;  %v1007_v21 = vld [vmem:[%s1275_s1 + $0xd0] sm:$0xff]  }
  0x11   : > { %v1000_v14 = vld [vmem:[%s1275_s1 + $0x20] sm:$0xff]   ;;  %v1004_v18 = vld [vmem:[%s1275_s1 + $0x18] sm:$0xff]   ;;  %v1008_v22 = vld [vmem:[%s1275_s1 + $0x10] sm:$0xff]  }
  0x12   : > { %901 = vmatpush3.bf16.msra.mxu0 %v992_v6  ;;  %v1001_v15 = vld [vmem:[%s1275_s1 + $0xa0] sm:$0xff]   ;;  %v1005_v19 = vld [vmem:[%s1275_s1 + $0x98] sm:$0xff]   ;;  %v1009_v23 = vld [vmem:[%s1275_s1 + $0x90] sm:$0xff]  }
  0x13   : > { %941 = vmatpush3.bf16.msra.mxu1 %v993_v7  ;;  %902 = vmatprep.subr.bf16.mxu0 %v994_v8  ;;  %v1010_v24 = vld [vmem:[%s1275_s1 + $0x48] sm:$0xff]   ;;  %v1014_v28 = vld [vmem:[%s1275_s1 + $0x40] sm:$0xff]  }
  0x14   : > { %942 = vmatprep.subr.bf16.mxu1 %v995_v9  ;;  %v1011_v25 = vld [vmem:[%s1275_s1 + $0xc8] sm:$0xff]   ;;  %v1015_v29 = vld [vmem:[%s1275_s1 + $0xc0] sm:$0xff]  }
  0x15   : > { %v1012_v26 = vld [vmem:[%s1275_s1 + $0x8] sm:$0xff]   ;;  %v1016_v30 = vld [vmem:[%s1275_s1] sm:$0xff]  }
  0x16   : > { %903 = vmatpush3.bf16.msra.mxu0 %v996_v10  ;;  %v1013_v27 = vld [vmem:[%s1275_s1 + $0x88] sm:$0xff]   ;;  %v1017_v31 = vld [vmem:[%s1275_s1 + $0x80] sm:$0xff]  }
  0x17   : > { %943 = vmatpush3.bf16.msra.mxu1 %v997_v11  ;;  %904 = vmatprep.subr.bf16.mxu0 %v998_v12  ;;  %v1018_v32 = vld [vmem:[%s1175_s22] ss:$16 sps:$4 sm:$0xff]   ;;  %v1020_v33 = vld [vmem:[%s1175_s22 + $0x4] ss:$16 sps:$4 sm:$0xff]   ;;  %v1021_v34 = vld [vmem:[%s1175_s22 + $0x8] ss:$16 sps:$4 sm:$0xff]  }
  0x18   : > { %944 = vmatprep.subr.bf16.mxu1 %v999_v13  ;;  %v1023_v35 = vld [vmem:[%s1175_s22 + $0xc] ss:$16 sps:$4 sm:$0xff]   ;;  %529 = vmatprep.mubr.bf16.mxu0 %v1020_v33  ;;  %v1024_v36 = vld [vmem:[%s1175_s22 + $0x24] ss:$16 sps:$4 sm:$0xff]   ;;  %v1028_v38 = vld [vmem:[%s1175_s22 + $0x20] ss:$16 sps:$4 sm:$0xff]  }
  0x19   : > { %594 = vmatprep.mubr.bf16.mxu1 %v1023_v35  ;;  %v1026_v37 = vld [vmem:[%s1175_s22 + $0x2c] ss:$16 sps:$4 sm:$0xff]   ;;  %v1029_v39 = vld [vmem:[%s1175_s22 + $0x28] ss:$16 sps:$4 sm:$0xff]   ;;  %v1030_v40 = vld [vmem:[%s1175_s22 + $0x44] ss:$16 sps:$4 sm:$0xff]  }
  0x1a   : > { %905 = vmatpush3.bf16.msra.mxu0 %v1000_v14  ;;  %v1032_v41 = vld [vmem:[%s1175_s22 + $0x4c] ss:$16 sps:$4 sm:$0xff]   ;;  %v1034_v42 = vld [vmem:[%s1175_s22 + $0x40] ss:$16 sps:$4 sm:$0xff]   ;;  %v1035_v43 = vld [vmem:[%s1175_s22 + $0x48] ss:$16 sps:$4 sm:$0xff]  }
  0x1b   : > { %945 = vmatpush3.bf16.msra.mxu1 %v1001_v15  ;;  %906 = vmatprep.subr.bf16.mxu0 %v1002_v16  ;;  %v1036_v44 = vld [vmem:[%s1175_s22 + $0x64] ss:$16 sps:$4 sm:$0xff]   ;;  %v1038_v45 = vld [vmem:[%s1175_s22 + $0x6c] ss:$16 sps:$4 sm:$0xff]   ;;  %v1040_v46 = vld [vmem:[%s1175_s22 + $0x60] ss:$16 sps:$4 sm:$0xff]  }
  0x1c   : > { %946 = vmatprep.subr.bf16.mxu1 %v1003_v17  ;;  %v1041_v47 = vld [vmem:[%s1175_s22 + $0x68] ss:$16 sps:$4 sm:$0xff]  }
  0x1e   : > { %907 = vmatpush3.bf16.msra.mxu0 %v1004_v18 }
  0x1f   : > { %947 = vmatpush3.bf16.msra.mxu1 %v1005_v19  ;;  %908 = vmatprep.subr.bf16.mxu0 %v1006_v20 }
  0x20   : > { %948 = vmatprep.subr.bf16.mxu1 %v1007_v21 }
  0x22   : > { %909 = vmatpush3.bf16.msra.mxu0 %v1008_v22 }
  0x23   : > { %949 = vmatpush3.bf16.msra.mxu1 %v1009_v23  ;;  %910 = vmatprep.subr.bf16.mxu0 %v1010_v24 }
  0x24   : > { %950 = vmatprep.subr.bf16.mxu1 %v1011_v25 }
  0x26   : > { %911 = vmatpush3.bf16.msra.mxu0 %v1012_v26 }
  0x27   : > { %951 = vmatpush3.bf16.msra.mxu1 %v1013_v27  ;;  %912 = vmatprep.subr.bf16.mxu0 %v1014_v28 }
  0x28   : > { %952 = vmatprep.subr.bf16.mxu1 %v1015_v29 }
  0x2a   : > { %913 = vmatpush3.bf16.msra.mxu0 %v1016_v30 }
  0x2b   : > { %953 = vmatpush3.bf16.msra.mxu1 %v1017_v31 }
  0x2d   : > { %530 = vmatmul.mubr.bf16.vlgmr.msra.gmra.mxu0 %v1018_v32 }
  0x2e   : > { %595 = vmatmul.mubr.bf16.vlgmr.msra.gmra.mxu1 %v1021_v34  ;;  %537 = vmatprep.mubr.bf16.mxu0 %v1024_v36 }
  0x2f   : > { %602 = vmatprep.mubr.bf16.mxu1 %v1026_v37 }
  0x35   : > { %538 = vmatmul.mubr.bf16.gmra.mxu0 %v1028_v38 }
  0x36   : > { %603 = vmatmul.mubr.bf16.gmra.mxu1 %v1029_v39  ;;  %545 = vmatprep.mubr.bf16.mxu0 %v1030_v40 }
  0x37   : > { %610 = vmatprep.mubr.bf16.mxu1 %v1032_v41 }
  0x3d   : > { %546 = vmatmul.mubr.bf16.gmra.mxu0 %v1034_v42 }
  0x3e   : > { %611 = vmatmul.mubr.bf16.gmra.mxu1 %v1035_v43  ;;  %553 = vmatprep.mubr.bf16.mxu0 %v1036_v44 }
  0x3f   : > { %618 = vmatprep.mubr.bf16.mxu1 %v1038_v45 }
  0x45   : > { %554 = vmatmul.mubr.bf16.gmra.mxu0 %v1040_v46 }
  0x46   : > { %619 = vmatmul.mubr.bf16.gmra.mxu1 %v1041_v47 }
  0xed   : > { %v914_v48 = vpop.f32.mrf.mxu0 }
  0xee   : > { %v954_v49 = vpop.f32.mrf.mxu1 }
  0xef   : > { %v915_v50 = vpop.f32.mrf.mxu0 }
  0xf0   : > { %v955_v51 = vpop.f32.mrf.mxu1  ;;  %v916_v63 = vadd.f32 %v915_v50, %v914_v48 }
  0xf1   : > { %v917_v52 = vpop.f32.mrf.mxu0  ;;  %v956_v0 = vadd.f32 %v955_v51, %v954_v49 }
  0xf2   : > { %v957_v53 = vpop.f32.mrf.mxu1 }
  0xf3   : > { %v918_v54 = vpop.f32.mrf.mxu0  ;;  %v1201_v10 = vadd.f32 %v956_v0, %v916_v63 }
  0xf4   : > { %v958_v55 = vpop.f32.mrf.mxu1  ;;  %v919_v60 = vadd.f32 %v918_v54, %v917_v52 }
  0xf5   : > { %v920_v56 = vpop.f32.mrf.mxu0  ;;  %v959_v61 = vadd.f32 %v958_v55, %v957_v53  ;;  %v650_v20 = vmul.f32 %v1201_v10, %v1201_v10  ;;  %v628_v26 = vsel %vm627_vm0, %v1201_v10, 0.0 }
  0xf6   : > { %v960_v57 = vpop.f32.mrf.mxu1 }
  0xf7   : > { %v921_v58 = vpop.f32.mrf.mxu0  ;;  %v1199_v6 = vadd.f32 %v959_v61, %v919_v60  ;;  %v658_v34 = vsel %vm627_vm0, %v650_v20, 0.0 }
  0xf8   : > { %v961_v59 = vpop.f32.mrf.mxu1  ;;  %v922_v2 = vadd.f32 %v921_v58, %v920_v56 }
  0xf9   : > { %v923_v62 = vpop.f32.mrf.mxu0  ;;  %v962_v3 = vadd.f32 %v961_v59, %v960_v57  ;;  %v651_v16 = vmul.f32 %v1199_v6, %v1199_v6  ;;  %v629_v22 = vsel %vm627_vm0, %v1199_v6, 0.0 }
  0xfa   : > { %v963_v1 = vpop.f32.mrf.mxu1  ;;  %v630_v35 = vadd.f32 %v629_v22, %v628_v26 }
  0xfb   : > { %v924_v4 = vpop.f32.mrf.mxu0  ;;  %v1203_v12 = vadd.f32 %v962_v3, %v922_v2  ;;  %v659_v29 = vsel %vm627_vm0, %v651_v16, 0.0 }
  0xfc   : > { %v964_v5 = vpop.f32.mrf.mxu1  ;;  %v925_v7 = vadd.f32 %v924_v4, %v923_v62  ;;  %v660_v42 = vadd.f32 %v659_v29, %v658_v34 }
  0xfd   : > { %v965_v8 = vadd.f32 %v964_v5, %v963_v1  ;;  %v926_v9 = vpop.f32.mrf.mxu0  ;;  %v652_v23 = vmul.f32 %v1203_v12, %v1203_v12  ;;  %v631_v30 = vsel %vm627_vm0, %v1203_v12, 0.0 }
  0xfe   : > { %v966_v11 = vpop.f32.mrf.mxu1  ;;  %v632_v43 = vadd.f32 %v631_v30, %v630_v35 }
  0xff   : > { %v927_v13 = vpop.f32.mrf.mxu0  ;;  %v1207_v17 = vadd.f32 %v965_v8, %v925_v7  ;;  %v661_v37 = vsel %vm627_vm0, %v652_v23, 0.0 }
 0x100   : > { %v928_v14 = vadd.f32 %v927_v13, %v926_v9  ;;  %v967_v15 = vpop.f32.mrf.mxu1  ;;  %v662_v51 = vadd.f32 %v661_v37, %v660_v42 }
 0x101   : > { %v968_v18 = vadd.f32 %v967_v15, %v966_v11  ;;  %v929_v19 = vpop.f32.mrf.mxu0  ;;  %v653_v31 = vmul.f32 %v1207_v17, %v1207_v17  ;;  %v633_v38 = vsel %vm627_vm0, %v1207_v17, 0.0 }
 0x102   : > { %v969_v21 = vpop.f32.mrf.mxu1  ;;  %v634_v52 = vadd.f32 %v633_v38, %v632_v43 }
 0x103   : > { %v1215_v24 = vadd.f32 %v968_v18, %v928_v14  ;;  %v930_v25 = vpop.f32.mrf.mxu0  ;;  %v663_v46 = vsel %vm627_vm0, %v653_v31, 0.0 }
 0x104   : > { %v931_v27 = vadd.f32 %v930_v25, %v929_v19  ;;  %v970_v28 = vpop.f32.mrf.mxu1  ;;  %v664_v58 = vadd.f32 %v663_v46, %v662_v51 }
 0x105   : > { %v971_v32 = vadd.f32 %v970_v28, %v969_v21  ;;  %v932_v33 = vpop.f32.mrf.mxu0  ;;  %v654_v39 = vmul.f32 %v1215_v24, %v1215_v24  ;;  %v635_v47 = vsel %vm627_vm0, %v1215_v24, 0.0 }
 0x106   : > { %v972_v36 = vpop.f32.mrf.mxu1  ;;  %v636_v59 = vadd.f32 %v635_v47, %v634_v52 }
 0x107   : > { %v1230_v40 = vadd.f32 %v971_v32, %v931_v27  ;;  %v933_v41 = vpop.f32.mrf.mxu0  ;;  %v665_v54 = vsel %vm627_vm0, %v654_v39, 0.0 }
 0x108   : > { %v934_v44 = vadd.f32 %v933_v41, %v932_v33  ;;  %v973_v45 = vpop.f32.mrf.mxu1  ;;  %v666_v2 = vadd.f32 %v665_v54, %v664_v58 }
 0x109   : > { %v655_v48 = vmul.f32 %v1230_v40, %v1230_v40  ;;  %v974_v49 = vadd.f32 %v973_v45, %v972_v36  ;;  %v935_v50 = vpop.f32.mrf.mxu0  ;;  %v637_v55 = vsel %vm627_vm0, %v1230_v40, 0.0 }
 0x10a   : > { %v975_v53 = vpop.f32.mrf.mxu1  ;;  %v638_v3 = vadd.f32 %v637_v55, %v636_v59 }
 0x10b   : > { %v621_v56 = vadd.f32 %v974_v49, %v934_v44  ;;  %v936_v57 = vpop.f32.mrf.mxu0  ;;  %v667_v62 = vsel %vm627_vm0, %v655_v48, 0.0 }
 0x10c   : > { %v937_v60 = vadd.f32 %v936_v57, %v935_v50  ;;  %v976_v61 = vpop.f32.mrf.mxu1  ;;  %v668_v7 = vadd.f32 %v667_v62, %v666_v2 }
 0x10d   : > { %v639_v63 = vsel %vm627_vm0, %v621_v56, 0.0  ;;  %v656_v0 = vmul.f32 %v621_v56, %v621_v56  ;;  %v977_v1 = vadd.f32 %v976_v61, %v975_v53 }
 0x10e   : > { %v640_v8 = vadd.f32 %v639_v63, %v638_v3 }
 0x10f   : > { %v669_v4 = vsel %vm627_vm0, %v656_v0, 0.0  ;;  %v624_v5 = vadd.f32 %v977_v1, %v937_v60 }
 0x110   : > { %v670_v13 = vadd.f32 %v669_v4, %v668_v7 }
 0x111   : > { %v641_v9 = vsel %vm627_vm0, %v624_v5, 0.0  ;;  %v657_v11 = vmul.f32 %v624_v5, %v624_v5 }
 0x112   : > { %v642_v14 = vadd.f32 %v641_v9, %v640_v8 }
 0x113   : > { %v671_v15 = vsel %vm627_vm0, %v657_v11, 0.0 }
 0x114   : > { %v643_v16 = vrot.slane %v642_v14, 4  ;;  %v672_v18 = vadd.f32 %v671_v15, %v670_v13 }
 0x116   : > { %v644_v19 = vadd.f32 %v643_v16, %v642_v14  ;;  %v673_v20 = vrot.slane %v672_v18, 4 }
 0x118   : > { %v645_v21 = vrot.slane %v644_v19, 2  ;;  %v674_v22 = vadd.f32 %v673_v20, %v672_v18 }
 0x11a   : > { %v646_v23 = vadd.f32 %v645_v21, %v644_v19  ;;  %v675_v25 = vrot.slane %v674_v22, 2 }
 0x11c   : > { %v647_v26 = vrot.slane %v646_v23, 1  ;;  %v676_v27 = vadd.f32 %v675_v25, %v674_v22 }
 0x11e   : > { %v648_v28 = vadd.f32 %v647_v26, %v646_v23  ;;  %v677_v29 = vrot.slane %v676_v27, 1 }
 0x120   : > { %v649_v30 = vmul.f32 0.015625, %v648_v28  ;;  %v678_v31 = vadd.f32 %v677_v29, %v676_v27 }
 0x122   : > { %v679_v32 = vmul.f32 0.015625, %v678_v31  ;;  %v680_v33 = vmul.f32 %v649_v30, %v649_v30  ;;  %v683_v37 = vsub.f32 %v1201_v10, %v649_v30  ;;  %v684_v38 = vsub.f32 %v1199_v6, %v649_v30 }
 0x123   : > { %v685_v39 = vsub.f32 %v1203_v12, %v649_v30  ;;  %v686_v41 = vsub.f32 %v1207_v17, %v649_v30  ;;  %v687_v43 = vsub.f32 %v1215_v24, %v649_v30  ;;  %v688_v44 = vsub.f32 %v1230_v40, %v649_v30 }
 0x124   : > { %v681_v34 = vsub.f32 %v679_v32, %v680_v33  ;;  %v689_v45 = vsub.f32 %v621_v56, %v649_v30  ;;  %v690_v46 = vsub.f32 %v624_v5, %v649_v30 }
 0x126   : > { %v682_v35 = vmax.f32 %v681_v34, 0.0 }
 0x128   : > { %v691_v36 = vadd.f32 1e-05, %v682_v35 }
 0x12a   : > { %1042 = vrsqrt.f32 %v691_v36 }
 0x137   : > { %v1043_v42 = vpop.eup %1042 }
 0x138   : > { %v693_v47 = vmul.f32 %v1043_v42, %v683_v37  ;;  %v694_v48 = vmul.f32 %v1043_v42, %v684_v38  ;;  %v695_v49 = vmul.f32 %v1043_v42, %v685_v39  ;;  %v696_v50 = vmul.f32 %v1043_v42, %v686_v41 }
 0x139   : > { %v697_v10 = vmul.f32 %v1043_v42, %v687_v43  ;;  %v698_v51 = vmul.f32 %v1043_v42, %v688_v44  ;;  %v699_v6 = vmul.f32 %v1043_v42, %v689_v45  ;;  %v700_v52 = vmul.f32 %v1043_v42, %v690_v46 }
 0x13a   : > { %vm701_vm2 = vcmp.gt.f32.partialorder %v693_v47, 0.0  ;;  %vm702_vm3 = vcmp.gt.f32.partialorder %v694_v48, 0.0  ;;  %vm703_vm4 = vcmp.gt.f32.partialorder %v695_v49, 0.0  ;;  %vm704_vm5 = vcmp.gt.f32.partialorder %v696_v50, 0.0 }
 0x13b   : > { %vm705_vm6 = vcmp.gt.f32.partialorder %v697_v10, 0.0  ;;  %vm706_vm7 = vcmp.gt.f32.partialorder %v698_v51, 0.0  ;;  %vm707_vm8 = vcmp.gt.f32.partialorder %v699_v6, 0.0  ;;  %vm708_vm9 = vcmp.gt.f32.partialorder %v700_v52, 0.0 }
 0x13c   : > { %v709_v12 = vmul.f32 0.2, %v693_v47  ;;  %v710_v17 = vmul.f32 0.2, %v694_v48  ;;  %v711_v24 = vmul.f32 0.2, %v695_v49 }
 0x13d   : > { %v712_v40 = vmul.f32 0.2, %v696_v50  ;;  %v713_v53 = vmul.f32 0.2, %v697_v10  ;;  %v714_v54 = vmul.f32 0.2, %v698_v51 }
 0x13e   : > { %v715_v55 = vmul.f32 0.2, %v699_v6  ;;  %v716_v56 = vmul.f32 0.2, %v700_v52  ;;  %v717_v57 = vsel %vm701_vm2, %v693_v47, %v709_v12  ;;  %v718_v58 = vsel %vm702_vm3, %v694_v48, %v710_v17 }
 0x13f   : > { %v719_v59 = vsel %vm703_vm4, %v695_v49, %v711_v24  ;;  %v720_v60 = vsel %vm704_vm5, %v696_v50, %v712_v40  ;;  %v721_v61 = vsel %vm705_vm6, %v697_v10, %v713_v53  ;;  %v722_v62 = vsel %vm706_vm7, %v698_v51, %v714_v54 }
 0x140   : > { %v723_v63 = vsel %vm707_vm8, %v699_v6, %v715_v55  ;;  %v724_v0 = vsel %vm708_vm9, %v700_v52, %v716_v56  ;;  %v890_v1 = vpack.c.bf16 %v717_v57, %v717_v57  ;;  %v891_v2 = vpack.c.bf16 %v718_v58, %v718_v58 }
 0x141   : > { %v892_v3 = vpack.c.bf16 %v719_v59, %v719_v59  ;;  %v893_v4 = vpack.c.bf16 %v720_v60, %v720_v60  ;;  %v894_v5 = vpack.c.bf16 %v721_v61, %v721_v61  ;;  %v895_v7 = vpack.c.bf16 %v722_v62, %v722_v62 }
 0x142   : > { %v896_v8 = vpack.c.bf16 %v723_v63, %v723_v63  ;;  %v897_v9 = vpack.c.bf16 %v724_v0, %v724_v0  ;;  %758 = vst.msk [vmem:[%s143_s10] sm:$0xf] %vm757_vm1, %v890_v1  ;;  %759 = vst.msk [vmem:[%s143_s10 + $0x4] sm:$0xf] %vm757_vm1, %v891_v2 }
 0x143   : > { %760 = vst.msk [vmem:[%s143_s10 + $0x8] sm:$0xf] %vm757_vm1, %v892_v3  ;;  %761 = vst.msk [vmem:[%s143_s10 + $0xc] sm:$0xf] %vm757_vm1, %v893_v4 }
 0x144   : > { %762 = vst.msk [vmem:[%s143_s10 + $0x10] sm:$0xf] %vm757_vm1, %v894_v5  ;;  %763 = vst.msk [vmem:[%s143_s10 + $0x14] sm:$0xf] %vm757_vm1, %v895_v7 }
 0x145   : > { %764 = vst.msk [vmem:[%s143_s10 + $0x18] sm:$0xf] %vm757_vm1, %v896_v8  ;;  %765 = vst.msk [vmem:[%s143_s10 + $0x1c] sm:$0xf] %vm757_vm1, %v897_v9 }
 0x146 PF: > { %s12_s9 = sadd.s32 1, %s1050_s9  }
 0x147   : > { %p9_p4 = scmp.ge.s32.totalorder %s12_s9, 4  }
 0x149   :  { %11 = sbr.rel (!%p9_p4) target bundleno = 1 (0x1), region = 58 }

// kernel: discriminator_forward.7
= control target key start
LH: loop header
LB: loop body
LE: loop exit
PB: predicated region body
PF: predicated region fallthrough
CT: control target
= control target key end

     0   :  { %s1246_s9 = smov 0   ;;  %s1473_s0 = inlined_call_operand.vmem [shape: bf16[2,16,1024], index: 0, kind: input, shape index: {}]   ;;  %s1474_s1 = inlined_call_operand.vmem [shape: bf16[1024,128], index: 1, kind: input, shape index: {}]   ;;  %s1475_s2 = inlined_call_operand.vmem [shape: bf16[2,16,128], index: 2, kind: output, shape index: {}]  }
   0x1 LB: > { %s967_s10 = sadd.s32 4294967295, %s1229_s9   ;;  %p971_p0 = scmp.ge.s32.totalorder %s1229_s9, 1  ;;  %s1229_s9 = sphi %s1246_s9, %s12_s9  }
   0x2   : > { %p112_p1 = scmp.lt.s32.totalorder %s1229_s9, 3 }
   0x4   : > { %p113_p2 = pnand %p971_p0, %p112_p1 }
   0x5   : > { %p134_p3 = scmp.lt.s32.totalorder (!%p113_p2), %s967_s10, 1 }
   0x6   : > { %116 = sbr.rel (%p113_p2) target bundleno = 328 (0x148), region = 28 }
   0xb   : > { %v1157_v0 = vld [vmem:[%s1474_s1 + $0x78] sm:$0xff]   ;;  %v1161_v4 = vld [vmem:[%s1474_s1 + $0x70] sm:$0xff]   ;;  %v1165_v8 = vld [vmem:[%s1474_s1 + $0x68] sm:$0xff]   ;;  %s1477_s10 = smov (!%p134_p3, %s967_s10), 1 }
   0xc   : > { %v1158_v1 = vld [vmem:[%s1474_s1 + $0xf8] sm:$0xff]   ;;  %1061 = vmatprep.subr.bf16.mxu0 %v1157_v0  ;;  %v1162_v5 = vld [vmem:[%s1474_s1 + $0xf0] sm:$0xff]   ;;  %v1166_v9 = vld [vmem:[%s1474_s1 + $0xe8] sm:$0xff]   ;;  %s1052_s13 = sshll.u32 %s1477_s10, 6 }
   0xd   : > { %v1159_v2 = vld [vmem:[%s1474_s1 + $0x38] sm:$0xff]   ;;  %1083 = vmatprep.subr.bf16.mxu1 %v1158_v1  ;;  %v1163_v6 = vld [vmem:[%s1474_s1 + $0x30] sm:$0xff]   ;;  %v1167_v10 = vld [vmem:[%s1474_s1 + $0x28] sm:$0xff]   ;;  %s1354_s22 = scalar_lea.vmem %s1473_s0, %s1052_s13 }
   0xe   : > { %v1160_v3 = vld [vmem:[%s1474_s1 + $0xb8] sm:$0xff]   ;;  %1062 = vmatpush3.bf16.msra.mxu0 %v1159_v2  ;;  %v1164_v7 = vld [vmem:[%s1474_s1 + $0xb0] sm:$0xff]   ;;  %v1168_v11 = vld [vmem:[%s1474_s1 + $0xa8] sm:$0xff]  }
   0xf   : > { %1084 = vmatpush3.bf16.msra.mxu1 %v1160_v3  ;;  %1063 = vmatprep.subr.bf16.mxu0 %v1161_v4  ;;  %v1169_v12 = vld [vmem:[%s1474_s1 + $0x60] sm:$0xff]   ;;  %v1173_v16 = vld [vmem:[%s1474_s1 + $0x58] sm:$0xff]   ;;  %v1177_v20 = vld [vmem:[%s1474_s1 + $0x50] sm:$0xff]  }
  0x10   : > { %1085 = vmatprep.subr.bf16.mxu1 %v1162_v5  ;;  %v1170_v13 = vld [vmem:[%s1474_s1 + $0xe0] sm:$0xff]   ;;  %v1174_v17 = vld [vmem:[%s1474_s1 + $0xd8] sm:$0xff]   ;;  %v1178_v21 = vld [vmem:[%s1474_s1 + $0xd0] sm:$0xff]  }
  0x11   : > { %v1171_v14 = vld [vmem:[%s1474_s1 + $0x20] sm:$0xff]   ;;  %v1175_v18 = vld [vmem:[%s1474_s1 + $0x18] sm:$0xff]   ;;  %v1179_v22 = vld [vmem:[%s1474_s1 + $0x10] sm:$0xff]  }
  0x12   : > { %1064 = vmatpush3.bf16.msra.mxu0 %v1163_v6  ;;  %v1172_v15 = vld [vmem:[%s1474_s1 + $0xa0] sm:$0xff]   ;;  %v1176_v19 = vld [vmem:[%s1474_s1 + $0x98] sm:$0xff]   ;;  %v1180_v23 = vld [vmem:[%s1474_s1 + $0x90] sm:$0xff]  }
  0x13   : > { %1086 = vmatpush3.bf16.msra.mxu1 %v1164_v7  ;;  %1065 = vmatprep.subr.bf16.mxu0 %v1165_v8  ;;  %v1181_v24 = vld [vmem:[%s1474_s1 + $0x48] sm:$0xff]   ;;  %v1185_v28 = vld [vmem:[%s1474_s1 + $0x40] sm:$0xff]   ;;  %v1189_v40 = vld [vmem:[%s1474_s1 + $0x178] sm:$0xff]  }
  0x14   : > { %1087 = vmatprep.subr.bf16.mxu1 %v1166_v9  ;;  %v1182_v25 = vld [vmem:[%s1474_s1 + $0xc8] sm:$0xff]   ;;  %v1186_v29 = vld [vmem:[%s1474_s1 + $0xc0] sm:$0xff]   ;;  %v1190_v41 = vld [vmem:[%s1474_s1 + $0x1f8] sm:$0xff]  }
  0x15   : > { %v1183_v26 = vld [vmem:[%s1474_s1 + $0x8] sm:$0xff]   ;;  %v1187_v30 = vld [vmem:[%s1474_s1] sm:$0xff]   ;;  %v1191_v42 = vld [vmem:[%s1474_s1 + $0x138] sm:$0xff]  }
  0x16   : > { %1066 = vmatpush3.bf16.msra.mxu0 %v1167_v10  ;;  %v1184_v27 = vld [vmem:[%s1474_s1 + $0x88] sm:$0xff]   ;;  %v1188_v31 = vld [vmem:[%s1474_s1 + $0x80] sm:$0xff]   ;;  %v1192_v43 = vld [vmem:[%s1474_s1 + $0x1b8] sm:$0xff]  }
  0x17   : > { %1088 = vmatpush3.bf16.msra.mxu1 %v1168_v11  ;;  %1067 = vmatprep.subr.bf16.mxu0 %v1169_v12  ;;  %v145_v32 = vld [vmem:[%s1354_s22] sm:$0xff]  ;;  %v146_v34 = vld [vmem:[%s1354_s22 + $0x8] sm:$0xff]  ;;  %v1193_v44 = vld [vmem:[%s1474_s1 + $0x170] sm:$0xff]  }
  0x18   : > { %1089 = vmatprep.subr.bf16.mxu1 %v1170_v13  ;;  %v149_v33 = vld [vmem:[%s1354_s22 + $0x20] sm:$0xff]  ;;  %v150_v37 = vld [vmem:[%s1354_s22 + $0x28] sm:$0xff]  ;;  %v1194_v45 = vld [vmem:[%s1474_s1 + $0x1f0] sm:$0xff]  }
  0x19   : > { %v976_v35 = vcombine.low %v145_v32, %v149_v33  ;;  %v977_v36 = vcombine.high %v145_v32, %v149_v33  ;;  %v978_v38 = vcombine.low %v146_v34, %v150_v37  ;;  %v979_v39 = vcombine.high %v146_v34, %v150_v37  ;;  %v1195_v46 = vld [vmem:[%s1474_s1 + $0x130] sm:$0xff]   ;;  %v1197_v48 = vld [vmem:[%s1474_s1 + $0x168] sm:$0xff]   ;;  %v1201_v52 = vld [vmem:[%s1474_s1 + $0x160] sm:$0xff]  }
  0x1a   : > { %1068 = vmatpush3.bf16.msra.mxu0 %v1171_v14  ;;  %v1196_v47 = vld [vmem:[%s1474_s1 + $0x1b0] sm:$0xff]   ;;  %v1198_v49 = vld [vmem:[%s1474_s1 + $0x1e8] sm:$0xff]   ;;  %v1202_v53 = vld [vmem:[%s1474_s1 + $0x1e0] sm:$0xff]  }
  0x1b   : > { %1090 = vmatpush3.bf16.msra.mxu1 %v1172_v15  ;;  %1069 = vmatprep.subr.bf16.mxu0 %v1173_v16  ;;  %v1199_v50 = vld [vmem:[%s1474_s1 + $0x128] sm:$0xff]   ;;  %v1203_v54 = vld [vmem:[%s1474_s1 + $0x120] sm:$0xff]   ;;  %v1205_v56 = vld [vmem:[%s1474_s1 + $0x158] sm:$0xff]  }
  0x1c   : > { %1091 = vmatprep.subr.bf16.mxu1 %v1174_v17  ;;  %737 = vmatprep.mubr.bf16.mxu0 %v977_v36  ;;  %v1200_v51 = vld [vmem:[%s1474_s1 + $0x1a8] sm:$0xff]   ;;  %v1204_v55 = vld [vmem:[%s1474_s1 + $0x1a0] sm:$0xff]   ;;  %v1206_v57 = vld [vmem:[%s1474_s1 + $0x1d8] sm:$0xff]  }
  0x1d   : > { %778 = vmatprep.mubr.bf16.mxu1 %v979_v39  ;;  %v1207_v58 = vld [vmem:[%s1474_s1 + $0x118] sm:$0xff]   ;;  %v1209_v60 = vld [vmem:[%s1474_s1 + $0x150] sm:$0xff]   ;;  %v1213_v0 = vld [vmem:[%s1474_s1 + $0x148] sm:$0xff]  }
  0x1e   : > { %1070 = vmatpush3.bf16.msra.mxu0 %v1175_v18  ;;  %v1208_v59 = vld [vmem:[%s1474_s1 + $0x198] sm:$0xff]   ;;  %v1210_v61 = vld [vmem:[%s1474_s1 + $0x1d0] sm:$0xff]   ;;  %v1214_v1 = vld [vmem:[%s1474_s1 + $0x1c8] sm:$0xff]  }
  0x1f   : > { %1092 = vmatpush3.bf16.msra.mxu1 %v1176_v19  ;;  %1071 = vmatprep.subr.bf16.mxu0 %v1177_v20  ;;  %v1211_v62 = vld [vmem:[%s1474_s1 + $0x110] sm:$0xff]   ;;  %v1215_v2 = vld [vmem:[%s1474_s1 + $0x108] sm:$0xff]   ;;  %v1217_v4 = vld [vmem:[%s1474_s1 + $0x140] sm:$0xff]  }
  0x20   : > { %1093 = vmatprep.subr.bf16.mxu1 %v1178_v21  ;;  %v1212_v63 = vld [vmem:[%s1474_s1 + $0x190] sm:$0xff]   ;;  %v1216_v3 = vld [vmem:[%s1474_s1 + $0x188] sm:$0xff]   ;;  %v1218_v5 = vld [vmem:[%s1474_s1 + $0x1c0] sm:$0xff]  }
  0x21   : > { %v1219_v6 = vld [vmem:[%s1474_s1 + $0x100] sm:$0xff]   ;;  %v147_v8 = vld [vmem:[%s1354_s22 + $0x10] sm:$0xff]  ;;  %v148_v12 = vld [vmem:[%s1354_s22 + $0x18] sm:$0xff] }
  0x22   : > { %1072 = vmatpush3.bf16.msra.mxu0 %v1179_v22  ;;  %v1220_v7 = vld [vmem:[%s1474_s1 + $0x180] sm:$0xff]   ;;  %v151_v9 = vld [vmem:[%s1354_s22 + $0x30] sm:$0xff]  ;;  %v152_v13 = vld [vmem:[%s1354_s22 + $0x38] sm:$0xff]  ;;  %s1053_s22 = sshll.u32 %s1477_s10, 3 }
  0x23   : > { %1094 = vmatpush3.bf16.msra.mxu1 %v1180_v23  ;;  %1073 = vmatprep.subr.bf16.mxu0 %v1181_v24  ;;  %v980_v10 = vcombine.low %v147_v8, %v151_v9  ;;  %v981_v11 = vcombine.high %v147_v8, %v151_v9  ;;  %v982_v14 = vcombine.low %v148_v12, %v152_v13  ;;  %s143_s17 = scalar_lea.vmem %s1475_s2, %s1053_s22 }
  0x24   : > { %1095 = vmatprep.subr.bf16.mxu1 %v1182_v25  ;;  %v983_v15 = vcombine.high %v148_v12, %v152_v13 }
  0x26   : > { %1074 = vmatpush3.bf16.msra.mxu0 %v1183_v26 }
  0x27   : > { %1096 = vmatpush3.bf16.msra.mxu1 %v1184_v27  ;;  %1075 = vmatprep.subr.bf16.mxu0 %v1185_v28 }
  0x28   : > { %1097 = vmatprep.subr.bf16.mxu1 %v1186_v29 }
  0x2a   : > { %1076 = vmatpush3.bf16.msra.mxu0 %v1187_v30 }
  0x2b   : > { %1098 = vmatpush3.bf16.msra.mxu1 %v1188_v31  ;;  %1105 = vmatprep.subr.bf16.mxu0 %v1189_v40 }
  0x2c   : > { %1127 = vmatprep.subr.bf16.mxu1 %v1190_v41 }
  0x2d   : > { %738 = vmatmul.mubr.bf16.vlgmr.msra.gmra.mxu0 %v976_v35 }
  0x2e   : > { %779 = vmatmul.mubr.bf16.vlgmr.msra.gmra.mxu1 %v978_v38  ;;  %1106 = vmatpush3.bf16.msra.mxu0 %v1191_v42 }
  0x2f   : > { %1128 = vmatpush3.bf16.msra.mxu1 %v1192_v43  ;;  %1107 = vmatprep.subr.bf16.mxu0 %v1193_v44 }
  0x30   : > { %1129 = vmatprep.subr.bf16.mxu1 %v1194_v45  ;;  %819 = vmatprep.mubr.bf16.mxu0 %v981_v11 }
  0x31   : > { %860 = vmatprep.mubr.bf16.mxu1 %v983_v15 }
  0x32   : > { %1108 = vmatpush3.bf16.msra.mxu0 %v1195_v46 }
  0x33   : > { %1130 = vmatpush3.bf16.msra.mxu1 %v1196_v47  ;;  %1109 = vmatprep.subr.bf16.mxu0 %v1197_v48 }
  0x34   : > { %1131 = vmatprep.subr.bf16.mxu1 %v1198_v49 }
  0x36   : > { %1110 = vmatpush3.bf16.msra.mxu0 %v1199_v50 }
  0x37   : > { %1132 = vmatpush3.bf16.msra.mxu1 %v1200_v51  ;;  %1111 = vmatprep.subr.bf16.mxu0 %v1201_v52 }
  0x38   : > { %1133 = vmatprep.subr.bf16.mxu1 %v1202_v53 }
  0x3a   : > { %1112 = vmatpush3.bf16.msra.mxu0 %v1203_v54 }
  0x3b   : > { %1134 = vmatpush3.bf16.msra.mxu1 %v1204_v55  ;;  %1113 = vmatprep.subr.bf16.mxu0 %v1205_v56 }
  0x3c   : > { %1135 = vmatprep.subr.bf16.mxu1 %v1206_v57 }
  0x3e   : > { %1114 = vmatpush3.bf16.msra.mxu0 %v1207_v58 }
  0x3f   : > { %1136 = vmatpush3.bf16.msra.mxu1 %v1208_v59  ;;  %1115 = vmatprep.subr.bf16.mxu0 %v1209_v60 }
  0x40   : > { %1137 = vmatprep.subr.bf16.mxu1 %v1210_v61 }
  0x42   : > { %1116 = vmatpush3.bf16.msra.mxu0 %v1211_v62 }
  0x43   : > { %1138 = vmatpush3.bf16.msra.mxu1 %v1212_v63  ;;  %1117 = vmatprep.subr.bf16.mxu0 %v1213_v0 }
  0x44   : > { %1139 = vmatprep.subr.bf16.mxu1 %v1214_v1 }
  0x46   : > { %1118 = vmatpush3.bf16.msra.mxu0 %v1215_v2 }
  0x47   : > { %1140 = vmatpush3.bf16.msra.mxu1 %v1216_v3  ;;  %1119 = vmatprep.subr.bf16.mxu0 %v1217_v4 }
  0x48   : > { %1141 = vmatprep.subr.bf16.mxu1 %v1218_v5 }
  0x4a   : > { %1120 = vmatpush3.bf16.msra.mxu0 %v1219_v6 }
  0x4b   : > { %1142 = vmatpush3.bf16.msra.mxu1 %v1220_v7 }
  0x4d   : > { %820 = vmatmul.mubr.bf16.vlgmr.msra.gmra.mxu0 %v980_v10 }
  0x4e   : > { %861 = vmatmul.mubr.bf16.vlgmr.msra.gmra.mxu1 %v982_v14 }
  0xed   : > { %v1077_v16 = vpop.f32.mrf.mxu0 }
  0xee   : > { %v1099_v17 = vpop.f32.mrf.mxu1 }
  0xef   : > { %v1078_v18 = vpop.f32.mrf.mxu0 }
  0xf0   : > { %v1100_v19 = vpop.f32.mrf.mxu1  ;;  %v1079_v23 = vadd.f32 %v1078_v18, %v1077_v16 }
  0xf1   : > { %v1080_v20 = vpop.f32.mrf.mxu0  ;;  %v1101_v24 = vadd.f32 %v1100_v19, %v1099_v17 }
  0xf2   : > { %v1102_v21 = vpop.f32.mrf.mxu1 }
  0xf3   : > { %v1081_v22 = vpop.f32.mrf.mxu0  ;;  %v781_v29 = vadd.f32 %v1101_v24, %v1079_v23 }
  0xf4   : > { %v1103_v25 = vpop.f32.mrf.mxu1  ;;  %v1082_v30 = vadd.f32 %v1081_v22, %v1080_v20 }
  0xf5   : > { %v1104_v31 = vadd.f32 %v1103_v25, %v1102_v21 }
  0xf7   : > { %v784_v38 = vadd.f32 %v1104_v31, %v1082_v30 }
 0x10d   : > { %v1121_v26 = vpop.f32.mrf.mxu0 }
 0x10e   : > { %v1143_v27 = vpop.f32.mrf.mxu1 }
 0x10f   : > { %v1122_v28 = vpop.f32.mrf.mxu0 }
 0x110   : > { %v1123_v32 = vadd.f32 %v1122_v28, %v1121_v26  ;;  %v1144_v33 = vpop.f32.mrf.mxu1 }
 0x111   : > { %v1124_v34 = vpop.f32.mrf.mxu0  ;;  %v1145_v39 = vadd.f32 %v1144_v33, %v1143_v27 }
 0x112   : > { %v822_v35 = vadd.f32 %v1123_v32, %v781_v29  ;;  %v1146_v36 = vpop.f32.mrf.mxu1 }
 0x113   : > { %v1125_v37 = vpop.f32.mrf.mxu0 }
 0x114   : > { %v1126_v40 = vadd.f32 %v1125_v37, %v1124_v34  ;;  %v1147_v41 = vpop.f32.mrf.mxu1  ;;  %v863_v42 = vadd.f32 %v1145_v39, %v822_v35 }
 0x115   : > { %v1148_v44 = vadd.f32 %v1147_v41, %v1146_v36 }
 0x116   : > { %v825_v43 = vadd.f32 %v1126_v40, %v784_v38  ;;  %v877_v46 = vmul.f32 %v863_v42, %v863_v42 }
 0x118   : > { %v866_v45 = vadd.f32 %v1148_v44, %v825_v43 }
 0x11a   : > { %v869_v47 = vadd.f32 %v866_v45, %v863_v42  ;;  %v878_v48 = vmul.f32 %v866_v45, %v866_v45 }
 0x11c   : > { %v870_v49 = vrot.slane %v869_v47, 4  ;;  %v879_v50 = vadd.f32 %v878_v48, %v877_v46 }
 0x11e   : > { %v871_v51 = vadd.f32 %v870_v49, %v869_v47  ;;  %v880_v52 = vrot.slane %v879_v50, 4 }
 0x120   : > { %v872_v53 = vrot.slane %v871_v51, 2  ;;  %v881_v54 = vadd.f32 %v880_v52, %v879_v50 }
 0x122   : > { %v873_v55 = vadd.f32 %v872_v53, %v871_v51  ;;  %v882_v56 = vrot.slane %v881_v54, 2 }
 0x124   : > { %v874_v57 = vrot.slane %v873_v55, 1  ;;  %v883_v58 = vadd.f32 %v882_v56, %v881_v54 }
 0x126   : > { %v875_v59 = vadd.f32 %v874_v57, %v873_v55  ;;  %v884_v60 = vrot.slane %v883_v58, 1 }
 0x128   : > { %v876_v61 = vmul.f32 0.0625, %v875_v59  ;;  %v885_v62 = vadd.f32 %v884_v60, %v883_v58 }
 0x12a   : > { %v886_v63 = vmul.f32 0.0625, %v885_v62  ;;  %v887_v0 = vmul.f32 %v876_v61, %v876_v61  ;;  %v890_v4 = vsub.f32 %v863_v42, %v876_v61  ;;  %v891_v5 = vsub.f32 %v866_v45, %v876_v61 }
 0x12c   : > { %v888_v1 = vsub.f32 %v886_v63, %v887_v0 }
 0x12e   : > { %v889_v2 = vmax.f32 %v888_v1, 0.0 }
 0x130   : > { %v892_v3 = vadd.f32 1e-05, %v889_v2 }
 0x132   : > { %1221 = vrsqrt.f32 %v892_v3 }
 0x13f   : > { %v1222_v6 = vpop.eup %1221 }
 0x140   : > { %v894_v7 = vmul.f32 %v1222_v6, %v890_v4  ;;  %v895_v8 = vmul.f32 %v1222_v6, %v891_v5 }
 0x142   : > { %vm896_vm0 = vcmp.gt.f32.partialorder %v894_v7, 0.0  ;;  %vm897_vm1 = vcmp.gt.f32.partialorder %v895_v8, 0.0  ;;  %v898_v9 = vmul.f32 0.2, %v894_v7  ;;  %v899_v10 = vmul.f32 0.2, %v895_v8 }
 0x144   : > { %v900_v11 = vsel %vm896_vm0, %v894_v7, %v898_v9  ;;  %v901_v12 = vsel %vm897_vm1, %v895_v8, %v899_v10 }
 0x145   : > { %v1059_v13 = vpack.c.bf16 %v901_v12, %v900_v11 }
 0x147   : > { %1060 = vst [vmem:[%s143_s17] sm:$0xff] %v1059_v13  }
 0x148 PF: > { %s12_s9 = sadd.s32 1, %s1229_s9  }
 0x149   : > { %p9_p4 = scmp.ge.s32.totalorder %s12_s9, 4  }
 0x14b   :  { %11 = sbr.rel (!%p9_p4) target bundleno = 1 (0x1), region = 58 }

// kernel: discriminator_forward.8
= control target key start
LH: loop header
LB: loop body
LE: loop exit
PB: predicated region body
PF: predicated region fallthrough
CT: control target
= control target key end

     0   :  { %s2977_s9 = smov 0   ;;  %s3865_s0 = inlined_call_operand.vmem [shape: bf16[2,9,2048], index: 0, kind: input, shape index: {}]   ;;  %s3866_s1 = inlined_call_operand.vmem [shape: bf16[2048,256], index: 1, kind: input, shape index: {}]   ;;  %s3867_s2 = inlined_call_operand.vmem [shape: bf16[2,9,256], index: 2, kind: output, shape index: {}]  }
   0x1 LB: > { %s2269_s10 = sadd.s32 4294967295, %s2960_s9   ;;  %p2273_p0 = scmp.ge.s32.totalorder %s2960_s9, 1  ;;  %s2960_s9 = sphi %s2977_s9, %s12_s9  }
   0x2   : > { %p112_p1 = scmp.lt.s32.totalorder %s2960_s9, 3 }
   0x4   : > { %p113_p2 = pnand %p2273_p0, %p112_p1 }
   0x5   : > { %p134_p3 = scmp.lt.s32.totalorder (!%p113_p2), %s2269_s10, 1 }
   0x6   : > { %116 = sbr.rel (%p113_p2) target bundleno = 519 (0x207), region = 28 }
   0xb   : > { %v2566_v0 = vld [vmem:[%s3866_s1 + $0x74] ss:$8 sps:$4 sm:$0xff]   ;;  %v2570_v2 = vld [vmem:[%s3866_s1 + $0x70] ss:$8 sps:$4 sm:$0xff]   ;;  %v2572_v4 = vld [vmem:[%s3866_s1 + $0x64] ss:$8 sps:$4 sm:$0xff]  }
   0xc   : > { %v2568_v1 = vld [vmem:[%s3866_s1 + $0x174] ss:$8 sps:$4 sm:$0xff]   ;;  %1776 = vmatprep.subr.bf16.mxu0 %v2566_v0  ;;  %v2571_v3 = vld [vmem:[%s3866_s1 + $0x170] ss:$8 sps:$4 sm:$0xff]   ;;  %v2574_v5 = vld [vmem:[%s3866_s1 + $0x164] ss:$8 sps:$4 sm:$0xff]  }
   0xd   : > { %1819 = vmatprep.subr.bf16.mxu1 %v2568_v1  ;;  %1777 = vmatpush1.bf16.msra.mxu0 %v2570_v2  ;;  %v2576_v6 = vld [vmem:[%s3866_s1 + $0x60] ss:$8 sps:$4 sm:$0xff]   ;;  %v2578_v8 = vld [vmem:[%s3866_s1 + $0x54] ss:$8 sps:$4 sm:$0xff]   ;;  %v2582_v10 = vld [vmem:[%s3866_s1 + $0x50] ss:$8 sps:$4 sm:$0xff]  }
   0xe   : > { %1820 = vmatpush1.bf16.msra.mxu1 %v2571_v3  ;;  %1778 = vmatprep.subr.bf16.mxu0 %v2572_v4  ;;  %v2577_v7 = vld [vmem:[%s3866_s1 + $0x160] ss:$8 sps:$4 sm:$0xff]   ;;  %v2580_v9 = vld [vmem:[%s3866_s1 + $0x154] ss:$8 sps:$4 sm:$0xff]   ;;  %v2583_v11 = vld [vmem:[%s3866_s1 + $0x150] ss:$8 sps:$4 sm:$0xff]  }
   0xf   : > { %1821 = vmatprep.subr.bf16.mxu1 %v2574_v5  ;;  %v2584_v12 = vld [vmem:[%s3866_s1 + $0x44] ss:$8 sps:$4 sm:$0xff]   ;;  %v2588_v14 = vld [vmem:[%s3866_s1 + $0x40] ss:$8 sps:$4 sm:$0xff]   ;;  %v2590_v16 = vld [vmem:[%s3866_s1 + $0x34] ss:$8 sps:$4 sm:$0xff]  }
  0x10   : > { %v2586_v13 = vld [vmem:[%s3866_s1 + $0x144] ss:$8 sps:$4 sm:$0xff]   ;;  %v2589_v15 = vld [vmem:[%s3866_s1 + $0x140] ss:$8 sps:$4 sm:$0xff]   ;;  %v2592_v17 = vld [vmem:[%s3866_s1 + $0x134] ss:$8 sps:$4 sm:$0xff]  }
  0x11   : > { %1779 = vmatpush1.bf16.msra.mxu0 %v2576_v6  ;;  %v2594_v18 = vld [vmem:[%s3866_s1 + $0x30] ss:$8 sps:$4 sm:$0xff]   ;;  %v2596_v20 = vld [vmem:[%s3866_s1 + $0x24] ss:$8 sps:$4 sm:$0xff]   ;;  %v2600_v22 = vld [vmem:[%s3866_s1 + $0x20] ss:$8 sps:$4 sm:$0xff]  }
  0x12   : > { %1822 = vmatpush1.bf16.msra.mxu1 %v2577_v7  ;;  %1780 = vmatprep.subr.bf16.mxu0 %v2578_v8  ;;  %v2595_v19 = vld [vmem:[%s3866_s1 + $0x130] ss:$8 sps:$4 sm:$0xff]   ;;  %v2598_v21 = vld [vmem:[%s3866_s1 + $0x124] ss:$8 sps:$4 sm:$0xff]   ;;  %v2601_v23 = vld [vmem:[%s3866_s1 + $0x120] ss:$8 sps:$4 sm:$0xff]  }
  0x13   : > { %1823 = vmatprep.subr.bf16.mxu1 %v2580_v9  ;;  %v2602_v24 = vld [vmem:[%s3866_s1 + $0x14] ss:$8 sps:$4 sm:$0xff]   ;;  %v2606_v26 = vld [vmem:[%s3866_s1 + $0x10] ss:$8 sps:$4 sm:$0xff]   ;;  %v2608_v28 = vld [vmem:[%s3866_s1 + $0x4] ss:$8 sps:$4 sm:$0xff]  }
  0x14   : > { %v2604_v25 = vld [vmem:[%s3866_s1 + $0x114] ss:$8 sps:$4 sm:$0xff]   ;;  %v2607_v27 = vld [vmem:[%s3866_s1 + $0x110] ss:$8 sps:$4 sm:$0xff]   ;;  %v2610_v29 = vld [vmem:[%s3866_s1 + $0x104] ss:$8 sps:$4 sm:$0xff]  }
  0x15   : > { %1781 = vmatpush1.bf16.msra.mxu0 %v2582_v10  ;;  %v2612_v30 = vld [vmem:[%s3866_s1] ss:$8 sps:$4 sm:$0xff]   ;;  %v2614_v32 = vld [vmem:[%s3866_s1 + $0xf4] ss:$8 sps:$4 sm:$0xff]   ;;  %v2618_v34 = vld [vmem:[%s3866_s1 + $0xf0] ss:$8 sps:$4 sm:$0xff]  }
  0x16   : > { %1824 = vmatpush1.bf16.msra.mxu1 %v2583_v11  ;;  %1782 = vmatprep.subr.bf16.mxu0 %v2584_v12  ;;  %v2613_v31 = vld [vmem:[%s3866_s1 + $0x100] ss:$8 sps:$4 sm:$0xff]   ;;  %v2616_v33 = vld [vmem:[%s3866_s1 + $0x1f4] ss:$8 sps:$4 sm:$0xff]   ;;  %v2619_v35 = vld [vmem:[%s3866_s1 + $0x1f0] ss:$8 sps:$4 sm:$0xff]  }
  0x17   : > { %1825 = vmatprep.subr.bf16.mxu1 %v2586_v13  ;;  %v2620_v36 = vld [vmem:[%s3866_s1 + $0xe4] ss:$8 sps:$4 sm:$0xff]   ;;  %s3873_s10 = smov (!%p134_p3, %s2269_s10), 1  ;;  %v2624_v38 = vld [vmem:[%s3866_s1 + $0xe0] ss:$8 sps:$4 sm:$0xff]   ;;  %vm2120_vm0 = vcmask 1040384  }
  0x18   : > { %v2622_v37 = vld [vmem:[%s3866_s1 + $0x1e4] ss:$8 sps:$4 sm:$0xff]   ;;  %v2625_v39 = vld [vmem:[%s3866_s1 + $0x1e0] ss:$8 sps:$4 sm:$0xff]   ;;  %v2626_v40 = vld [vmem:[%s3866_s1 + $0xd4] ss:$8 sps:$4 sm:$0xff]  }
  0x19   : > { %1783 = vmatpush1.bf16.msra.mxu0 %v2588_v14  ;;  %s2554_s15 = sshll.u32 %s3873_s10, 7  ;;  %v2628_v41 = vld [vmem:[%s3866_s1 + $0x1d4] ss:$8 sps:$4 sm:$0xff]   ;;  %v2630_v42 = vld [vmem:[%s3866_s1 + $0xd0] ss:$8 sps:$4 sm:$0xff]   ;;  %vm2207_vm2 = vcmask 1044484  }
  0x1a   : > { %1826 = vmatpush1.bf16.msra.mxu1 %v2589_v15  ;;  %1784 = vmatprep.subr.bf16.mxu0 %v2590_v16  ;;  %v2631_v43 = vld [vmem:[%s3866_s1 + $0x1d0] ss:$8 sps:$4 sm:$0xff]   ;;  %s3127_s24 = scalar_lea.vmem %s3865_s0, %s2554_s15  ;;  %v2632_v44 = vld [vmem:[%s3866_s1 + $0xc4] ss:$8 sps:$4 sm:$0xff]   ;;  %v2636_v46 = vld [vmem:[%s3866_s1 + $0xc0] ss:$8 sps:$4 sm:$0xff]  }
  0x1b   : > { %1827 = vmatprep.subr.bf16.mxu1 %v2592_v17  ;;  %v2634_v45 = vld [vmem:[%s3866_s1 + $0x1c4] ss:$8 sps:$4 sm:$0xff]   ;;  %v2637_v47 = vld [vmem:[%s3866_s1 + $0x1c0] ss:$8 sps:$4 sm:$0xff]   ;;  %v2638_v52 = vld [vmem:[%s3866_s1 + $0xb4] ss:$8 sps:$4 sm:$0xff]  }
  0x1c   : > { %v144_v48 = vld [vmem:[%s3127_s24] sm:$0xff]  ;;  %v145_v50 = vld [vmem:[%s3127_s24 + $0x8] sm:$0xff]  ;;  %v2640_v54 = vld [vmem:[%s3866_s1 + $0x1b4] ss:$8 sps:$4 sm:$0xff]   ;;  %vm2205_vm1 = vsmask.f32 256 }
  0x1d   : > { %1785 = vmatpush1.bf16.msra.mxu0 %v2594_v18  ;;  %v152_v49 = vld [vmem:[%s3127_s24 + $0x40] sm:$0x11]  ;;  %v153_v51 = vld [vmem:[%s3127_s24 + $0x48] sm:$0x11]  ;;  %v2642_v56 = vld [vmem:[%s3866_s1 + $0xb0] ss:$8 sps:$4 sm:$0xff]  }
  0x1e   : > { %1828 = vmatpush1.bf16.msra.mxu1 %v2595_v19  ;;  %1786 = vmatprep.subr.bf16.mxu0 %v2596_v20  ;;  %v2279_v53 = vcombine.high %v144_v48, %v152_v49  ;;  %v2281_v55 = vcombine.high %v145_v50, %v153_v51  ;;  %v2643_v57 = vld [vmem:[%s3866_s1 + $0x1b0] ss:$8 sps:$4 sm:$0xff]   ;;  %v2644_v58 = vld [vmem:[%s3866_s1 + $0xa4] ss:$8 sps:$4 sm:$0xff]   ;;  %v2648_v60 = vld [vmem:[%s3866_s1 + $0xa0] ss:$8 sps:$4 sm:$0xff]   ;;  %v2278_v8 = vcombine.low %v144_v48, %v152_v49 }
  0x1f   : > { %1829 = vmatprep.subr.bf16.mxu1 %v2598_v21  ;;  %v2646_v59 = vld [vmem:[%s3866_s1 + $0x1a4] ss:$8 sps:$4 sm:$0xff]   ;;  %v2649_v61 = vld [vmem:[%s3866_s1 + $0x1a0] ss:$8 sps:$4 sm:$0xff]   ;;  %v2650_v62 = vld [vmem:[%s3866_s1 + $0x94] ss:$8 sps:$4 sm:$0xff]   ;;  %v2280_v9 = vcombine.low %v145_v50, %v153_v51 }
  0x20   : > { %1808 = vmatprep.mubr.bf16.mxu0 %v2279_v53  ;;  %1851 = vmatprep.mubr.bf16.mxu1 %v2281_v55  ;;  %v2652_v63 = vld [vmem:[%s3866_s1 + $0x194] ss:$8 sps:$4 sm:$0xff]   ;;  %v2654_v0 = vld [vmem:[%s3866_s1 + $0x90] ss:$8 sps:$4 sm:$0xff]   ;;  %v2656_v2 = vld [vmem:[%s3866_s1 + $0x84] ss:$8 sps:$4 sm:$0xff]  }
  0x21   : > { %1787 = vmatpush1.bf16.msra.mxu0 %v2600_v22  ;;  %v2655_v1 = vld [vmem:[%s3866_s1 + $0x190] ss:$8 sps:$4 sm:$0xff]   ;;  %v2658_v3 = vld [vmem:[%s3866_s1 + $0x184] ss:$8 sps:$4 sm:$0xff]   ;;  %v2660_v4 = vld [vmem:[%s3866_s1 + $0x80] ss:$8 sps:$4 sm:$0xff]  }
  0x22   : > { %1830 = vmatpush1.bf16.msra.mxu1 %v2601_v23  ;;  %1788 = vmatprep.subr.bf16.mxu0 %v2602_v24  ;;  %v2661_v5 = vld [vmem:[%s3866_s1 + $0x180] ss:$8 sps:$4 sm:$0xff]   ;;  %v2664_v6 = vld [vmem:[%s3866_s1 + $0x274] ss:$8 sps:$4 sm:$0xff]   ;;  %v2662_v10 = vld [vmem:[%s3866_s1 + $0x270] ss:$8 sps:$4 sm:$0xff]  }
  0x23   : > { %1831 = vmatprep.subr.bf16.mxu1 %v2604_v25  ;;  %v2667_v7 = vld [vmem:[%s3866_s1 + $0x374] ss:$8 sps:$4 sm:$0xff]   ;;  %v2665_v11 = vld [vmem:[%s3866_s1 + $0x370] ss:$8 sps:$4 sm:$0xff]   ;;  %v2670_v12 = vld [vmem:[%s3866_s1 + $0x264] ss:$8 sps:$4 sm:$0xff]  }
  0x24   : > { %v2673_v13 = vld [vmem:[%s3866_s1 + $0x364] ss:$8 sps:$4 sm:$0xff]   ;;  %v2668_v14 = vld [vmem:[%s3866_s1 + $0x260] ss:$8 sps:$4 sm:$0xff]   ;;  %v2676_v16 = vld [vmem:[%s3866_s1 + $0x254] ss:$8 sps:$4 sm:$0xff]  }
  0x25   : > { %1789 = vmatpush1.bf16.msra.mxu0 %v2606_v26  ;;  %v2671_v15 = vld [vmem:[%s3866_s1 + $0x360] ss:$8 sps:$4 sm:$0xff]   ;;  %v2679_v17 = vld [vmem:[%s3866_s1 + $0x354] ss:$8 sps:$4 sm:$0xff]   ;;  %v2674_v18 = vld [vmem:[%s3866_s1 + $0x250] ss:$8 sps:$4 sm:$0xff]  }
  0x26   : > { %1832 = vmatpush1.bf16.msra.mxu1 %v2607_v27  ;;  %1790 = vmatprep.subr.bf16.mxu0 %v2608_v28  ;;  %v2677_v19 = vld [vmem:[%s3866_s1 + $0x350] ss:$8 sps:$4 sm:$0xff]   ;;  %v2682_v20 = vld [vmem:[%s3866_s1 + $0x244] ss:$8 sps:$4 sm:$0xff]   ;;  %v2680_v22 = vld [vmem:[%s3866_s1 + $0x240] ss:$8 sps:$4 sm:$0xff]  }
  0x27   : > { %1833 = vmatprep.subr.bf16.mxu1 %v2610_v29  ;;  %v2685_v21 = vld [vmem:[%s3866_s1 + $0x344] ss:$8 sps:$4 sm:$0xff]   ;;  %v2683_v23 = vld [vmem:[%s3866_s1 + $0x340] ss:$8 sps:$4 sm:$0xff]   ;;  %v2688_v24 = vld [vmem:[%s3866_s1 + $0x234] ss:$8 sps:$4 sm:$0xff]  }
  0x28   : > { %v2691_v25 = vld [vmem:[%s3866_s1 + $0x334] ss:$8 sps:$4 sm:$0xff]   ;;  %v2686_v26 = vld [vmem:[%s3866_s1 + $0x230] ss:$8 sps:$4 sm:$0xff]   ;;  %v2694_v28 = vld [vmem:[%s3866_s1 + $0x224] ss:$8 sps:$4 sm:$0xff]  }
  0x29   : > { %1791 = vmatpush1.bf16.msra.mxu0 %v2612_v30  ;;  %v2689_v27 = vld [vmem:[%s3866_s1 + $0x330] ss:$8 sps:$4 sm:$0xff]   ;;  %v2697_v29 = vld [vmem:[%s3866_s1 + $0x324] ss:$8 sps:$4 sm:$0xff]   ;;  %v2692_v30 = vld [vmem:[%s3866_s1 + $0x220] ss:$8 sps:$4 sm:$0xff]  }
  0x2a   : > { %1834 = vmatpush1.bf16.msra.mxu1 %v2613_v31  ;;  %1792 = vmatprep.subr.bf16.mxu0 %v2614_v32  ;;  %v2695_v31 = vld [vmem:[%s3866_s1 + $0x320] ss:$8 sps:$4 sm:$0xff]   ;;  %v2700_v32 = vld [vmem:[%s3866_s1 + $0x214] ss:$8 sps:$4 sm:$0xff]   ;;  %v2710_v48 = vld [vmem:[%s3866_s1 + $0x2f0] ss:$8 sps:$4 sm:$0xff]  }
  0x2b   : > { %1835 = vmatprep.subr.bf16.mxu1 %v2616_v33  ;;  %v2703_v33 = vld [vmem:[%s3866_s1 + $0x314] ss:$8 sps:$4 sm:$0xff]   ;;  %v2713_v49 = vld [vmem:[%s3866_s1 + $0x3f0] ss:$8 sps:$4 sm:$0xff]   ;;  %v2718_v50 = vld [vmem:[%s3866_s1 + $0x2e4] ss:$8 sps:$4 sm:$0xff]  }
  0x2c   : > { %v2721_v51 = vld [vmem:[%s3866_s1 + $0x3e4] ss:$8 sps:$4 sm:$0xff]   ;;  %v2719_v53 = vld [vmem:[%s3866_s1 + $0x3e0] ss:$8 sps:$4 sm:$0xff]   ;;  %v2727_v55 = vld [vmem:[%s3866_s1 + $0x3d4] ss:$8 sps:$4 sm:$0xff]  }
  0x2d   : > { %1793 = vmatpush2.bf16.msra.mxu0 %v2618_v34  ;;  %v2698_v34 = vld [vmem:[%s3866_s1 + $0x210] ss:$8 sps:$4 sm:$0xff]   ;;  %vm2208_vm3 = vsmask.f32 4352  ;;  %s2555_s18 = sshll.u32 %s3873_s10, 4  ;;  %vm3847_vm4 = vmand %vm2120_vm0, %vm2205_vm1 }
  0x2e   : > { %1836 = vmatpush2.bf16.msra.mxu1 %v2619_v35  ;;  %1794 = vmatprep.subr.bf16.mxu0 %v2620_v36  ;;  %v2701_v35 = vld [vmem:[%s3866_s1 + $0x310] ss:$8 sps:$4 sm:$0xff]   ;;  %vm3851_vm7 = vmand %vm2207_vm2, %vm2208_vm3  ;;  %s143_s20 = scalar_lea.vmem %s3867_s2, %s2555_s18 }
  0x2f   : > { %1837 = vmatprep.subr.bf16.mxu1 %v2622_v37  ;;  %v3278_v36 = vld [vmem:[%s3127_s24 + $0x10] sm:$0xff]  ;;  %vm2210_vm10 = vmor %vm3851_vm7, %vm3847_vm4 }
  0x30   : > { %v3281_v37 = vld [vmem:[%s3127_s24 + $0x50] sm:$0x11] }
  0x31   : > { %1795 = vmatpush2.bf16.msra.mxu0 %v2624_v38  ;;  %v3284_v38 = vld [vmem:[%s3127_s24 + $0x18] sm:$0xff] }
  0x32   : > { %1838 = vmatpush2.bf16.msra.mxu1 %v2625_v39  ;;  %1796 = vmatprep.subr.bf16.mxu0 %v2626_v40  ;;  %v3287_v39 = vld [vmem:[%s3127_s24 + $0x58] sm:$0x11]  ;;  %v2706_v40 = vld [vmem:[%s3866_s1 + $0x204] ss:$8 sps:$4 sm:$0xff]  }
  0x33   : > { %1839 = vmatprep.subr.bf16.mxu1 %v2628_v41  ;;  %v2283_v41 = vcombine.high %v3278_v36, %v3281_v37 }
  0x35   : > { %1797 = vmatpush2.bf16.msra.mxu0 %v2630_v42  ;;  %v2709_v42 = vld [vmem:[%s3866_s1 + $0x304] ss:$8 sps:$4 sm:$0xff]  }
  0x36   : > { %1840 = vmatpush2.bf16.msra.mxu1 %v2631_v43  ;;  %1798 = vmatprep.subr.bf16.mxu0 %v2632_v44  ;;  %v2285_v43 = vcombine.high %v3284_v38, %v3287_v39  ;;  %v2704_v44 = vld [vmem:[%s3866_s1 + $0x200] ss:$8 sps:$4 sm:$0xff]  }
  0x37   : > { %1841 = vmatprep.subr.bf16.mxu1 %v2634_v45  ;;  %v2707_v45 = vld [vmem:[%s3866_s1 + $0x300] ss:$8 sps:$4 sm:$0xff]  }
  0x39   : > { %1799 = vmatpush2.bf16.msra.mxu0 %v2636_v46  ;;  %v2712_v46 = vld [vmem:[%s3866_s1 + $0x2f4] ss:$8 sps:$4 sm:$0xff]  }
  0x3a   : > { %1842 = vmatpush2.bf16.msra.mxu1 %v2637_v47  ;;  %1800 = vmatprep.subr.bf16.mxu0 %v2638_v52  ;;  %v2715_v47 = vld [vmem:[%s3866_s1 + $0x3f4] ss:$8 sps:$4 sm:$0xff]   ;;  %v2716_v52 = vld [vmem:[%s3866_s1 + $0x2e0] ss:$8 sps:$4 sm:$0xff]  }
  0x3b   : > { %1843 = vmatprep.subr.bf16.mxu1 %v2640_v54  ;;  %v2724_v54 = vld [vmem:[%s3866_s1 + $0x2d4] ss:$8 sps:$4 sm:$0xff]  }
  0x3d   : > { %1801 = vmatpush2.bf16.msra.mxu0 %v2642_v56  ;;  %v2722_v56 = vld [vmem:[%s3866_s1 + $0x2d0] ss:$8 sps:$4 sm:$0xff]  }
  0x3e   : > { %1844 = vmatpush2.bf16.msra.mxu1 %v2643_v57  ;;  %1802 = vmatprep.subr.bf16.mxu0 %v2644_v58  ;;  %v2725_v57 = vld [vmem:[%s3866_s1 + $0x3d0] ss:$8 sps:$4 sm:$0xff]   ;;  %v2730_v58 = vld [vmem:[%s3866_s1 + $0x2c4] ss:$8 sps:$4 sm:$0xff]  }
  0x3f   : > { %1845 = vmatprep.subr.bf16.mxu1 %v2646_v59  ;;  %v2733_v59 = vld [vmem:[%s3866_s1 + $0x3c4] ss:$8 sps:$4 sm:$0xff]  }
  0x41   : > { %1803 = vmatpush2.bf16.msra.mxu0 %v2648_v60  ;;  %v2728_v60 = vld [vmem:[%s3866_s1 + $0x2c0] ss:$8 sps:$4 sm:$0xff]  }
  0x42   : > { %1846 = vmatpush2.bf16.msra.mxu1 %v2649_v61  ;;  %1804 = vmatprep.subr.bf16.mxu0 %v2650_v62  ;;  %v2731_v61 = vld [vmem:[%s3866_s1 + $0x3c0] ss:$8 sps:$4 sm:$0xff]   ;;  %v2736_v62 = vld [vmem:[%s3866_s1 + $0x2b4] ss:$8 sps:$4 sm:$0xff]  }
  0x43   : > { %1847 = vmatprep.subr.bf16.mxu1 %v2652_v63  ;;  %v2739_v63 = vld [vmem:[%s3866_s1 + $0x3b4] ss:$8 sps:$4 sm:$0xff]  }
  0x45   : > { %1805 = vmatpush2.bf16.msra.mxu0 %v2654_v0  ;;  %v2734_v0 = vld [vmem:[%s3866_s1 + $0x2b0] ss:$8 sps:$4 sm:$0xff]  }
  0x46   : > { %1848 = vmatpush2.bf16.msra.mxu1 %v2655_v1  ;;  %1806 = vmatprep.subr.bf16.mxu0 %v2656_v2  ;;  %v2737_v1 = vld [vmem:[%s3866_s1 + $0x3b0] ss:$8 sps:$4 sm:$0xff]   ;;  %v2742_v2 = vld [vmem:[%s3866_s1 + $0x2a4] ss:$8 sps:$4 sm:$0xff]  }
  0x47   : > { %1849 = vmatprep.subr.bf16.mxu1 %v2658_v3  ;;  %v2745_v3 = vld [vmem:[%s3866_s1 + $0x3a4] ss:$8 sps:$4 sm:$0xff]  }
  0x49   : > { %1807 = vmatpush2.bf16.msra.mxu0 %v2660_v4  ;;  %v2740_v4 = vld [vmem:[%s3866_s1 + $0x2a0] ss:$8 sps:$4 sm:$0xff]  }
  0x4a   : > { %1850 = vmatpush2.bf16.msra.mxu1 %v2661_v5  ;;  %1862 = vmatprep.subr.bf16.mxu0 %v2664_v6  ;;  %v2743_v5 = vld [vmem:[%s3866_s1 + $0x3a0] ss:$8 sps:$4 sm:$0xff]   ;;  %v2748_v6 = vld [vmem:[%s3866_s1 + $0x294] ss:$8 sps:$4 sm:$0xff]  }
  0x4b   : > { %1905 = vmatprep.subr.bf16.mxu1 %v2667_v7  ;;  %v2751_v7 = vld [vmem:[%s3866_s1 + $0x394] ss:$8 sps:$4 sm:$0xff]  }
  0x4c   : > { %1809 = vmatmul.mubr.bf16.vlgmr.msra.gmra.mxu0 %v2278_v8  ;;  %v2746_v8 = vld [vmem:[%s3866_s1 + $0x290] ss:$8 sps:$4 sm:$0xff]  }
  0x4d   : > { %1852 = vmatmul.mubr.bf16.vlgmr.msra.gmra.mxu1 %v2280_v9  ;;  %1863 = vmatpush1.bf16.msra.mxu0 %v2662_v10  ;;  %v2749_v9 = vld [vmem:[%s3866_s1 + $0x390] ss:$8 sps:$4 sm:$0xff]   ;;  %v2754_v10 = vld [vmem:[%s3866_s1 + $0x284] ss:$8 sps:$4 sm:$0xff]  }
  0x4e   : > { %1906 = vmatpush1.bf16.msra.mxu1 %v2665_v11  ;;  %1864 = vmatprep.subr.bf16.mxu0 %v2670_v12  ;;  %v2757_v11 = vld [vmem:[%s3866_s1 + $0x384] ss:$8 sps:$4 sm:$0xff]   ;;  %v2752_v12 = vld [vmem:[%s3866_s1 + $0x280] ss:$8 sps:$4 sm:$0xff]  }
  0x4f   : > { %1907 = vmatprep.subr.bf16.mxu1 %v2673_v13  ;;  %1894 = vmatprep.mubr.bf16.mxu0 %v2283_v41  ;;  %v2755_v13 = vld [vmem:[%s3866_s1 + $0x380] ss:$8 sps:$4 sm:$0xff]   ;;  %v2785_v41 = vld [vmem:[%s3866_s1 + $0x530] ss:$8 sps:$4 sm:$0xff]  }
  0x50   : > { %1937 = vmatprep.mubr.bf16.mxu1 %v2285_v43  ;;  %v2793_v43 = vld [vmem:[%s3866_s1 + $0x524] ss:$8 sps:$4 sm:$0xff]  }
  0x51   : > { %1865 = vmatpush1.bf16.msra.mxu0 %v2668_v14  ;;  %v2760_v14 = vld [vmem:[%s3866_s1 + $0x474] ss:$8 sps:$4 sm:$0xff]  }
  0x52   : > { %1908 = vmatpush1.bf16.msra.mxu1 %v2671_v15  ;;  %1866 = vmatprep.subr.bf16.mxu0 %v2676_v16  ;;  %v2763_v15 = vld [vmem:[%s3866_s1 + $0x574] ss:$8 sps:$4 sm:$0xff]   ;;  %v2282_v16 = vcombine.low %v3278_v36, %v3281_v37  ;;  %v2776_v36 = vld [vmem:[%s3866_s1 + $0x440] ss:$8 sps:$4 sm:$0xff]  }
  0x53   : > { %1909 = vmatprep.subr.bf16.mxu1 %v2679_v17  ;;  %v2284_v17 = vcombine.low %v3284_v38, %v3287_v39  ;;  %v2779_v37 = vld [vmem:[%s3866_s1 + $0x540] ss:$8 sps:$4 sm:$0xff]   ;;  %v2784_v38 = vld [vmem:[%s3866_s1 + $0x434] ss:$8 sps:$4 sm:$0xff]  }
  0x54   : > { %v2787_v39 = vld [vmem:[%s3866_s1 + $0x534] ss:$8 sps:$4 sm:$0xff]  }
  0x55   : > { %1867 = vmatpush1.bf16.msra.mxu0 %v2674_v18  ;;  %v2758_v18 = vld [vmem:[%s3866_s1 + $0x470] ss:$8 sps:$4 sm:$0xff]  }
  0x56   : > { %1910 = vmatpush1.bf16.msra.mxu1 %v2677_v19  ;;  %1868 = vmatprep.subr.bf16.mxu0 %v2682_v20  ;;  %v2761_v19 = vld [vmem:[%s3866_s1 + $0x570] ss:$8 sps:$4 sm:$0xff]   ;;  %v2766_v20 = vld [vmem:[%s3866_s1 + $0x464] ss:$8 sps:$4 sm:$0xff]  }
  0x57   : > { %1911 = vmatprep.subr.bf16.mxu1 %v2685_v21  ;;  %v2769_v21 = vld [vmem:[%s3866_s1 + $0x564] ss:$8 sps:$4 sm:$0xff]  }
  0x59   : > { %1869 = vmatpush1.bf16.msra.mxu0 %v2680_v22  ;;  %v2764_v22 = vld [vmem:[%s3866_s1 + $0x460] ss:$8 sps:$4 sm:$0xff]  }
  0x5a   : > { %1912 = vmatpush1.bf16.msra.mxu1 %v2683_v23  ;;  %1870 = vmatprep.subr.bf16.mxu0 %v2688_v24  ;;  %v2767_v23 = vld [vmem:[%s3866_s1 + $0x560] ss:$8 sps:$4 sm:$0xff]  }
  0x5b   : > { %1913 = vmatprep.subr.bf16.mxu1 %v2691_v25  ;;  %v3430_v24 = vld [vmem:[%s3127_s24 + $0x20] sm:$0xff] }
  0x5c   : > { %v3433_v25 = vld [vmem:[%s3127_s24 + $0x60] sm:$0x11] }
  0x5d   : > { %1871 = vmatpush1.bf16.msra.mxu0 %v2686_v26  ;;  %v3436_v26 = vld [vmem:[%s3127_s24 + $0x28] sm:$0xff] }
  0x5e   : > { %1914 = vmatpush1.bf16.msra.mxu1 %v2689_v27  ;;  %1872 = vmatprep.subr.bf16.mxu0 %v2694_v28  ;;  %v3439_v27 = vld [vmem:[%s3127_s24 + $0x68] sm:$0x11]  ;;  %v2772_v28 = vld [vmem:[%s3866_s1 + $0x454] ss:$8 sps:$4 sm:$0xff]  }
  0x5f   : > { %1915 = vmatprep.subr.bf16.mxu1 %v2697_v29  ;;  %v2287_v29 = vcombine.high %v3430_v24, %v3433_v25 }
  0x61   : > { %1873 = vmatpush1.bf16.msra.mxu0 %v2692_v30  ;;  %v2775_v30 = vld [vmem:[%s3866_s1 + $0x554] ss:$8 sps:$4 sm:$0xff]  }
  0x62   : > { %1916 = vmatpush1.bf16.msra.mxu1 %v2695_v31  ;;  %1874 = vmatprep.subr.bf16.mxu0 %v2700_v32  ;;  %v2289_v31 = vcombine.high %v3436_v26, %v3439_v27  ;;  %v2770_v32 = vld [vmem:[%s3866_s1 + $0x450] ss:$8 sps:$4 sm:$0xff]  }
  0x63   : > { %1917 = vmatprep.subr.bf16.mxu1 %v2703_v33  ;;  %v2773_v33 = vld [vmem:[%s3866_s1 + $0x550] ss:$8 sps:$4 sm:$0xff]  }
  0x65   : > { %1875 = vmatpush1.bf16.msra.mxu0 %v2698_v34  ;;  %v2778_v34 = vld [vmem:[%s3866_s1 + $0x444] ss:$8 sps:$4 sm:$0xff]  }
  0x66   : > { %1918 = vmatpush1.bf16.msra.mxu1 %v2701_v35  ;;  %1876 = vmatprep.subr.bf16.mxu0 %v2706_v40  ;;  %v2781_v35 = vld [vmem:[%s3866_s1 + $0x544] ss:$8 sps:$4 sm:$0xff]   ;;  %v2782_v40 = vld [vmem:[%s3866_s1 + $0x430] ss:$8 sps:$4 sm:$0xff]  }
  0x67   : > { %1919 = vmatprep.subr.bf16.mxu1 %v2709_v42  ;;  %v2790_v42 = vld [vmem:[%s3866_s1 + $0x424] ss:$8 sps:$4 sm:$0xff]  }
  0x69   : > { %1877 = vmatpush1.bf16.msra.mxu0 %v2704_v44  ;;  %v2788_v44 = vld [vmem:[%s3866_s1 + $0x420] ss:$8 sps:$4 sm:$0xff]  }
  0x6a   : > { %1920 = vmatpush1.bf16.msra.mxu1 %v2707_v45  ;;  %1878 = vmatprep.subr.bf16.mxu0 %v2712_v46  ;;  %v2791_v45 = vld [vmem:[%s3866_s1 + $0x520] ss:$8 sps:$4 sm:$0xff]   ;;  %v2796_v46 = vld [vmem:[%s3866_s1 + $0x414] ss:$8 sps:$4 sm:$0xff]  }
  0x6b   : > { %1921 = vmatprep.subr.bf16.mxu1 %v2715_v47  ;;  %v2799_v47 = vld [vmem:[%s3866_s1 + $0x514] ss:$8 sps:$4 sm:$0xff]  }
  0x6d   : > { %1879 = vmatpush2.bf16.msra.mxu0 %v2710_v48  ;;  %v2794_v48 = vld [vmem:[%s3866_s1 + $0x410] ss:$8 sps:$4 sm:$0xff]  }
  0x6e   : > { %1922 = vmatpush2.bf16.msra.mxu1 %v2713_v49  ;;  %1880 = vmatprep.subr.bf16.mxu0 %v2718_v50  ;;  %v2797_v49 = vld [vmem:[%s3866_s1 + $0x510] ss:$8 sps:$4 sm:$0xff]   ;;  %v2802_v50 = vld [vmem:[%s3866_s1 + $0x404] ss:$8 sps:$4 sm:$0xff]  }
  0x6f   : > { %1923 = vmatprep.subr.bf16.mxu1 %v2721_v51  ;;  %v2805_v51 = vld [vmem:[%s3866_s1 + $0x504] ss:$8 sps:$4 sm:$0xff]  }
  0x71   : > { %1881 = vmatpush2.bf16.msra.mxu0 %v2716_v52  ;;  %v2800_v52 = vld [vmem:[%s3866_s1 + $0x400] ss:$8 sps:$4 sm:$0xff]  }
  0x72   : > { %1924 = vmatpush2.bf16.msra.mxu1 %v2719_v53  ;;  %1882 = vmatprep.subr.bf16.mxu0 %v2724_v54  ;;  %v2803_v53 = vld [vmem:[%s3866_s1 + $0x500] ss:$8 sps:$4 sm:$0xff]   ;;  %v2808_v54 = vld [vmem:[%s3866_s1 + $0x4f4] ss:$8 sps:$4 sm:$0xff]  }
  0x73   : > { %1925 = vmatprep.subr.bf16.mxu1 %v2727_v55  ;;  %v2811_v55 = vld [vmem:[%s3866_s1 + $0x5f4] ss:$8 sps:$4 sm:$0xff]  }
  0x75   : > { %1883 = vmatpush2.bf16.msra.mxu0 %v2722_v56  ;;  %v2806_v56 = vld [vmem:[%s3866_s1 + $0x4f0] ss:$8 sps:$4 sm:$0xff]  }
  0x76   : > { %1926 = vmatpush2.bf16.msra.mxu1 %v2725_v57  ;;  %1884 = vmatprep.subr.bf16.mxu0 %v2730_v58  ;;  %v2809_v57 = vld [vmem:[%s3866_s1 + $0x5f0] ss:$8 sps:$4 sm:$0xff]   ;;  %v2814_v58 = vld [vmem:[%s3866_s1 + $0x4e4] ss:$8 sps:$4 sm:$0xff]  }
  0x77   : > { %1927 = vmatprep.subr.bf16.mxu1 %v2733_v59  ;;  %v2817_v59 = vld [vmem:[%s3866_s1 + $0x5e4] ss:$8 sps:$4 sm:$0xff]  }
  0x79   : > { %1885 = vmatpush2.bf16.msra.mxu0 %v2728_v60  ;;  %v2812_v60 = vld [vmem:[%s3866_s1 + $0x4e0] ss:$8 sps:$4 sm:$0xff]  }
  0x7a   : > { %1928 = vmatpush2.bf16.msra.mxu1 %v2731_v61  ;;  %1886 = vmatprep.subr.bf16.mxu0 %v2736_v62  ;;  %v2815_v61 = vld [vmem:[%s3866_s1 + $0x5e0] ss:$8 sps:$4 sm:$0xff]   ;;  %v2820_v62 = vld [vmem:[%s3866_s1 + $0x4d4] ss:$8 sps:$4 sm:$0xff]  }
  0x7b   : > { %1929 = vmatprep.subr.bf16.mxu1 %v2739_v63  ;;  %v2823_v63 = vld [vmem:[%s3866_s1 + $0x5d4] ss:$8 sps:$4 sm:$0xff]  }
  0x7d   : > { %1887 = vmatpush2.bf16.msra.mxu0 %v2734_v0  ;;  %v2818_v0 = vld [vmem:[%s3866_s1 + $0x4d0] ss:$8 sps:$4 sm:$0xff]  }
  0x7e   : > { %1930 = vmatpush2.bf16.msra.mxu1 %v2737_v1  ;;  %1888 = vmatprep.subr.bf16.mxu0 %v2742_v2  ;;  %v2821_v1 = vld [vmem:[%s3866_s1 + $0x5d0] ss:$8 sps:$4 sm:$0xff]   ;;  %v2826_v2 = vld [vmem:[%s3866_s1 + $0x4c4] ss:$8 sps:$4 sm:$0xff]  }
  0x7f   : > { %1931 = vmatprep.subr.bf16.mxu1 %v2745_v3  ;;  %v2829_v3 = vld [vmem:[%s3866_s1 + $0x5c4] ss:$8 sps:$4 sm:$0xff]  }
  0x81   : > { %1889 = vmatpush2.bf16.msra.mxu0 %v2740_v4  ;;  %v2824_v4 = vld [vmem:[%s3866_s1 + $0x4c0] ss:$8 sps:$4 sm:$0xff]  }
  0x82   : > { %1932 = vmatpush2.bf16.msra.mxu1 %v2743_v5  ;;  %1890 = vmatprep.subr.bf16.mxu0 %v2748_v6  ;;  %v2827_v5 = vld [vmem:[%s3866_s1 + $0x5c0] ss:$8 sps:$4 sm:$0xff]   ;;  %v2832_v6 = vld [vmem:[%s3866_s1 + $0x4b4] ss:$8 sps:$4 sm:$0xff]  }
  0x83   : > { %1933 = vmatprep.subr.bf16.mxu1 %v2751_v7  ;;  %v2835_v7 = vld [vmem:[%s3866_s1 + $0x5b4] ss:$8 sps:$4 sm:$0xff]  }
  0x85   : > { %1891 = vmatpush2.bf16.msra.mxu0 %v2746_v8  ;;  %v2830_v8 = vld [vmem:[%s3866_s1 + $0x4b0] ss:$8 sps:$4 sm:$0xff]  }
  0x86   : > { %1934 = vmatpush2.bf16.msra.mxu1 %v2749_v9  ;;  %1892 = vmatprep.subr.bf16.mxu0 %v2754_v10  ;;  %v2833_v9 = vld [vmem:[%s3866_s1 + $0x5b0] ss:$8 sps:$4 sm:$0xff]   ;;  %v2838_v10 = vld [vmem:[%s3866_s1 + $0x4a4] ss:$8 sps:$4 sm:$0xff]  }
  0x87   : > { %1935 = vmatprep.subr.bf16.mxu1 %v2757_v11  ;;  %v2841_v11 = vld [vmem:[%s3866_s1 + $0x5a4] ss:$8 sps:$4 sm:$0xff]  }
  0x89   : > { %1893 = vmatpush2.bf16.msra.mxu0 %v2752_v12  ;;  %v2836_v12 = vld [vmem:[%s3866_s1 + $0x4a0] ss:$8 sps:$4 sm:$0xff]  }
  0x8a   : > { %1936 = vmatpush2.bf16.msra.mxu1 %v2755_v13  ;;  %1948 = vmatprep.subr.bf16.mxu0 %v2760_v14  ;;  %v2839_v13 = vld [vmem:[%s3866_s1 + $0x5a0] ss:$8 sps:$4 sm:$0xff]   ;;  %v2844_v14 = vld [vmem:[%s3866_s1 + $0x494] ss:$8 sps:$4 sm:$0xff]  }
  0x8b   : > { %1991 = vmatprep.subr.bf16.mxu1 %v2763_v15  ;;  %v2847_v15 = vld [vmem:[%s3866_s1 + $0x594] ss:$8 sps:$4 sm:$0xff]  }
  0x8c   : > { %1895 = vmatmul.mubr.bf16.vlgmr.msra.gmra.mxu0 %v2282_v16  ;;  %v2842_v16 = vld [vmem:[%s3866_s1 + $0x490] ss:$8 sps:$4 sm:$0xff]  }
  0x8d   : > { %1938 = vmatmul.mubr.bf16.vlgmr.msra.gmra.mxu1 %v2284_v17  ;;  %1949 = vmatpush1.bf16.msra.mxu0 %v2758_v18  ;;  %v2845_v17 = vld [vmem:[%s3866_s1 + $0x590] ss:$8 sps:$4 sm:$0xff]   ;;  %v2850_v18 = vld [vmem:[%s3866_s1 + $0x484] ss:$8 sps:$4 sm:$0xff]  }
  0x8e   : > { %1992 = vmatpush1.bf16.msra.mxu1 %v2761_v19  ;;  %1950 = vmatprep.subr.bf16.mxu0 %v2766_v20  ;;  %v2853_v19 = vld [vmem:[%s3866_s1 + $0x584] ss:$8 sps:$4 sm:$0xff]   ;;  %v2848_v20 = vld [vmem:[%s3866_s1 + $0x480] ss:$8 sps:$4 sm:$0xff]  }
  0x8f   : > { %1993 = vmatprep.subr.bf16.mxu1 %v2769_v21  ;;  %1980 = vmatprep.mubr.bf16.mxu0 %v2287_v29  ;;  %v2851_v21 = vld [vmem:[%s3866_s1 + $0x580] ss:$8 sps:$4 sm:$0xff]   ;;  %v2286_v29 = vcombine.low %v3430_v24, %v3433_v25  ;;  %v2862_v24 = vld [vmem:[%s3866_s1 + $0x664] ss:$8 sps:$4 sm:$0xff]  }
  0x90   : > { %2023 = vmatprep.mubr.bf16.mxu1 %v2289_v31  ;;  %v3627_v31 = vld [vmem:[%s3127_s24 + $0x70] sm:$0x11]  ;;  %v2865_v25 = vld [vmem:[%s3866_s1 + $0x764] ss:$8 sps:$4 sm:$0xff]  }
  0x91   : > { %1951 = vmatpush1.bf16.msra.mxu0 %v2764_v22  ;;  %v2856_v22 = vld [vmem:[%s3866_s1 + $0x674] ss:$8 sps:$4 sm:$0xff]  }
  0x92   : > { %1994 = vmatpush1.bf16.msra.mxu1 %v2767_v23  ;;  %1952 = vmatprep.subr.bf16.mxu0 %v2772_v28  ;;  %v2859_v23 = vld [vmem:[%s3866_s1 + $0x774] ss:$8 sps:$4 sm:$0xff]  }
  0x93   : > { %1995 = vmatprep.subr.bf16.mxu1 %v2775_v30  ;;  %v3620_v28 = vld [vmem:[%s3127_s24 + $0x30] sm:$0xff]  ;;  %v2288_v30 = vcombine.low %v3436_v26, %v3439_v27 }
  0x94   : > { %v2291_v26 = vcombine.high %v3620_v28, %v3627_v31 }
  0x95   : > { %1953 = vmatpush1.bf16.msra.mxu0 %v2770_v32  ;;  %v3630_v32 = vld [vmem:[%s3127_s24 + $0x38] sm:$0xff] }
  0x96   : > { %1996 = vmatpush1.bf16.msra.mxu1 %v2773_v33  ;;  %1954 = vmatprep.subr.bf16.mxu0 %v2778_v34  ;;  %v3633_v33 = vld [vmem:[%s3127_s24 + $0x78] sm:$0x11] }
  0x97   : > { %1997 = vmatprep.subr.bf16.mxu1 %v2781_v35  ;;  %v2854_v34 = vld [vmem:[%s3866_s1 + $0x670] ss:$8 sps:$4 sm:$0xff]   ;;  %v2293_v27 = vcombine.high %v3630_v32, %v3633_v33 }
  0x98   : > { %v2857_v35 = vld [vmem:[%s3866_s1 + $0x770] ss:$8 sps:$4 sm:$0xff]  }
  0x99   : > { %1955 = vmatpush1.bf16.msra.mxu0 %v2776_v36  ;;  %v2860_v36 = vld [vmem:[%s3866_s1 + $0x660] ss:$8 sps:$4 sm:$0xff]  }
  0x9a   : > { %1998 = vmatpush1.bf16.msra.mxu1 %v2779_v37  ;;  %1956 = vmatprep.subr.bf16.mxu0 %v2784_v38  ;;  %v2863_v37 = vld [vmem:[%s3866_s1 + $0x760] ss:$8 sps:$4 sm:$0xff]   ;;  %v2868_v38 = vld [vmem:[%s3866_s1 + $0x654] ss:$8 sps:$4 sm:$0xff]  }
  0x9b   : > { %1999 = vmatprep.subr.bf16.mxu1 %v2787_v39  ;;  %v2871_v39 = vld [vmem:[%s3866_s1 + $0x754] ss:$8 sps:$4 sm:$0xff]  }
  0x9d   : > { %1957 = vmatpush1.bf16.msra.mxu0 %v2782_v40  ;;  %v2866_v40 = vld [vmem:[%s3866_s1 + $0x650] ss:$8 sps:$4 sm:$0xff]  }
  0x9e   : > { %2000 = vmatpush1.bf16.msra.mxu1 %v2785_v41  ;;  %1958 = vmatprep.subr.bf16.mxu0 %v2790_v42  ;;  %v2869_v41 = vld [vmem:[%s3866_s1 + $0x750] ss:$8 sps:$4 sm:$0xff]   ;;  %v2874_v42 = vld [vmem:[%s3866_s1 + $0x644] ss:$8 sps:$4 sm:$0xff]  }
  0x9f   : > { %2001 = vmatprep.subr.bf16.mxu1 %v2793_v43  ;;  %v2877_v43 = vld [vmem:[%s3866_s1 + $0x744] ss:$8 sps:$4 sm:$0xff]  }
  0xa1   : > { %1959 = vmatpush1.bf16.msra.mxu0 %v2788_v44  ;;  %v2872_v44 = vld [vmem:[%s3866_s1 + $0x640] ss:$8 sps:$4 sm:$0xff]  }
  0xa2   : > { %2002 = vmatpush1.bf16.msra.mxu1 %v2791_v45  ;;  %1960 = vmatprep.subr.bf16.mxu0 %v2796_v46  ;;  %v2875_v45 = vld [vmem:[%s3866_s1 + $0x740] ss:$8 sps:$4 sm:$0xff]   ;;  %v2880_v46 = vld [vmem:[%s3866_s1 + $0x634] ss:$8 sps:$4 sm:$0xff]  }
  0xa3   : > { %2003 = vmatprep.subr.bf16.mxu1 %v2799_v47  ;;  %v2883_v47 = vld [vmem:[%s3866_s1 + $0x734] ss:$8 sps:$4 sm:$0xff]  }
  0xa5   : > { %1961 = vmatpush1.bf16.msra.mxu0 %v2794_v48  ;;  %v2878_v48 = vld [vmem:[%s3866_s1 + $0x630] ss:$8 sps:$4 sm:$0xff]  }
  0xa6   : > { %2004 = vmatpush1.bf16.msra.mxu1 %v2797_v49  ;;  %1962 = vmatprep.subr.bf16.mxu0 %v2802_v50  ;;  %v2881_v49 = vld [vmem:[%s3866_s1 + $0x730] ss:$8 sps:$4 sm:$0xff]   ;;  %v2886_v50 = vld [vmem:[%s3866_s1 + $0x624] ss:$8 sps:$4 sm:$0xff]  }
  0xa7   : > { %2005 = vmatprep.subr.bf16.mxu1 %v2805_v51  ;;  %v2889_v51 = vld [vmem:[%s3866_s1 + $0x724] ss:$8 sps:$4 sm:$0xff]  }
  0xa9   : > { %1963 = vmatpush1.bf16.msra.mxu0 %v2800_v52  ;;  %v2884_v52 = vld [vmem:[%s3866_s1 + $0x620] ss:$8 sps:$4 sm:$0xff]  }
  0xaa   : > { %2006 = vmatpush1.bf16.msra.mxu1 %v2803_v53  ;;  %1964 = vmatprep.subr.bf16.mxu0 %v2808_v54  ;;  %v2887_v53 = vld [vmem:[%s3866_s1 + $0x720] ss:$8 sps:$4 sm:$0xff]   ;;  %v2892_v54 = vld [vmem:[%s3866_s1 + $0x614] ss:$8 sps:$4 sm:$0xff]  }
  0xab   : > { %2007 = vmatprep.subr.bf16.mxu1 %v2811_v55  ;;  %v2895_v55 = vld [vmem:[%s3866_s1 + $0x714] ss:$8 sps:$4 sm:$0xff]  }
  0xad   : > { %1965 = vmatpush2.bf16.msra.mxu0 %v2806_v56  ;;  %v2890_v56 = vld [vmem:[%s3866_s1 + $0x610] ss:$8 sps:$4 sm:$0xff]  }
  0xae   : > { %2008 = vmatpush2.bf16.msra.mxu1 %v2809_v57  ;;  %1966 = vmatprep.subr.bf16.mxu0 %v2814_v58  ;;  %v2893_v57 = vld [vmem:[%s3866_s1 + $0x710] ss:$8 sps:$4 sm:$0xff]   ;;  %v2898_v58 = vld [vmem:[%s3866_s1 + $0x604] ss:$8 sps:$4 sm:$0xff]  }
  0xaf   : > { %2009 = vmatprep.subr.bf16.mxu1 %v2817_v59  ;;  %v2901_v59 = vld [vmem:[%s3866_s1 + $0x704] ss:$8 sps:$4 sm:$0xff]  }
  0xb1   : > { %1967 = vmatpush2.bf16.msra.mxu0 %v2812_v60  ;;  %v2896_v60 = vld [vmem:[%s3866_s1 + $0x600] ss:$8 sps:$4 sm:$0xff]  }
  0xb2   : > { %2010 = vmatpush2.bf16.msra.mxu1 %v2815_v61  ;;  %1968 = vmatprep.subr.bf16.mxu0 %v2820_v62  ;;  %v2899_v61 = vld [vmem:[%s3866_s1 + $0x700] ss:$8 sps:$4 sm:$0xff]   ;;  %v2904_v62 = vld [vmem:[%s3866_s1 + $0x6f4] ss:$8 sps:$4 sm:$0xff]  }
  0xb3   : > { %2011 = vmatprep.subr.bf16.mxu1 %v2823_v63  ;;  %v2907_v63 = vld [vmem:[%s3866_s1 + $0x7f4] ss:$8 sps:$4 sm:$0xff]  }
  0xb5   : > { %1969 = vmatpush2.bf16.msra.mxu0 %v2818_v0  ;;  %v2902_v0 = vld [vmem:[%s3866_s1 + $0x6f0] ss:$8 sps:$4 sm:$0xff]  }
  0xb6   : > { %2012 = vmatpush2.bf16.msra.mxu1 %v2821_v1  ;;  %1970 = vmatprep.subr.bf16.mxu0 %v2826_v2  ;;  %v2905_v1 = vld [vmem:[%s3866_s1 + $0x7f0] ss:$8 sps:$4 sm:$0xff]   ;;  %v2910_v2 = vld [vmem:[%s3866_s1 + $0x6e4] ss:$8 sps:$4 sm:$0xff]  }
  0xb7   : > { %2013 = vmatprep.subr.bf16.mxu1 %v2829_v3  ;;  %v2913_v3 = vld [vmem:[%s3866_s1 + $0x7e4] ss:$8 sps:$4 sm:$0xff]  }
  0xb9   : > { %1971 = vmatpush2.bf16.msra.mxu0 %v2824_v4  ;;  %v2908_v4 = vld [vmem:[%s3866_s1 + $0x6e0] ss:$8 sps:$4 sm:$0xff]  }
  0xba   : > { %2014 = vmatpush2.bf16.msra.mxu1 %v2827_v5  ;;  %1972 = vmatprep.subr.bf16.mxu0 %v2832_v6  ;;  %v2911_v5 = vld [vmem:[%s3866_s1 + $0x7e0] ss:$8 sps:$4 sm:$0xff]   ;;  %v2916_v6 = vld [vmem:[%s3866_s1 + $0x6d4] ss:$8 sps:$4 sm:$0xff]  }
  0xbb   : > { %2015 = vmatprep.subr.bf16.mxu1 %v2835_v7  ;;  %v2919_v7 = vld [vmem:[%s3866_s1 + $0x7d4] ss:$8 sps:$4 sm:$0xff]  }
  0xbd   : > { %1973 = vmatpush2.bf16.msra.mxu0 %v2830_v8  ;;  %v2914_v8 = vld [vmem:[%s3866_s1 + $0x6d0] ss:$8 sps:$4 sm:$0xff]  }
  0xbe   : > { %2016 = vmatpush2.bf16.msra.mxu1 %v2833_v9  ;;  %1974 = vmatprep.subr.bf16.mxu0 %v2838_v10  ;;  %v2917_v9 = vld [vmem:[%s3866_s1 + $0x7d0] ss:$8 sps:$4 sm:$0xff]   ;;  %v2922_v10 = vld [vmem:[%s3866_s1 + $0x6c4] ss:$8 sps:$4 sm:$0xff]  }
  0xbf   : > { %2017 = vmatprep.subr.bf16.mxu1 %v2841_v11  ;;  %v2925_v11 = vld [vmem:[%s3866_s1 + $0x7c4] ss:$8 sps:$4 sm:$0xff]  }
  0xc1   : > { %1975 = vmatpush2.bf16.msra.mxu0 %v2836_v12  ;;  %v2920_v12 = vld [vmem:[%s3866_s1 + $0x6c0] ss:$8 sps:$4 sm:$0xff]  }
  0xc2   : > { %2018 = vmatpush2.bf16.msra.mxu1 %v2839_v13  ;;  %1976 = vmatprep.subr.bf16.mxu0 %v2844_v14  ;;  %v2923_v13 = vld [vmem:[%s3866_s1 + $0x7c0] ss:$8 sps:$4 sm:$0xff]   ;;  %v2928_v14 = vld [vmem:[%s3866_s1 + $0x6b4] ss:$8 sps:$4 sm:$0xff]  }
  0xc3   : > { %2019 = vmatprep.subr.bf16.mxu1 %v2847_v15  ;;  %v2931_v15 = vld [vmem:[%s3866_s1 + $0x7b4] ss:$8 sps:$4 sm:$0xff]  }
  0xc5   : > { %1977 = vmatpush2.bf16.msra.mxu0 %v2842_v16  ;;  %v2926_v16 = vld [vmem:[%s3866_s1 + $0x6b0] ss:$8 sps:$4 sm:$0xff]  }
  0xc6   : > { %2020 = vmatpush2.bf16.msra.mxu1 %v2845_v17  ;;  %1978 = vmatprep.subr.bf16.mxu0 %v2850_v18  ;;  %v2929_v17 = vld [vmem:[%s3866_s1 + $0x7b0] ss:$8 sps:$4 sm:$0xff]   ;;  %v2934_v18 = vld [vmem:[%s3866_s1 + $0x6a4] ss:$8 sps:$4 sm:$0xff]  }
  0xc7   : > { %2021 = vmatprep.subr.bf16.mxu1 %v2853_v19  ;;  %v2937_v19 = vld [vmem:[%s3866_s1 + $0x7a4] ss:$8 sps:$4 sm:$0xff]  }
  0xc9   : > { %1979 = vmatpush2.bf16.msra.mxu0 %v2848_v20  ;;  %v2932_v20 = vld [vmem:[%s3866_s1 + $0x6a0] ss:$8 sps:$4 sm:$0xff]  }
  0xca   : > { %2022 = vmatpush2.bf16.msra.mxu1 %v2851_v21  ;;  %2034 = vmatprep.subr.bf16.mxu0 %v2856_v22  ;;  %v2935_v21 = vld [vmem:[%s3866_s1 + $0x7a0] ss:$8 sps:$4 sm:$0xff]   ;;  %v2940_v22 = vld [vmem:[%s3866_s1 + $0x694] ss:$8 sps:$4 sm:$0xff]  }
  0xcb   : > { %2077 = vmatprep.subr.bf16.mxu1 %v2859_v23  ;;  %v2943_v23 = vld [vmem:[%s3866_s1 + $0x794] ss:$8 sps:$4 sm:$0xff]  }
  0xcc   : > { %1981 = vmatmul.mubr.bf16.vlgmr.msra.gmra.mxu0 %v2286_v29  ;;  %v2938_v29 = vld [vmem:[%s3866_s1 + $0x690] ss:$8 sps:$4 sm:$0xff]  }
  0xcd   : > { %2024 = vmatmul.mubr.bf16.vlgmr.msra.gmra.mxu1 %v2288_v30  ;;  %2035 = vmatpush1.bf16.msra.mxu0 %v2854_v34  ;;  %v2941_v30 = vld [vmem:[%s3866_s1 + $0x790] ss:$8 sps:$4 sm:$0xff]   ;;  %v2946_v34 = vld [vmem:[%s3866_s1 + $0x684] ss:$8 sps:$4 sm:$0xff]  }
  0xce   : > { %2078 = vmatpush1.bf16.msra.mxu1 %v2857_v35  ;;  %2036 = vmatprep.subr.bf16.mxu0 %v2862_v24  ;;  %v2949_v35 = vld [vmem:[%s3866_s1 + $0x784] ss:$8 sps:$4 sm:$0xff]   ;;  %v2944_v24 = vld [vmem:[%s3866_s1 + $0x680] ss:$8 sps:$4 sm:$0xff]  }
  0xcf   : > { %2079 = vmatprep.subr.bf16.mxu1 %v2865_v25  ;;  %2066 = vmatprep.mubr.bf16.mxu0 %v2291_v26  ;;  %v2947_v25 = vld [vmem:[%s3866_s1 + $0x780] ss:$8 sps:$4 sm:$0xff]   ;;  %v2290_v26 = vcombine.low %v3620_v28, %v3627_v31 }
  0xd0   : > { %2109 = vmatprep.mubr.bf16.mxu1 %v2293_v27  ;;  %v2292_v27 = vcombine.low %v3630_v32, %v3633_v33 }
  0xd1   : > { %2037 = vmatpush1.bf16.msra.mxu0 %v2860_v36 }
  0xd2   : > { %2080 = vmatpush1.bf16.msra.mxu1 %v2863_v37  ;;  %2038 = vmatprep.subr.bf16.mxu0 %v2868_v38 }
  0xd3   : > { %2081 = vmatprep.subr.bf16.mxu1 %v2871_v39 }
  0xd5   : > { %2039 = vmatpush1.bf16.msra.mxu0 %v2866_v40 }
  0xd6   : > { %2082 = vmatpush1.bf16.msra.mxu1 %v2869_v41  ;;  %2040 = vmatprep.subr.bf16.mxu0 %v2874_v42 }
  0xd7   : > { %2083 = vmatprep.subr.bf16.mxu1 %v2877_v43 }
  0xd9   : > { %2041 = vmatpush1.bf16.msra.mxu0 %v2872_v44 }
  0xda   : > { %2084 = vmatpush1.bf16.msra.mxu1 %v2875_v45  ;;  %2042 = vmatprep.subr.bf16.mxu0 %v2880_v46 }
  0xdb   : > { %2085 = vmatprep.subr.bf16.mxu1 %v2883_v47 }
  0xdd   : > { %2043 = vmatpush1.bf16.msra.mxu0 %v2878_v48 }
  0xde   : > { %2086 = vmatpush1.bf16.msra.mxu1 %v2881_v49  ;;  %2044 = vmatprep.subr.bf16.mxu0 %v2886_v50 }
  0xdf   : > { %2087 = vmatprep.subr.bf16.mxu1 %v2889_v51 }
  0xe1   : > { %2045 = vmatpush1.bf16.msra.mxu0 %v2884_v52 }
  0xe2   : > { %2088 = vmatpush1.bf16.msra.mxu1 %v2887_v53  ;;  %2046 = vmatprep.subr.bf16.mxu0 %v2892_v54 }
  0xe3   : > { %2089 = vmatprep.subr.bf16.mxu1 %v2895_v55 }
  0xe5   : > { %2047 = vmatpush1.bf16.msra.mxu0 %v2890_v56 }
  0xe6   : > { %2090 = vmatpush1.bf16.msra.mxu1 %v2893_v57  ;;  %2048 = vmatprep.subr.bf16.mxu0 %v2898_v58 }
  0xe7   : > { %2091 = vmatprep.subr.bf16.mxu1 %v2901_v59 }
  0xe9   : > { %2049 = vmatpush1.bf16.msra.mxu0 %v2896_v60 }
  0xea   : > { %2092 = vmatpush1.bf16.msra.mxu1 %v2899_v61  ;;  %2050 = vmatprep.subr.bf16.mxu0 %v2904_v62 }
  0xeb   : > { %2093 = vmatprep.subr.bf16.mxu1 %v2907_v63 }
  0xed   : > { %2051 = vmatpush2.bf16.msra.mxu0 %v2902_v0 }
  0xee   : > { %2094 = vmatpush2.bf16.msra.mxu1 %v2905_v1  ;;  %2052 = vmatprep.subr.bf16.mxu0 %v2910_v2 }
  0xef   : > { %2095 = vmatprep.subr.bf16.mxu1 %v2913_v3 }
  0xf1   : > { %2053 = vmatpush2.bf16.msra.mxu0 %v2908_v4 }
  0xf2   : > { %2096 = vmatpush2.bf16.msra.mxu1 %v2911_v5  ;;  %2054 = vmatprep.subr.bf16.mxu0 %v2916_v6 }
  0xf3   : > { %2097 = vmatprep.subr.bf16.mxu1 %v2919_v7 }
  0xf5   : > { %2055 = vmatpush2.bf16.msra.mxu0 %v2914_v8 }
  0xf6   : > { %2098 = vmatpush2.bf16.msra.mxu1 %v2917_v9  ;;  %2056 = vmatprep.subr.bf16.mxu0 %v2922_v10 }
  0xf7   : > { %2099 = vmatprep.subr.bf16.mxu1 %v2925_v11 }
  0xf9   : > { %2057 = vmatpush2.bf16.msra.mxu0 %v2920_v12 }
  0xfa   : > { %2100 = vmatpush2.bf16.msra.mxu1 %v2923_v13  ;;  %2058 = vmatprep.subr.bf16.mxu0 %v2928_v14 }
  0xfb   : > { %2101 = vmatprep.subr.bf16.mxu1 %v2931_v15 }
  0xfd   : > { %2059 = vmatpush2.bf16.msra.mxu0 %v2926_v16 }
  0xfe   : > { %2102 = vmatpush2.bf16.msra.mxu1 %v2929_v17  ;;  %2060 = vmatprep.subr.bf16.mxu0 %v2934_v18 }
  0xff   : > { %2103 = vmatprep.subr.bf16.mxu1 %v2937_v19 }
 0x101   : > { %2061 = vmatpush2.bf16.msra.mxu0 %v2932_v20 }
 0x102   : > { %2104 = vmatpush2.bf16.msra.mxu1 %v2935_v21  ;;  %2062 = vmatprep.subr.bf16.mxu0 %v2940_v22 }
 0x103   : > { %2105 = vmatprep.subr.bf16.mxu1 %v2943_v23 }
 0x105   : > { %2063 = vmatpush2.bf16.msra.mxu0 %v2938_v29 }
 0x106   : > { %2106 = vmatpush2.bf16.msra.mxu1 %v2941_v30  ;;  %2064 = vmatprep.subr.bf16.mxu0 %v2946_v34 }
 0x107   : > { %2107 = vmatprep.subr.bf16.mxu1 %v2949_v35 }
 0x109   : > { %2065 = vmatpush2.bf16.msra.mxu0 %v2944_v24 }
 0x10a   : > { %2108 = vmatpush2.bf16.msra.mxu1 %v2947_v25 }
 0x10c   : > { %2067 = vmatmul.mubr.bf16.vlgmr.msra.gmra.mxu0 %v2290_v26  ;;  %v1810_v36 = vpop.f32.mrf.mxu0 }
 0x10d   : > { %2110 = vmatmul.mubr.bf16.vlgmr.msra.gmra.mxu1 %v2292_v27  ;;  %v1853_v37 = vpop.f32.mrf.mxu1 }
 0x10e   : > { %v1812_v38 = vpop.f32.mrf.mxu0  ;;  %v1854_v50 = vadd.f32 %v1853_v37, %v1810_v36 }
 0x10f   : > { %v1855_v39 = vpop.f32.mrf.mxu1 }
 0x110   : > { %v1814_v40 = vpop.f32.mrf.mxu0  ;;  %v1856_v51 = vadd.f32 %v1855_v39, %v1812_v38 }
 0x111   : > { %v1857_v41 = vpop.f32.mrf.mxu1 }
 0x112   : > { %v1816_v42 = vpop.f32.mrf.mxu0  ;;  %v1858_v55 = vadd.f32 %v1857_v41, %v1814_v40 }
 0x113   : > { %v1859_v43 = vpop.f32.mrf.mxu1 }
 0x114   : > { %v1860_v57 = vadd.f32 %v1859_v43, %v1816_v42 }
 0x14c   : > { %v1896_v44 = vpop.f32.mrf.mxu0 }
 0x14d   : > { %v1939_v45 = vpop.f32.mrf.mxu1  ;;  %v1897_v52 = vadd.f32 %v1896_v44, %v1854_v50 }
 0x14e   : > { %v1898_v46 = vpop.f32.mrf.mxu0 }
 0x14f   : > { %v1941_v47 = vpop.f32.mrf.mxu1  ;;  %v1899_v56 = vadd.f32 %v1898_v46, %v1856_v51  ;;  %v1940_v59 = vadd.f32 %v1939_v45, %v1897_v52 }
 0x150   : > { %v1900_v28 = vpop.f32.mrf.mxu0 }
 0x151   : > { %v1943_v31 = vpop.f32.mrf.mxu1  ;;  %v1901_v58 = vadd.f32 %v1900_v28, %v1858_v55  ;;  %v1942_v63 = vadd.f32 %v1941_v47, %v1899_v56 }
 0x152   : > { %v1902_v48 = vpop.f32.mrf.mxu0 }
 0x153   : > { %v1945_v32 = vpop.f32.mrf.mxu1  ;;  %v1903_v62 = vadd.f32 %v1902_v48, %v1860_v57  ;;  %v1944_v1 = vadd.f32 %v1943_v31, %v1901_v58 }
 0x155   : > { %v1946_v5 = vadd.f32 %v1945_v32, %v1903_v62 }
 0x18c   : > { %v1982_v33 = vpop.f32.mrf.mxu0 }
 0x18d   : > { %v2025_v49 = vpop.f32.mrf.mxu1  ;;  %v1983_v0 = vadd.f32 %v1982_v33, %v1940_v59 }
 0x18e   : > { %v1984_v53 = vpop.f32.mrf.mxu0 }
 0x18f   : > { %v2027_v54 = vpop.f32.mrf.mxu1  ;;  %v1985_v2 = vadd.f32 %v1984_v53, %v1942_v63  ;;  %v2026_v7 = vadd.f32 %v2025_v49, %v1983_v0 }
 0x190   : > { %v1986_v60 = vpop.f32.mrf.mxu0 }
 0x191   : > { %v2029_v61 = vpop.f32.mrf.mxu1  ;;  %v1987_v6 = vadd.f32 %v1986_v60, %v1944_v1  ;;  %v2028_v11 = vadd.f32 %v2027_v54, %v1985_v2 }
 0x192   : > { %v1988_v3 = vpop.f32.mrf.mxu0 }
 0x193   : > { %v2031_v4 = vpop.f32.mrf.mxu1  ;;  %v1989_v10 = vadd.f32 %v1988_v3, %v1946_v5  ;;  %v2030_v15 = vadd.f32 %v2029_v61, %v1987_v6 }
 0x195   : > { %v2032_v19 = vadd.f32 %v2031_v4, %v1989_v10 }
 0x1cc   : > { %v2068_v8 = vpop.f32.mrf.mxu0 }
 0x1cd   : > { %v2111_v9 = vpop.f32.mrf.mxu1  ;;  %v2069_v12 = vadd.f32 %v2068_v8, %v2026_v7 }
 0x1ce   : > { %v2070_v13 = vpop.f32.mrf.mxu0 }
 0x1cf   : > { %v2113_v14 = vpop.f32.mrf.mxu1  ;;  %v2071_v16 = vadd.f32 %v2070_v13, %v2028_v11  ;;  %v2112_v21 = vadd.f32 %v2111_v9, %v2069_v12 }
 0x1d0   : > { %v2072_v17 = vpop.f32.mrf.mxu0 }
 0x1d1   : > { %v2115_v18 = vpop.f32.mrf.mxu1  ;;  %v2073_v20 = vadd.f32 %v2072_v17, %v2030_v15  ;;  %v3829_v30 = vadd.f32 %v2113_v14, %v2071_v16  ;;  %v2139_v26 = vmul.f32 %v2112_v21, %v2112_v21 }
 0x1d2   : > { %v2074_v22 = vpop.f32.mrf.mxu0 }
 0x1d3   : > { %v2116_v23 = vadd.f32 %v2115_v18, %v2073_v20  ;;  %v2075_v29 = vadd.f32 %v2074_v22, %v2032_v19  ;;  %v2117_v34 = vpop.f32.mrf.mxu1  ;;  %v2140_v39 = vmul.f32 %v3829_v30, %v3829_v30 }
 0x1d5   : > { %v2121_v35 = vsel %vm2120_vm0, %v2116_v23, 0.0  ;;  %v2141_v24 = vmul.f32 %v2116_v23, %v2116_v23  ;;  %v3832_v25 = vadd.f32 %v2117_v34, %v2075_v29 }
 0x1d6   : > { %v2122_v27 = vadd.f32 %v2121_v35, %v2112_v21 }
 0x1d7   : > { %v2143_v36 = vsel %vm2120_vm0, %v2141_v24, 0.0  ;;  %v2129_v37 = vsel %vm2120_vm0, %v3832_v25, 0.0  ;;  %v2142_v38 = vmul.f32 %v3832_v25, %v3832_v25 }
 0x1d8   : > { %v2123_v40 = vrot.slane %v2122_v27, 4  ;;  %v2144_v41 = vadd.f32 %v2143_v36, %v2139_v26  ;;  %v2130_v42 = vadd.f32 %v2129_v37, %v3829_v30  ;;  %v2211_v36 = vld [vmem:[%s143_s20 + $0x8] sm:$0x11] }
 0x1d9   : > { %v2151_v43 = vsel %vm2120_vm0, %v2142_v38, 0.0 }
 0x1da   : > { %v2124_v44 = vadd.f32 %v2123_v40, %v2122_v27  ;;  %v2145_v45 = vrot.slane %v2144_v41, 4  ;;  %v2131_v46 = vrot.slane %v2130_v42, 4  ;;  %v2152_v47 = vadd.f32 %v2151_v43, %v2140_v39 }
 0x1dc   : > { %v2125_v28 = vrot.slane %v2124_v44, 2  ;;  %v2146_v31 = vadd.f32 %v2145_v45, %v2144_v41  ;;  %v2132_v48 = vadd.f32 %v2131_v46, %v2130_v42  ;;  %v2153_v32 = vrot.slane %v2152_v47, 4 }
 0x1de   : > { %v2126_v33 = vadd.f32 %v2125_v28, %v2124_v44  ;;  %v2147_v49 = vrot.slane %v2146_v31, 2  ;;  %v2133_v50 = vrot.slane %v2132_v48, 2  ;;  %v2154_v51 = vadd.f32 %v2153_v32, %v2152_v47 }
 0x1e0   : > { %v2127_v52 = vrot.slane %v2126_v33, 1  ;;  %v2148_v53 = vadd.f32 %v2147_v49, %v2146_v31  ;;  %v2134_v54 = vadd.f32 %v2133_v50, %v2132_v48  ;;  %v2155_v55 = vrot.slane %v2154_v51, 2 }
 0x1e2   : > { %v2128_v56 = vadd.f32 %v2127_v52, %v2126_v33  ;;  %v2149_v57 = vrot.slane %v2148_v53, 1  ;;  %v2135_v58 = vrot.slane %v2134_v54, 1  ;;  %v2156_v59 = vadd.f32 %v2155_v55, %v2154_v51 }
 0x1e4   : > { %v2137_v60 = vmul.f32 0.11111111, %v2128_v56  ;;  %v2150_v61 = vadd.f32 %v2149_v57, %v2148_v53  ;;  %v2136_v62 = vadd.f32 %v2135_v58, %v2134_v54  ;;  %v2157_v63 = vrot.slane %v2156_v59, 1 }
 0x1e6   : > { %v2159_v0 = vmul.f32 0.11111111, %v2150_v61  ;;  %v2161_v1 = vmul.f32 %v2137_v60, %v2137_v60  ;;  %v2138_v2 = vmul.f32 0.11111111, %v2136_v62  ;;  %v2158_v3 = vadd.f32 %v2157_v63, %v2156_v59 }
 0x1e7   : > { %v2167_v12 = vsub.f32 %v2112_v21, %v2137_v60  ;;  %v2169_v13 = vsub.f32 %v2116_v23, %v2137_v60 }
 0x1e8   : > { %v2163_v4 = vsub.f32 %v2159_v0, %v2161_v1  ;;  %v2160_v5 = vmul.f32 0.11111111, %v2158_v3  ;;  %v2162_v6 = vmul.f32 %v2138_v2, %v2138_v2  ;;  %v2168_v17 = vsub.f32 %v3829_v30, %v2138_v2 }
 0x1e9   : > { %v2170_v18 = vsub.f32 %v3832_v25, %v2138_v2 }
 0x1ea   : > { %v2165_v7 = vmax.f32 %v2163_v4, 0.0  ;;  %v2164_v8 = vsub.f32 %v2160_v5, %v2162_v6 }
 0x1ec   : > { %v2171_v9 = vadd.f32 1e-05, %v2165_v7  ;;  %v2166_v10 = vmax.f32 %v2164_v8, 0.0 }
 0x1ee   : > { %2950 = vrsqrt.f32 %v2171_v9  ;;  %v2172_v11 = vadd.f32 1e-05, %v2166_v10 }
 0x1f0   : > { %2952 = vrsqrt.f32 %v2172_v11 }
 0x1fb   : > { %v2951_v14 = vpop.eup %2950 }
 0x1fc   : > { %v2175_v15 = vmul.f32 %v2951_v14, %v2167_v12  ;;  %v2177_v16 = vmul.f32 %v2951_v14, %v2169_v13 }
 0x1fd   : > { %v2953_v19 = vpop.eup %2952 }
 0x1fe   : > { %v2183_v20 = vmul.f32 0.2, %v2175_v15  ;;  %v2185_v22 = vmul.f32 0.2, %v2177_v16  ;;  %v2176_v21 = vmul.f32 %v2953_v19, %v2168_v17  ;;  %v2178_v23 = vmul.f32 %v2953_v19, %v2170_v18 }
 0x1ff   : > { %vm2179_vm5 = vcmp.gt.f32.partialorder %v2175_v15, 0.0  ;;  %vm2181_vm6 = vcmp.gt.f32.partialorder %v2177_v16, 0.0 }
 0x200   : > { %vm2180_vm8 = vcmp.gt.f32.partialorder %v2176_v21, 0.0  ;;  %vm2182_vm9 = vcmp.gt.f32.partialorder %v2178_v23, 0.0  ;;  %v2184_v30 = vmul.f32 0.2, %v2176_v21  ;;  %v2186_v35 = vmul.f32 0.2, %v2178_v23 }
 0x201   : > { %v2187_v24 = vsel %vm2179_vm5, %v2175_v15, %v2183_v20  ;;  %v2189_v25 = vsel %vm2181_vm6, %v2177_v16, %v2185_v22 }
 0x202   : > { %v2188_v26 = vsel %vm2180_vm8, %v2176_v21, %v2184_v30  ;;  %v2190_v27 = vsel %vm2182_vm9, %v2178_v23, %v2186_v35 }
 0x203   : > { %v2556_v37 = vpack.c.bf16 %v2188_v26, %v2187_v24  ;;  %v2557_v38 = vpack.c.bf16 %v2190_v27, %v2189_v25 }
 0x205   : > { %2203 = vst [vmem:[%s143_s20] sm:$0xff] %v2556_v37  ;;  %v2212_v39 = vsel %vm2210_vm10, %v2557_v38, %v2211_v36 }
 0x206   : > { %2213 = vst [vmem:[%s143_s20 + $0x8] sm:$0x11] %v2212_v39 }
 0x207 PF: > { %s12_s9 = sadd.s32 1, %s2960_s9  }
 0x208   : > { %p9_p4 = scmp.ge.s32.totalorder %s12_s9, 4  }
 0x20a   :  { %11 = sbr.rel (!%p9_p4) target bundleno = 1 (0x1), region = 58 }

// kernel: discriminator_forward.9
= control target key start
LH: loop header
LB: loop body
LE: loop exit
PB: predicated region body
PF: predicated region fallthrough
CT: control target
= control target key end

     0   :  { %s4617_s1 = inlined_call_operand.vmem [shape: bf16[4096,128], index: 1, kind: input, shape index: {}]   ;;  %s4618_s0 = inlined_call_operand.vmem [shape: bf16[8,4096], index: 0, kind: input, shape index: {}]   ;;  %s4619_s2 = inlined_call_operand.vmem [shape: f32[1,128], index: 2, kind: input, shape index: {}]   ;;  %s4620_s3 = inlined_call_operand.vmem [shape: f32[8,128], index: 3, kind: output, shape index: {}]  }
   0x1   :  { %v3484_v0 = vld [vmem:[%s4617_s1 + $0x78] sm:$0xff]   ;;  %v3488_v4 = vld [vmem:[%s4617_s1 + $0x70] sm:$0xff]   ;;  %v3492_v8 = vld [vmem:[%s4617_s1 + $0x68] sm:$0xff]  }
   0x2   :  { %v3485_v1 = vld [vmem:[%s4617_s1 + $0xf8] sm:$0xff]   ;;  %3132 = vmatprep.subr.bf16.mxu0 %v3484_v0  ;;  %v3489_v5 = vld [vmem:[%s4617_s1 + $0xf0] sm:$0xff]   ;;  %v3493_v9 = vld [vmem:[%s4617_s1 + $0xe8] sm:$0xff]  }
   0x3   :  { %v3486_v2 = vld [vmem:[%s4617_s1 + $0x38] sm:$0xff]   ;;  %3154 = vmatprep.subr.bf16.mxu1 %v3485_v1  ;;  %v3490_v6 = vld [vmem:[%s4617_s1 + $0x30] sm:$0xff]   ;;  %v3494_v10 = vld [vmem:[%s4617_s1 + $0x28] sm:$0xff]  }
   0x4   :  { %v3487_v3 = vld [vmem:[%s4617_s1 + $0xb8] sm:$0xff]   ;;  %3133 = vmatpush3.bf16.msra.mxu0 %v3486_v2  ;;  %v3491_v7 = vld [vmem:[%s4617_s1 + $0xb0] sm:$0xff]   ;;  %v3495_v11 = vld [vmem:[%s4617_s1 + $0xa8] sm:$0xff]  }
   0x5   :  { %3155 = vmatpush3.bf16.msra.mxu1 %v3487_v3  ;;  %3134 = vmatprep.subr.bf16.mxu0 %v3488_v4  ;;  %v3496_v12 = vld [vmem:[%s4617_s1 + $0x60] sm:$0xff]   ;;  %v3500_v16 = vld [vmem:[%s4617_s1 + $0x58] sm:$0xff]   ;;  %v3504_v20 = vld [vmem:[%s4617_s1 + $0x50] sm:$0xff]  }
   0x6   :  { %3156 = vmatprep.subr.bf16.mxu1 %v3489_v5  ;;  %v3497_v13 = vld [vmem:[%s4617_s1 + $0xe0] sm:$0xff]   ;;  %v3501_v17 = vld [vmem:[%s4617_s1 + $0xd8] sm:$0xff]   ;;  %v3505_v21 = vld [vmem:[%s4617_s1 + $0xd0] sm:$0xff]  }
   0x7   :  { %v3498_v14 = vld [vmem:[%s4617_s1 + $0x20] sm:$0xff]   ;;  %v3502_v18 = vld [vmem:[%s4617_s1 + $0x18] sm:$0xff]   ;;  %v3506_v22 = vld [vmem:[%s4617_s1 + $0x10] sm:$0xff]  }
   0x8   :  { %3135 = vmatpush3.bf16.msra.mxu0 %v3490_v6  ;;  %v3499_v15 = vld [vmem:[%s4617_s1 + $0xa0] sm:$0xff]   ;;  %v3503_v19 = vld [vmem:[%s4617_s1 + $0x98] sm:$0xff]   ;;  %v3507_v23 = vld [vmem:[%s4617_s1 + $0x90] sm:$0xff]  }
   0x9   :  { %3157 = vmatpush3.bf16.msra.mxu1 %v3491_v7  ;;  %3136 = vmatprep.subr.bf16.mxu0 %v3492_v8  ;;  %v3508_v24 = vld [vmem:[%s4617_s1 + $0x48] sm:$0xff]   ;;  %v3512_v28 = vld [vmem:[%s4617_s1 + $0x40] sm:$0xff]   ;;  %v3520_v38 = vld [vmem:[%s4617_s1 + $0x178] sm:$0xff]  }
   0xa   :  { %3158 = vmatprep.subr.bf16.mxu1 %v3493_v9  ;;  %v3509_v25 = vld [vmem:[%s4617_s1 + $0xc8] sm:$0xff]   ;;  %v3513_v29 = vld [vmem:[%s4617_s1 + $0xc0] sm:$0xff]   ;;  %v3521_v39 = vld [vmem:[%s4617_s1 + $0x1f8] sm:$0xff]  }
   0xb   :  { %v3510_v26 = vld [vmem:[%s4617_s1 + $0x8] sm:$0xff]   ;;  %v3514_v30 = vld [vmem:[%s4617_s1] sm:$0xff]   ;;  %v3522_v40 = vld [vmem:[%s4617_s1 + $0x138] sm:$0xff]  }
   0xc   :  { %3137 = vmatpush3.bf16.msra.mxu0 %v3494_v10  ;;  %v3511_v27 = vld [vmem:[%s4617_s1 + $0x88] sm:$0xff]   ;;  %v3515_v31 = vld [vmem:[%s4617_s1 + $0x80] sm:$0xff]   ;;  %v3523_v41 = vld [vmem:[%s4617_s1 + $0x1b8] sm:$0xff]  }
   0xd   :  { %3159 = vmatpush3.bf16.msra.mxu1 %v3495_v11  ;;  %3138 = vmatprep.subr.bf16.mxu0 %v3496_v12  ;;  %v15_v32 = vld [vmem:[%s4618_s0] sm:$0xff]  ;;  %v16_v33 = vld [vmem:[%s4618_s0 + $0x8] sm:$0xff]  ;;  %v3524_v42 = vld [vmem:[%s4617_s1 + $0x170] sm:$0xff]  }
   0xe   :  { %3160 = vmatprep.subr.bf16.mxu1 %v3497_v13  ;;  %v2844_v34 = vcombine.low %v15_v32, %v15_v32  ;;  %v2845_v35 = vcombine.high %v15_v32, %v15_v32  ;;  %v2846_v36 = vcombine.low %v16_v33, %v16_v33  ;;  %v2847_v37 = vcombine.high %v16_v33, %v16_v33  ;;  %v3525_v43 = vld [vmem:[%s4617_s1 + $0x1f0] sm:$0xff]   ;;  %v3528_v46 = vld [vmem:[%s4617_s1 + $0x168] sm:$0xff]   ;;  %v3532_v50 = vld [vmem:[%s4617_s1 + $0x160] sm:$0xff]  }
   0xf   :  { %v3526_v44 = vld [vmem:[%s4617_s1 + $0x130] sm:$0xff]   ;;  %v3529_v47 = vld [vmem:[%s4617_s1 + $0x1e8] sm:$0xff]   ;;  %v3533_v51 = vld [vmem:[%s4617_s1 + $0x1e0] sm:$0xff]  }
  0x10   :  { %3139 = vmatpush3.bf16.msra.mxu0 %v3498_v14  ;;  %2230 = vmatprep.mubr.bf16.mxu0 %v2845_v35  ;;  %v3527_v45 = vld [vmem:[%s4617_s1 + $0x1b0] sm:$0xff]   ;;  %v3530_v48 = vld [vmem:[%s4617_s1 + $0x128] sm:$0xff]   ;;  %v3534_v52 = vld [vmem:[%s4617_s1 + $0x120] sm:$0xff]  }
  0x11   :  { %3161 = vmatpush3.bf16.msra.mxu1 %v3499_v15  ;;  %3140 = vmatprep.subr.bf16.mxu0 %v3500_v16  ;;  %v3531_v49 = vld [vmem:[%s4617_s1 + $0x1a8] sm:$0xff]   ;;  %v3535_v53 = vld [vmem:[%s4617_s1 + $0x1a0] sm:$0xff]   ;;  %v3536_v54 = vld [vmem:[%s4617_s1 + $0x158] sm:$0xff]  }
  0x12   :  { %3162 = vmatprep.subr.bf16.mxu1 %v3501_v17  ;;  %2270 = vmatprep.mubr.bf16.mxu1 %v2847_v37  ;;  %v3537_v55 = vld [vmem:[%s4617_s1 + $0x1d8] sm:$0xff]   ;;  %v3540_v58 = vld [vmem:[%s4617_s1 + $0x150] sm:$0xff]   ;;  %v3544_v62 = vld [vmem:[%s4617_s1 + $0x148] sm:$0xff]  }
  0x13   :  { %v3538_v56 = vld [vmem:[%s4617_s1 + $0x118] sm:$0xff]   ;;  %v3541_v59 = vld [vmem:[%s4617_s1 + $0x1d0] sm:$0xff]   ;;  %v3545_v63 = vld [vmem:[%s4617_s1 + $0x1c8] sm:$0xff]  }
  0x14   :  { %3141 = vmatpush3.bf16.msra.mxu0 %v3502_v18  ;;  %v3539_v57 = vld [vmem:[%s4617_s1 + $0x198] sm:$0xff]   ;;  %v3542_v60 = vld [vmem:[%s4617_s1 + $0x110] sm:$0xff]   ;;  %v3546_v0 = vld [vmem:[%s4617_s1 + $0x108] sm:$0xff]  }
  0x15   :  { %3163 = vmatpush3.bf16.msra.mxu1 %v3503_v19  ;;  %3142 = vmatprep.subr.bf16.mxu0 %v3504_v20  ;;  %v3543_v61 = vld [vmem:[%s4617_s1 + $0x190] sm:$0xff]   ;;  %v3547_v1 = vld [vmem:[%s4617_s1 + $0x188] sm:$0xff]   ;;  %v3548_v2 = vld [vmem:[%s4617_s1 + $0x140] sm:$0xff]  }
  0x16   :  { %3164 = vmatprep.subr.bf16.mxu1 %v3505_v21  ;;  %v3549_v3 = vld [vmem:[%s4617_s1 + $0x1c0] sm:$0xff]   ;;  %v17_v6 = vld [vmem:[%s4618_s0 + $0x10] sm:$0xff]  ;;  %v18_v9 = vld [vmem:[%s4618_s0 + $0x18] sm:$0xff] }
  0x17   :  { %v3550_v4 = vld [vmem:[%s4617_s1 + $0x100] sm:$0xff]   ;;  %v2848_v7 = vcombine.low %v17_v6, %v17_v6  ;;  %v2849_v8 = vcombine.high %v17_v6, %v17_v6  ;;  %v2850_v10 = vcombine.low %v18_v9, %v18_v9  ;;  %v2851_v11 = vcombine.high %v18_v9, %v18_v9  ;;  %v3556_v12 = vld [vmem:[%s4617_s1 + $0x278] sm:$0xff]   ;;  %v3560_v16 = vld [vmem:[%s4617_s1 + $0x270] sm:$0xff]  }
  0x18   :  { %3143 = vmatpush3.bf16.msra.mxu0 %v3506_v22  ;;  %v3551_v5 = vld [vmem:[%s4617_s1 + $0x180] sm:$0xff]   ;;  %v3557_v13 = vld [vmem:[%s4617_s1 + $0x2f8] sm:$0xff]   ;;  %v3561_v17 = vld [vmem:[%s4617_s1 + $0x2f0] sm:$0xff]  }
  0x19   :  { %3165 = vmatpush3.bf16.msra.mxu1 %v3507_v23  ;;  %3144 = vmatprep.subr.bf16.mxu0 %v3508_v24  ;;  %v3558_v14 = vld [vmem:[%s4617_s1 + $0x238] sm:$0xff]   ;;  %v3562_v18 = vld [vmem:[%s4617_s1 + $0x230] sm:$0xff]   ;;  %v3564_v20 = vld [vmem:[%s4617_s1 + $0x268] sm:$0xff]  }
  0x1a   :  { %3166 = vmatprep.subr.bf16.mxu1 %v3509_v25  ;;  %v3559_v15 = vld [vmem:[%s4617_s1 + $0x2b8] sm:$0xff]   ;;  %v3563_v19 = vld [vmem:[%s4617_s1 + $0x2b0] sm:$0xff]   ;;  %v3565_v21 = vld [vmem:[%s4617_s1 + $0x2e8] sm:$0xff]  }
  0x1b   :  { %v3566_v22 = vld [vmem:[%s4617_s1 + $0x228] sm:$0xff]   ;;  %v3568_v24 = vld [vmem:[%s4617_s1 + $0x260] sm:$0xff]   ;;  %v3576_v32 = vld [vmem:[%s4617_s1 + $0x250] sm:$0xff]  }
  0x1c   :  { %3145 = vmatpush3.bf16.msra.mxu0 %v3510_v26  ;;  %v3567_v23 = vld [vmem:[%s4617_s1 + $0x2a8] sm:$0xff]   ;;  %v3569_v25 = vld [vmem:[%s4617_s1 + $0x2e0] sm:$0xff]   ;;  %v3577_v33 = vld [vmem:[%s4617_s1 + $0x2d0] sm:$0xff]  }
  0x1d   :  { %3167 = vmatpush3.bf16.msra.mxu1 %v3511_v27  ;;  %3146 = vmatprep.subr.bf16.mxu0 %v3512_v28  ;;  %v3570_v26 = vld [vmem:[%s4617_s1 + $0x220] sm:$0xff]   ;;  %v3572_v28 = vld [vmem:[%s4617_s1 + $0x258] sm:$0xff]   ;;  %v3579_v35 = vld [vmem:[%s4617_s1 + $0x290] sm:$0xff]  }
  0x1e   :  { %3168 = vmatprep.subr.bf16.mxu1 %v3513_v29  ;;  %v3571_v27 = vld [vmem:[%s4617_s1 + $0x2a0] sm:$0xff]   ;;  %v3573_v29 = vld [vmem:[%s4617_s1 + $0x2d8] sm:$0xff]   ;;  %v3581_v37 = vld [vmem:[%s4617_s1 + $0x2c8] sm:$0xff]  }
  0x1f   :  { %v3612_v6 = vld [vmem:[%s4617_s1 + $0x350] sm:$0xff]  }
  0x20   :  { %3147 = vmatpush3.bf16.msra.mxu0 %v3514_v30  ;;  %v3574_v30 = vld [vmem:[%s4617_s1 + $0x218] sm:$0xff]   ;;  %v3615_v9 = vld [vmem:[%s4617_s1 + $0x390] sm:$0xff]  }
  0x21   :  { %3169 = vmatpush3.bf16.msra.mxu1 %v3515_v31  ;;  %3176 = vmatprep.subr.bf16.mxu0 %v3520_v38  ;;  %v3575_v31 = vld [vmem:[%s4617_s1 + $0x298] sm:$0xff]   ;;  %v3582_v38 = vld [vmem:[%s4617_s1 + $0x208] sm:$0xff]  }
  0x22   :  { %3198 = vmatprep.subr.bf16.mxu1 %v3521_v39  ;;  %v3583_v39 = vld [vmem:[%s4617_s1 + $0x288] sm:$0xff]  }
  0x23   :  { %2231 = vmatmul.mubr.bf16.vlgmr.msra.gmra.mxu0 %v2844_v34  ;;  %v3578_v34 = vld [vmem:[%s4617_s1 + $0x210] sm:$0xff]  }
  0x24   :  { %2271 = vmatmul.mubr.bf16.vlgmr.msra.gmra.mxu1 %v2846_v36  ;;  %3177 = vmatpush3.bf16.msra.mxu0 %v3522_v40  ;;  %v3580_v36 = vld [vmem:[%s4617_s1 + $0x248] sm:$0xff]   ;;  %v3584_v40 = vld [vmem:[%s4617_s1 + $0x240] sm:$0xff]  }
  0x25   :  { %3199 = vmatpush3.bf16.msra.mxu1 %v3523_v41  ;;  %3178 = vmatprep.subr.bf16.mxu0 %v3524_v42  ;;  %v3585_v41 = vld [vmem:[%s4617_s1 + $0x2c0] sm:$0xff]  }
  0x26   :  { %3200 = vmatprep.subr.bf16.mxu1 %v3525_v43  ;;  %2310 = vmatprep.mubr.bf16.mxu0 %v2849_v8  ;;  %v3586_v42 = vld [vmem:[%s4617_s1 + $0x200] sm:$0xff]   ;;  %v3614_v8 = vld [vmem:[%s4617_s1 + $0x310] sm:$0xff]  }
  0x27   :  { %2350 = vmatprep.mubr.bf16.mxu1 %v2851_v11  ;;  %v3587_v43 = vld [vmem:[%s4617_s1 + $0x280] sm:$0xff]   ;;  %v3617_v11 = vld [vmem:[%s4617_s1 + $0x3c8] sm:$0xff]  }
  0x28   :  { %3179 = vmatpush3.bf16.msra.mxu0 %v3526_v44  ;;  %v19_v44 = vld [vmem:[%s4618_s0 + $0x20] sm:$0xff] }
  0x29   :  { %3201 = vmatpush3.bf16.msra.mxu1 %v3527_v45  ;;  %3180 = vmatprep.subr.bf16.mxu0 %v3528_v46  ;;  %v20_v45 = vld [vmem:[%s4618_s0 + $0x28] sm:$0xff]  ;;  %v2852_v46 = vcombine.low %v19_v44, %v19_v44 }
  0x2a   :  { %3202 = vmatprep.subr.bf16.mxu1 %v3529_v47  ;;  %v2853_v47 = vcombine.high %v19_v44, %v19_v44  ;;  %v3648_v44 = vld [vmem:[%s4617_s1 + $0x450] sm:$0xff]  }
  0x2c   :  { %3181 = vmatpush3.bf16.msra.mxu0 %v3530_v48  ;;  %v2854_v48 = vcombine.low %v20_v45, %v20_v45 }
  0x2d   :  { %3203 = vmatpush3.bf16.msra.mxu1 %v3531_v49  ;;  %3182 = vmatprep.subr.bf16.mxu0 %v3532_v50  ;;  %v2855_v49 = vcombine.high %v20_v45, %v20_v45  ;;  %v3592_v50 = vld [vmem:[%s4617_s1 + $0x378] sm:$0xff]   ;;  %v3649_v45 = vld [vmem:[%s4617_s1 + $0x4d0] sm:$0xff]  }
  0x2e   :  { %3204 = vmatprep.subr.bf16.mxu1 %v3533_v51  ;;  %v3593_v51 = vld [vmem:[%s4617_s1 + $0x3f8] sm:$0xff]  }
  0x30   :  { %3183 = vmatpush3.bf16.msra.mxu0 %v3534_v52  ;;  %v3594_v52 = vld [vmem:[%s4617_s1 + $0x338] sm:$0xff]  }
  0x31   :  { %3205 = vmatpush3.bf16.msra.mxu1 %v3535_v53  ;;  %3184 = vmatprep.subr.bf16.mxu0 %v3536_v54  ;;  %v3595_v53 = vld [vmem:[%s4617_s1 + $0x3b8] sm:$0xff]   ;;  %v3596_v54 = vld [vmem:[%s4617_s1 + $0x370] sm:$0xff]  }
  0x32   :  { %3206 = vmatprep.subr.bf16.mxu1 %v3537_v55  ;;  %v3597_v55 = vld [vmem:[%s4617_s1 + $0x3f0] sm:$0xff]  }
  0x34   :  { %3185 = vmatpush3.bf16.msra.mxu0 %v3538_v56  ;;  %v3598_v56 = vld [vmem:[%s4617_s1 + $0x330] sm:$0xff]  }
  0x35   :  { %3207 = vmatpush3.bf16.msra.mxu1 %v3539_v57  ;;  %3186 = vmatprep.subr.bf16.mxu0 %v3540_v58  ;;  %v3599_v57 = vld [vmem:[%s4617_s1 + $0x3b0] sm:$0xff]   ;;  %v3600_v58 = vld [vmem:[%s4617_s1 + $0x368] sm:$0xff]  }
  0x36   :  { %3208 = vmatprep.subr.bf16.mxu1 %v3541_v59  ;;  %v3601_v59 = vld [vmem:[%s4617_s1 + $0x3e8] sm:$0xff]  }
  0x38   :  { %3187 = vmatpush3.bf16.msra.mxu0 %v3542_v60  ;;  %v3602_v60 = vld [vmem:[%s4617_s1 + $0x328] sm:$0xff]  }
  0x39   :  { %3209 = vmatpush3.bf16.msra.mxu1 %v3543_v61  ;;  %3188 = vmatprep.subr.bf16.mxu0 %v3544_v62  ;;  %v3603_v61 = vld [vmem:[%s4617_s1 + $0x3a8] sm:$0xff]   ;;  %v3604_v62 = vld [vmem:[%s4617_s1 + $0x360] sm:$0xff]  }
  0x3a   :  { %3210 = vmatprep.subr.bf16.mxu1 %v3545_v63  ;;  %v3605_v63 = vld [vmem:[%s4617_s1 + $0x3e0] sm:$0xff]  }
  0x3c   :  { %3189 = vmatpush3.bf16.msra.mxu0 %v3546_v0  ;;  %v3606_v0 = vld [vmem:[%s4617_s1 + $0x320] sm:$0xff]  }
  0x3d   :  { %3211 = vmatpush3.bf16.msra.mxu1 %v3547_v1  ;;  %3190 = vmatprep.subr.bf16.mxu0 %v3548_v2  ;;  %v3607_v1 = vld [vmem:[%s4617_s1 + $0x3a0] sm:$0xff]   ;;  %v3608_v2 = vld [vmem:[%s4617_s1 + $0x358] sm:$0xff]  }
  0x3e   :  { %3212 = vmatprep.subr.bf16.mxu1 %v3549_v3  ;;  %v3609_v3 = vld [vmem:[%s4617_s1 + $0x3d8] sm:$0xff]  }
  0x40   :  { %3191 = vmatpush3.bf16.msra.mxu0 %v3550_v4  ;;  %v3610_v4 = vld [vmem:[%s4617_s1 + $0x318] sm:$0xff]  }
  0x41   :  { %3213 = vmatpush3.bf16.msra.mxu1 %v3551_v5  ;;  %3220 = vmatprep.subr.bf16.mxu0 %v3556_v12  ;;  %v3611_v5 = vld [vmem:[%s4617_s1 + $0x398] sm:$0xff]   ;;  %v3618_v12 = vld [vmem:[%s4617_s1 + $0x308] sm:$0xff]  }
  0x42   :  { %3242 = vmatprep.subr.bf16.mxu1 %v3557_v13  ;;  %v3619_v13 = vld [vmem:[%s4617_s1 + $0x388] sm:$0xff]  }
  0x43   :  { %2311 = vmatmul.mubr.bf16.vlgmr.msra.gmra.mxu0 %v2848_v7  ;;  %v3613_v7 = vld [vmem:[%s4617_s1 + $0x3d0] sm:$0xff]  }
  0x44   :  { %2351 = vmatmul.mubr.bf16.vlgmr.msra.gmra.mxu1 %v2850_v10  ;;  %3221 = vmatpush3.bf16.msra.mxu0 %v3558_v14  ;;  %v3616_v10 = vld [vmem:[%s4617_s1 + $0x348] sm:$0xff]   ;;  %v3620_v14 = vld [vmem:[%s4617_s1 + $0x340] sm:$0xff]  }
  0x45   :  { %3243 = vmatpush3.bf16.msra.mxu1 %v3559_v15  ;;  %3222 = vmatprep.subr.bf16.mxu0 %v3560_v16  ;;  %v3621_v15 = vld [vmem:[%s4617_s1 + $0x3c0] sm:$0xff]  }
  0x46   :  { %3244 = vmatprep.subr.bf16.mxu1 %v3561_v17  ;;  %2390 = vmatprep.mubr.bf16.mxu0 %v2853_v47  ;;  %v3622_v16 = vld [vmem:[%s4617_s1 + $0x300] sm:$0xff]   ;;  %v3651_v47 = vld [vmem:[%s4617_s1 + $0x490] sm:$0xff]  }
  0x47   :  { %2430 = vmatprep.mubr.bf16.mxu1 %v2855_v49  ;;  %v3623_v17 = vld [vmem:[%s4617_s1 + $0x380] sm:$0xff]   ;;  %v3653_v49 = vld [vmem:[%s4617_s1 + $0x4c8] sm:$0xff]  }
  0x48   :  { %3223 = vmatpush3.bf16.msra.mxu0 %v3562_v18  ;;  %v21_v18 = vld [vmem:[%s4618_s0 + $0x30] sm:$0xff] }
  0x49   :  { %3245 = vmatpush3.bf16.msra.mxu1 %v3563_v19  ;;  %3224 = vmatprep.subr.bf16.mxu0 %v3564_v20  ;;  %v22_v19 = vld [vmem:[%s4618_s0 + $0x38] sm:$0xff]  ;;  %v2856_v20 = vcombine.low %v21_v18, %v21_v18 }
  0x4a   :  { %3246 = vmatprep.subr.bf16.mxu1 %v3565_v21  ;;  %v2857_v21 = vcombine.high %v21_v18, %v21_v18  ;;  %v3684_v18 = vld [vmem:[%s4617_s1 + $0x550] sm:$0xff]  }
  0x4c   :  { %3225 = vmatpush3.bf16.msra.mxu0 %v3566_v22  ;;  %v2858_v22 = vcombine.low %v22_v19, %v22_v19 }
  0x4d   :  { %3247 = vmatpush3.bf16.msra.mxu1 %v3567_v23  ;;  %3226 = vmatprep.subr.bf16.mxu0 %v3568_v24  ;;  %v3628_v23 = vld [vmem:[%s4617_s1 + $0x478] sm:$0xff]   ;;  %v2859_v24 = vcombine.high %v22_v19, %v22_v19  ;;  %v3685_v19 = vld [vmem:[%s4617_s1 + $0x5d0] sm:$0xff]  }
  0x4e   :  { %3248 = vmatprep.subr.bf16.mxu1 %v3569_v25  ;;  %v3629_v25 = vld [vmem:[%s4617_s1 + $0x4f8] sm:$0xff]  }
  0x50   :  { %3227 = vmatpush3.bf16.msra.mxu0 %v3570_v26  ;;  %v3630_v26 = vld [vmem:[%s4617_s1 + $0x438] sm:$0xff]  }
  0x51   :  { %3249 = vmatpush3.bf16.msra.mxu1 %v3571_v27  ;;  %3228 = vmatprep.subr.bf16.mxu0 %v3572_v28  ;;  %v3631_v27 = vld [vmem:[%s4617_s1 + $0x4b8] sm:$0xff]   ;;  %v3632_v28 = vld [vmem:[%s4617_s1 + $0x470] sm:$0xff]  }
  0x52   :  { %3250 = vmatprep.subr.bf16.mxu1 %v3573_v29  ;;  %v3633_v29 = vld [vmem:[%s4617_s1 + $0x4f0] sm:$0xff]  }
  0x54   :  { %3229 = vmatpush3.bf16.msra.mxu0 %v3574_v30  ;;  %v3634_v30 = vld [vmem:[%s4617_s1 + $0x430] sm:$0xff]  }
  0x55   :  { %3251 = vmatpush3.bf16.msra.mxu1 %v3575_v31  ;;  %3230 = vmatprep.subr.bf16.mxu0 %v3576_v32  ;;  %v3635_v31 = vld [vmem:[%s4617_s1 + $0x4b0] sm:$0xff]   ;;  %v3636_v32 = vld [vmem:[%s4617_s1 + $0x468] sm:$0xff]  }
  0x56   :  { %3252 = vmatprep.subr.bf16.mxu1 %v3577_v33  ;;  %v3637_v33 = vld [vmem:[%s4617_s1 + $0x4e8] sm:$0xff]  }
  0x58   :  { %3231 = vmatpush3.bf16.msra.mxu0 %v3578_v34  ;;  %v3638_v34 = vld [vmem:[%s4617_s1 + $0x428] sm:$0xff]  }
  0x59   :  { %3253 = vmatpush3.bf16.msra.mxu1 %v3579_v35  ;;  %3232 = vmatprep.subr.bf16.mxu0 %v3580_v36  ;;  %v3639_v35 = vld [vmem:[%s4617_s1 + $0x4a8] sm:$0xff]   ;;  %v3640_v36 = vld [vmem:[%s4617_s1 + $0x460] sm:$0xff]  }
  0x5a   :  { %3254 = vmatprep.subr.bf16.mxu1 %v3581_v37  ;;  %v3641_v37 = vld [vmem:[%s4617_s1 + $0x4e0] sm:$0xff]  }
  0x5c   :  { %3233 = vmatpush3.bf16.msra.mxu0 %v3582_v38  ;;  %v3642_v38 = vld [vmem:[%s4617_s1 + $0x420] sm:$0xff]  }
  0x5d   :  { %3255 = vmatpush3.bf16.msra.mxu1 %v3583_v39  ;;  %3234 = vmatprep.subr.bf16.mxu0 %v3584_v40  ;;  %v3643_v39 = vld [vmem:[%s4617_s1 + $0x4a0] sm:$0xff]   ;;  %v3644_v40 = vld [vmem:[%s4617_s1 + $0x458] sm:$0xff]  }
  0x5e   :  { %3256 = vmatprep.subr.bf16.mxu1 %v3585_v41  ;;  %v3645_v41 = vld [vmem:[%s4617_s1 + $0x4d8] sm:$0xff]  }
  0x60   :  { %3235 = vmatpush3.bf16.msra.mxu0 %v3586_v42  ;;  %v3646_v42 = vld [vmem:[%s4617_s1 + $0x418] sm:$0xff]  }
  0x61   :  { %3257 = vmatpush3.bf16.msra.mxu1 %v3587_v43  ;;  %3264 = vmatprep.subr.bf16.mxu0 %v3592_v50  ;;  %v3647_v43 = vld [vmem:[%s4617_s1 + $0x498] sm:$0xff]   ;;  %v3654_v50 = vld [vmem:[%s4617_s1 + $0x408] sm:$0xff]  }
  0x62   :  { %3286 = vmatprep.subr.bf16.mxu1 %v3593_v51  ;;  %v3655_v51 = vld [vmem:[%s4617_s1 + $0x488] sm:$0xff]  }
  0x63   :  { %2391 = vmatmul.mubr.bf16.vlgmr.msra.gmra.mxu0 %v2852_v46  ;;  %v3650_v46 = vld [vmem:[%s4617_s1 + $0x410] sm:$0xff]  }
  0x64   :  { %2431 = vmatmul.mubr.bf16.vlgmr.msra.gmra.mxu1 %v2854_v48  ;;  %3265 = vmatpush3.bf16.msra.mxu0 %v3594_v52  ;;  %v3652_v48 = vld [vmem:[%s4617_s1 + $0x448] sm:$0xff]   ;;  %v3656_v52 = vld [vmem:[%s4617_s1 + $0x440] sm:$0xff]  }
  0x65   :  { %3287 = vmatpush3.bf16.msra.mxu1 %v3595_v53  ;;  %3266 = vmatprep.subr.bf16.mxu0 %v3596_v54  ;;  %v3657_v53 = vld [vmem:[%s4617_s1 + $0x4c0] sm:$0xff]  }
  0x66   :  { %3288 = vmatprep.subr.bf16.mxu1 %v3597_v55  ;;  %2470 = vmatprep.mubr.bf16.mxu0 %v2857_v21  ;;  %v3658_v54 = vld [vmem:[%s4617_s1 + $0x400] sm:$0xff]   ;;  %v3687_v21 = vld [vmem:[%s4617_s1 + $0x590] sm:$0xff]  }
  0x67   :  { %2510 = vmatprep.mubr.bf16.mxu1 %v2859_v24  ;;  %v3659_v55 = vld [vmem:[%s4617_s1 + $0x480] sm:$0xff]   ;;  %v3690_v24 = vld [vmem:[%s4617_s1 + $0x508] sm:$0xff]  }
  0x68   :  { %3267 = vmatpush3.bf16.msra.mxu0 %v3598_v56  ;;  %v23_v56 = vld [vmem:[%s4618_s0 + $0x40] sm:$0xff] }
  0x69   :  { %3289 = vmatpush3.bf16.msra.mxu1 %v3599_v57  ;;  %3268 = vmatprep.subr.bf16.mxu0 %v3600_v58  ;;  %v2860_v57 = vcombine.low %v23_v56, %v23_v56  ;;  %v2861_v58 = vcombine.high %v23_v56, %v23_v56  ;;  %v3720_v56 = vld [vmem:[%s4617_s1 + $0x650] sm:$0xff]  }
  0x6a   :  { %3290 = vmatprep.subr.bf16.mxu1 %v3601_v59  ;;  %v24_v59 = vld [vmem:[%s4618_s0 + $0x48] sm:$0xff] }
  0x6c   :  { %3269 = vmatpush3.bf16.msra.mxu0 %v3602_v60  ;;  %v2862_v60 = vcombine.low %v24_v59, %v24_v59 }
  0x6d   :  { %3291 = vmatpush3.bf16.msra.mxu1 %v3603_v61  ;;  %3270 = vmatprep.subr.bf16.mxu0 %v3604_v62  ;;  %v2863_v61 = vcombine.high %v24_v59, %v24_v59  ;;  %v3664_v62 = vld [vmem:[%s4617_s1 + $0x578] sm:$0xff]   ;;  %v3723_v59 = vld [vmem:[%s4617_s1 + $0x690] sm:$0xff]  }
  0x6e   :  { %3292 = vmatprep.subr.bf16.mxu1 %v3605_v63  ;;  %v3665_v63 = vld [vmem:[%s4617_s1 + $0x5f8] sm:$0xff]  }
  0x70   :  { %3271 = vmatpush3.bf16.msra.mxu0 %v3606_v0  ;;  %v3666_v0 = vld [vmem:[%s4617_s1 + $0x538] sm:$0xff]  }
  0x71   :  { %3293 = vmatpush3.bf16.msra.mxu1 %v3607_v1  ;;  %3272 = vmatprep.subr.bf16.mxu0 %v3608_v2  ;;  %v3667_v1 = vld [vmem:[%s4617_s1 + $0x5b8] sm:$0xff]   ;;  %v3668_v2 = vld [vmem:[%s4617_s1 + $0x570] sm:$0xff]  }
  0x72   :  { %3294 = vmatprep.subr.bf16.mxu1 %v3609_v3  ;;  %v3669_v3 = vld [vmem:[%s4617_s1 + $0x5f0] sm:$0xff]  }
  0x74   :  { %3273 = vmatpush3.bf16.msra.mxu0 %v3610_v4  ;;  %v3670_v4 = vld [vmem:[%s4617_s1 + $0x530] sm:$0xff]  }
  0x75   :  { %3295 = vmatpush3.bf16.msra.mxu1 %v3611_v5  ;;  %3274 = vmatprep.subr.bf16.mxu0 %v3612_v6  ;;  %v3671_v5 = vld [vmem:[%s4617_s1 + $0x5b0] sm:$0xff]   ;;  %v3672_v6 = vld [vmem:[%s4617_s1 + $0x568] sm:$0xff]  }
  0x76   :  { %3296 = vmatprep.subr.bf16.mxu1 %v3613_v7  ;;  %v3673_v7 = vld [vmem:[%s4617_s1 + $0x5e8] sm:$0xff]  }
  0x78   :  { %3275 = vmatpush3.bf16.msra.mxu0 %v3614_v8  ;;  %v3674_v8 = vld [vmem:[%s4617_s1 + $0x528] sm:$0xff]  }
  0x79   :  { %3297 = vmatpush3.bf16.msra.mxu1 %v3615_v9  ;;  %3276 = vmatprep.subr.bf16.mxu0 %v3616_v10  ;;  %v3675_v9 = vld [vmem:[%s4617_s1 + $0x5a8] sm:$0xff]   ;;  %v3676_v10 = vld [vmem:[%s4617_s1 + $0x560] sm:$0xff]  }
  0x7a   :  { %3298 = vmatprep.subr.bf16.mxu1 %v3617_v11  ;;  %v3677_v11 = vld [vmem:[%s4617_s1 + $0x5e0] sm:$0xff]  }
  0x7c   :  { %3277 = vmatpush3.bf16.msra.mxu0 %v3618_v12  ;;  %v3678_v12 = vld [vmem:[%s4617_s1 + $0x520] sm:$0xff]  }
  0x7d   :  { %3299 = vmatpush3.bf16.msra.mxu1 %v3619_v13  ;;  %3278 = vmatprep.subr.bf16.mxu0 %v3620_v14  ;;  %v3679_v13 = vld [vmem:[%s4617_s1 + $0x5a0] sm:$0xff]   ;;  %v3680_v14 = vld [vmem:[%s4617_s1 + $0x558] sm:$0xff]  }
  0x7e   :  { %3300 = vmatprep.subr.bf16.mxu1 %v3621_v15  ;;  %v3681_v15 = vld [vmem:[%s4617_s1 + $0x5d8] sm:$0xff]  }
  0x80   :  { %3279 = vmatpush3.bf16.msra.mxu0 %v3622_v16  ;;  %v3682_v16 = vld [vmem:[%s4617_s1 + $0x518] sm:$0xff]  }
  0x81   :  { %3301 = vmatpush3.bf16.msra.mxu1 %v3623_v17  ;;  %3308 = vmatprep.subr.bf16.mxu0 %v3628_v23  ;;  %v3683_v17 = vld [vmem:[%s4617_s1 + $0x598] sm:$0xff]   ;;  %v3689_v23 = vld [vmem:[%s4617_s1 + $0x5c8] sm:$0xff]  }
  0x82   :  { %3330 = vmatprep.subr.bf16.mxu1 %v3629_v25  ;;  %v3691_v25 = vld [vmem:[%s4617_s1 + $0x588] sm:$0xff]  }
  0x83   :  { %2471 = vmatmul.mubr.bf16.vlgmr.msra.gmra.mxu0 %v2856_v20  ;;  %v3686_v20 = vld [vmem:[%s4617_s1 + $0x510] sm:$0xff]  }
  0x84   :  { %2511 = vmatmul.mubr.bf16.vlgmr.msra.gmra.mxu1 %v2858_v22  ;;  %3309 = vmatpush3.bf16.msra.mxu0 %v3630_v26  ;;  %v3688_v22 = vld [vmem:[%s4617_s1 + $0x548] sm:$0xff]   ;;  %v3692_v26 = vld [vmem:[%s4617_s1 + $0x540] sm:$0xff]  }
  0x85   :  { %3331 = vmatpush3.bf16.msra.mxu1 %v3631_v27  ;;  %3310 = vmatprep.subr.bf16.mxu0 %v3632_v28  ;;  %v3693_v27 = vld [vmem:[%s4617_s1 + $0x5c0] sm:$0xff]  }
  0x86   :  { %3332 = vmatprep.subr.bf16.mxu1 %v3633_v29  ;;  %2550 = vmatprep.mubr.bf16.mxu0 %v2861_v58  ;;  %v3694_v28 = vld [vmem:[%s4617_s1 + $0x500] sm:$0xff]   ;;  %v3722_v58 = vld [vmem:[%s4617_s1 + $0x610] sm:$0xff]  }
  0x87   :  { %2590 = vmatprep.mubr.bf16.mxu1 %v2863_v61  ;;  %v3695_v29 = vld [vmem:[%s4617_s1 + $0x580] sm:$0xff]   ;;  %v3725_v61 = vld [vmem:[%s4617_s1 + $0x6c8] sm:$0xff]  }
  0x88   :  { %3311 = vmatpush3.bf16.msra.mxu0 %v3634_v30  ;;  %v25_v30 = vld [vmem:[%s4618_s0 + $0x50] sm:$0xff] }
  0x89   :  { %3333 = vmatpush3.bf16.msra.mxu1 %v3635_v31  ;;  %3312 = vmatprep.subr.bf16.mxu0 %v3636_v32  ;;  %v26_v31 = vld [vmem:[%s4618_s0 + $0x58] sm:$0xff]  ;;  %v2864_v32 = vcombine.low %v25_v30, %v25_v30 }
  0x8a   :  { %3334 = vmatprep.subr.bf16.mxu1 %v3637_v33  ;;  %v2865_v33 = vcombine.high %v25_v30, %v25_v30  ;;  %v3743_v30 = vld [vmem:[%s4617_s1 + $0x7b0] sm:$0xff]  }
  0x8c   :  { %3313 = vmatpush3.bf16.msra.mxu0 %v3638_v34  ;;  %v2866_v34 = vcombine.low %v26_v31, %v26_v31 }
  0x8d   :  { %3335 = vmatpush3.bf16.msra.mxu1 %v3639_v35  ;;  %3314 = vmatprep.subr.bf16.mxu0 %v3640_v36  ;;  %v2867_v35 = vcombine.high %v26_v31, %v26_v31  ;;  %v3700_v36 = vld [vmem:[%s4617_s1 + $0x678] sm:$0xff]   ;;  %v3744_v31 = vld [vmem:[%s4617_s1 + $0x768] sm:$0xff]  }
  0x8e   :  { %3336 = vmatprep.subr.bf16.mxu1 %v3641_v37  ;;  %v3701_v37 = vld [vmem:[%s4617_s1 + $0x6f8] sm:$0xff]  }
  0x90   :  { %3315 = vmatpush3.bf16.msra.mxu0 %v3642_v38  ;;  %v3702_v38 = vld [vmem:[%s4617_s1 + $0x638] sm:$0xff]  }
  0x91   :  { %3337 = vmatpush3.bf16.msra.mxu1 %v3643_v39  ;;  %3316 = vmatprep.subr.bf16.mxu0 %v3644_v40  ;;  %v3703_v39 = vld [vmem:[%s4617_s1 + $0x6b8] sm:$0xff]   ;;  %v3704_v40 = vld [vmem:[%s4617_s1 + $0x670] sm:$0xff]  }
  0x92   :  { %3338 = vmatprep.subr.bf16.mxu1 %v3645_v41  ;;  %v3705_v41 = vld [vmem:[%s4617_s1 + $0x6f0] sm:$0xff]  }
  0x94   :  { %3317 = vmatpush3.bf16.msra.mxu0 %v3646_v42  ;;  %v3706_v42 = vld [vmem:[%s4617_s1 + $0x630] sm:$0xff]  }
  0x95   :  { %3339 = vmatpush3.bf16.msra.mxu1 %v3647_v43  ;;  %3318 = vmatprep.subr.bf16.mxu0 %v3648_v44  ;;  %v3707_v43 = vld [vmem:[%s4617_s1 + $0x6b0] sm:$0xff]   ;;  %v3708_v44 = vld [vmem:[%s4617_s1 + $0x668] sm:$0xff]  }
  0x96   :  { %3340 = vmatprep.subr.bf16.mxu1 %v3649_v45  ;;  %v3709_v45 = vld [vmem:[%s4617_s1 + $0x6e8] sm:$0xff]  }
  0x98   :  { %3319 = vmatpush3.bf16.msra.mxu0 %v3650_v46  ;;  %v3710_v46 = vld [vmem:[%s4617_s1 + $0x628] sm:$0xff]  }
  0x99   :  { %3341 = vmatpush3.bf16.msra.mxu1 %v3651_v47  ;;  %3320 = vmatprep.subr.bf16.mxu0 %v3652_v48  ;;  %v3711_v47 = vld [vmem:[%s4617_s1 + $0x6a8] sm:$0xff]   ;;  %v3712_v48 = vld [vmem:[%s4617_s1 + $0x660] sm:$0xff]  }
  0x9a   :  { %3342 = vmatprep.subr.bf16.mxu1 %v3653_v49  ;;  %v3713_v49 = vld [vmem:[%s4617_s1 + $0x6e0] sm:$0xff]  }
  0x9c   :  { %3321 = vmatpush3.bf16.msra.mxu0 %v3654_v50  ;;  %v3714_v50 = vld [vmem:[%s4617_s1 + $0x620] sm:$0xff]  }
  0x9d   :  { %3343 = vmatpush3.bf16.msra.mxu1 %v3655_v51  ;;  %3322 = vmatprep.subr.bf16.mxu0 %v3656_v52  ;;  %v3715_v51 = vld [vmem:[%s4617_s1 + $0x6a0] sm:$0xff]   ;;  %v3716_v52 = vld [vmem:[%s4617_s1 + $0x658] sm:$0xff]  }
  0x9e   :  { %3344 = vmatprep.subr.bf16.mxu1 %v3657_v53  ;;  %v3717_v53 = vld [vmem:[%s4617_s1 + $0x6d8] sm:$0xff]  }
  0xa0   :  { %3323 = vmatpush3.bf16.msra.mxu0 %v3658_v54  ;;  %v3718_v54 = vld [vmem:[%s4617_s1 + $0x618] sm:$0xff]  }
  0xa1   :  { %3345 = vmatpush3.bf16.msra.mxu1 %v3659_v55  ;;  %3352 = vmatprep.subr.bf16.mxu0 %v3664_v62  ;;  %v3719_v55 = vld [vmem:[%s4617_s1 + $0x698] sm:$0xff]   ;;  %v3726_v62 = vld [vmem:[%s4617_s1 + $0x608] sm:$0xff]  }
  0xa2   :  { %3374 = vmatprep.subr.bf16.mxu1 %v3665_v63  ;;  %v3727_v63 = vld [vmem:[%s4617_s1 + $0x688] sm:$0xff]  }
  0xa3   :  { %2551 = vmatmul.mubr.bf16.vlgmr.msra.gmra.mxu0 %v2860_v57  ;;  %v3721_v57 = vld [vmem:[%s4617_s1 + $0x6d0] sm:$0xff]  }
  0xa4   :  { %2591 = vmatmul.mubr.bf16.vlgmr.msra.gmra.mxu1 %v2862_v60  ;;  %3353 = vmatpush3.bf16.msra.mxu0 %v3666_v0  ;;  %v3724_v60 = vld [vmem:[%s4617_s1 + $0x648] sm:$0xff]   ;;  %v3728_v0 = vld [vmem:[%s4617_s1 + $0x640] sm:$0xff]  }
  0xa5   :  { %3375 = vmatpush3.bf16.msra.mxu1 %v3667_v1  ;;  %3354 = vmatprep.subr.bf16.mxu0 %v3668_v2  ;;  %v3729_v1 = vld [vmem:[%s4617_s1 + $0x6c0] sm:$0xff]  }
  0xa6   :  { %3376 = vmatprep.subr.bf16.mxu1 %v3669_v3  ;;  %2630 = vmatprep.mubr.bf16.mxu0 %v2865_v33  ;;  %v3730_v2 = vld [vmem:[%s4617_s1 + $0x600] sm:$0xff]   ;;  %v3746_v33 = vld [vmem:[%s4617_s1 + $0x728] sm:$0xff]  }
  0xa7   :  { %2670 = vmatprep.mubr.bf16.mxu1 %v2867_v35  ;;  %v3731_v3 = vld [vmem:[%s4617_s1 + $0x680] sm:$0xff]  }
  0xa8   :  { %3355 = vmatpush3.bf16.msra.mxu0 %v3670_v4  ;;  %v27_v4 = vld [vmem:[%s4618_s0 + $0x60] sm:$0xff] }
  0xa9   :  { %3377 = vmatpush3.bf16.msra.mxu1 %v3671_v5  ;;  %3356 = vmatprep.subr.bf16.mxu0 %v3672_v6  ;;  %v28_v5 = vld [vmem:[%s4618_s0 + $0x68] sm:$0xff]  ;;  %v3748_v35 = vld [vmem:[%s4617_s1 + $0x760] sm:$0xff]  }
  0xaa   :  { %3378 = vmatprep.subr.bf16.mxu1 %v3673_v7 }
  0xac   :  { %3357 = vmatpush3.bf16.msra.mxu0 %v3674_v8  ;;  %v2868_v8 = vcombine.low %v27_v4, %v27_v4 }
  0xad   :  { %3379 = vmatpush3.bf16.msra.mxu1 %v3675_v9  ;;  %3358 = vmatprep.subr.bf16.mxu0 %v3676_v10  ;;  %v2869_v9 = vcombine.high %v27_v4, %v27_v4  ;;  %v2870_v10 = vcombine.low %v28_v5, %v28_v5 }
  0xae   :  { %3380 = vmatprep.subr.bf16.mxu1 %v3677_v11  ;;  %v3736_v11 = vld [vmem:[%s4617_s1 + $0x778] sm:$0xff]  }
  0xb0   :  { %3359 = vmatpush3.bf16.msra.mxu0 %v3678_v12  ;;  %v2871_v12 = vcombine.high %v28_v5, %v28_v5 }
  0xb1   :  { %3381 = vmatpush3.bf16.msra.mxu1 %v3679_v13  ;;  %3360 = vmatprep.subr.bf16.mxu0 %v3680_v14  ;;  %v3737_v13 = vld [vmem:[%s4617_s1 + $0x7f8] sm:$0xff]  }
  0xb2   :  { %3382 = vmatprep.subr.bf16.mxu1 %v3681_v15 }
  0xb4   :  { %3361 = vmatpush3.bf16.msra.mxu0 %v3682_v16  ;;  %v3738_v16 = vld [vmem:[%s4617_s1 + $0x738] sm:$0xff]  }
  0xb5   :  { %3383 = vmatpush3.bf16.msra.mxu1 %v3683_v17  ;;  %3362 = vmatprep.subr.bf16.mxu0 %v3684_v18 }
  0xb6   :  { %3384 = vmatprep.subr.bf16.mxu1 %v3685_v19  ;;  %v3739_v19 = vld [vmem:[%s4617_s1 + $0x7b8] sm:$0xff]  }
  0xb8   :  { %3363 = vmatpush3.bf16.msra.mxu0 %v3686_v20  ;;  %v2843_v20 = vld [vmem:[%s4619_s2] ss:$0 sm:$0xff] }
  0xb9   :  { %3385 = vmatpush3.bf16.msra.mxu1 %v3687_v21  ;;  %3364 = vmatprep.subr.bf16.mxu0 %v3688_v22 }
  0xba   :  { %3386 = vmatprep.subr.bf16.mxu1 %v3689_v23 }
  0xbc   :  { %3365 = vmatpush3.bf16.msra.mxu0 %v3690_v24  ;;  %v3740_v24 = vld [vmem:[%s4617_s1 + $0x770] sm:$0xff]  }
  0xbd   :  { %3387 = vmatpush3.bf16.msra.mxu1 %v3691_v25  ;;  %3366 = vmatprep.subr.bf16.mxu0 %v3692_v26  ;;  %v3741_v25 = vld [vmem:[%s4617_s1 + $0x7f0] sm:$0xff]  }
  0xbe   :  { %3388 = vmatprep.subr.bf16.mxu1 %v3693_v27 }
  0xc0   :  { %3367 = vmatpush3.bf16.msra.mxu0 %v3694_v28 }
  0xc1   :  { %3389 = vmatpush3.bf16.msra.mxu1 %v3695_v29  ;;  %3396 = vmatprep.subr.bf16.mxu0 %v3700_v36  ;;  %v3742_v29 = vld [vmem:[%s4617_s1 + $0x730] sm:$0xff]   ;;  %v3749_v36 = vld [vmem:[%s4617_s1 + $0x7e0] sm:$0xff]  }
  0xc2   :  { %3418 = vmatprep.subr.bf16.mxu1 %v3701_v37  ;;  %v3750_v37 = vld [vmem:[%s4617_s1 + $0x720] sm:$0xff]  }
  0xc3   :  { %2631 = vmatmul.mubr.bf16.vlgmr.msra.gmra.mxu0 %v2864_v32  ;;  %v3745_v32 = vld [vmem:[%s4617_s1 + $0x7e8] sm:$0xff]  }
  0xc4   :  { %2671 = vmatmul.mubr.bf16.vlgmr.msra.gmra.mxu1 %v2866_v34  ;;  %3397 = vmatpush3.bf16.msra.mxu0 %v3702_v38  ;;  %v3747_v34 = vld [vmem:[%s4617_s1 + $0x7a8] sm:$0xff]   ;;  %v3751_v38 = vld [vmem:[%s4617_s1 + $0x7a0] sm:$0xff]  }
  0xc5   :  { %3419 = vmatpush3.bf16.msra.mxu1 %v3703_v39  ;;  %3398 = vmatprep.subr.bf16.mxu0 %v3704_v40  ;;  %v3752_v39 = vld [vmem:[%s4617_s1 + $0x758] sm:$0xff]  }
  0xc6   :  { %3420 = vmatprep.subr.bf16.mxu1 %v3705_v41  ;;  %2710 = vmatprep.mubr.bf16.mxu0 %v2869_v9  ;;  %v3753_v40 = vld [vmem:[%s4617_s1 + $0x7d8] sm:$0xff]  }
  0xc7   :  { %2750 = vmatprep.mubr.bf16.mxu1 %v2871_v12  ;;  %v3754_v41 = vld [vmem:[%s4617_s1 + $0x718] sm:$0xff]  }
  0xc8   :  { %3399 = vmatpush3.bf16.msra.mxu0 %v3706_v42  ;;  %v3755_v42 = vld [vmem:[%s4617_s1 + $0x798] sm:$0xff]  }
  0xc9   :  { %3421 = vmatpush3.bf16.msra.mxu1 %v3707_v43  ;;  %3400 = vmatprep.subr.bf16.mxu0 %v3708_v44  ;;  %v3756_v43 = vld [vmem:[%s4617_s1 + $0x750] sm:$0xff]  }
  0xca   :  { %3422 = vmatprep.subr.bf16.mxu1 %v3709_v45  ;;  %v3757_v44 = vld [vmem:[%s4617_s1 + $0x7d0] sm:$0xff]  }
  0xcb   :  { %v3758_v45 = vld [vmem:[%s4617_s1 + $0x710] sm:$0xff]  }
  0xcc   :  { %3401 = vmatpush3.bf16.msra.mxu0 %v3710_v46  ;;  %v3759_v46 = vld [vmem:[%s4617_s1 + $0x790] sm:$0xff]  }
  0xcd   :  { %3423 = vmatpush3.bf16.msra.mxu1 %v3711_v47  ;;  %3402 = vmatprep.subr.bf16.mxu0 %v3712_v48  ;;  %v3760_v47 = vld [vmem:[%s4617_s1 + $0x748] sm:$0xff]  }
  0xce   :  { %3424 = vmatprep.subr.bf16.mxu1 %v3713_v49  ;;  %v3761_v48 = vld [vmem:[%s4617_s1 + $0x7c8] sm:$0xff]  }
  0xcf   :  { %v3762_v49 = vld [vmem:[%s4617_s1 + $0x708] sm:$0xff]  }
  0xd0   :  { %3403 = vmatpush3.bf16.msra.mxu0 %v3714_v50  ;;  %v3763_v50 = vld [vmem:[%s4617_s1 + $0x788] sm:$0xff]  }
  0xd1   :  { %3425 = vmatpush3.bf16.msra.mxu1 %v3715_v51  ;;  %3404 = vmatprep.subr.bf16.mxu0 %v3716_v52  ;;  %v3764_v51 = vld [vmem:[%s4617_s1 + $0x740] sm:$0xff]  }
  0xd2   :  { %3426 = vmatprep.subr.bf16.mxu1 %v3717_v53  ;;  %v3765_v52 = vld [vmem:[%s4617_s1 + $0x7c0] sm:$0xff]  }
  0xd3   :  { %v3766_v53 = vld [vmem:[%s4617_s1 + $0x700] sm:$0xff]  }
  0xd4   :  { %3405 = vmatpush3.bf16.msra.mxu0 %v3718_v54  ;;  %v3767_v54 = vld [vmem:[%s4617_s1 + $0x780] sm:$0xff]  }
  0xd5   :  { %3427 = vmatpush3.bf16.msra.mxu1 %v3719_v55  ;;  %3406 = vmatprep.subr.bf16.mxu0 %v3720_v56  ;;  %v29_v55 = vld [vmem:[%s4618_s0 + $0x70] sm:$0xff]  ;;  %v30_v56 = vld [vmem:[%s4618_s0 + $0x78] sm:$0xff] }
  0xd6   :  { %3428 = vmatprep.subr.bf16.mxu1 %v3721_v57 }
  0xd8   :  { %3407 = vmatpush3.bf16.msra.mxu0 %v3722_v58 }
  0xd9   :  { %3429 = vmatpush3.bf16.msra.mxu1 %v3723_v59  ;;  %3408 = vmatprep.subr.bf16.mxu0 %v3724_v60  ;;  %v2872_v59 = vcombine.low %v29_v55, %v29_v55  ;;  %v2873_v60 = vcombine.high %v29_v55, %v29_v55 }
  0xda   :  { %3430 = vmatprep.subr.bf16.mxu1 %v3725_v61  ;;  %v2874_v61 = vcombine.low %v30_v56, %v30_v56 }
  0xdc   :  { %3409 = vmatpush3.bf16.msra.mxu0 %v3726_v62  ;;  %v2875_v62 = vcombine.high %v30_v56, %v30_v56 }
  0xdd   :  { %3431 = vmatpush3.bf16.msra.mxu1 %v3727_v63  ;;  %3410 = vmatprep.subr.bf16.mxu0 %v3728_v0 }
  0xde   :  { %3432 = vmatprep.subr.bf16.mxu1 %v3729_v1 }
  0xe0   :  { %3411 = vmatpush3.bf16.msra.mxu0 %v3730_v2 }
  0xe1   :  { %3433 = vmatpush3.bf16.msra.mxu1 %v3731_v3  ;;  %3440 = vmatprep.subr.bf16.mxu0 %v3736_v11 }
  0xe2   :  { %3462 = vmatprep.subr.bf16.mxu1 %v3737_v13 }
  0xe3   :  { %v3148_v6 = vpop.f32.mrf.mxu0  ;;  %2711 = vmatmul.mubr.bf16.vlgmr.msra.gmra.mxu0 %v2868_v8 }
  0xe4   :  { %v3170_v7 = vpop.f32.mrf.mxu1  ;;  %2751 = vmatmul.mubr.bf16.vlgmr.msra.gmra.mxu1 %v2870_v10  ;;  %3441 = vmatpush3.bf16.msra.mxu0 %v3738_v16 }
  0xe5   :  { %v3149_v14 = vpop.f32.mrf.mxu0  ;;  %3463 = vmatpush3.bf16.msra.mxu1 %v3739_v19  ;;  %3442 = vmatprep.subr.bf16.mxu0 %v3740_v24 }
  0xe6   :  { %v3171_v15 = vpop.f32.mrf.mxu1  ;;  %v3150_v17 = vadd.f32 %v3149_v14, %v3148_v6  ;;  %3464 = vmatprep.subr.bf16.mxu1 %v3741_v25  ;;  %2790 = vmatprep.mubr.bf16.mxu0 %v2873_v60 }
  0xe7   :  { %v3172_v18 = vadd.f32 %v3171_v15, %v3170_v7  ;;  %v3151_v21 = vpop.f32.mrf.mxu0  ;;  %2830 = vmatprep.mubr.bf16.mxu1 %v2875_v62 }
  0xe8   :  { %v3173_v22 = vpop.f32.mrf.mxu1  ;;  %v2233_v23 = vadd.f32 %v3150_v17, %v2843_v20  ;;  %3443 = vmatpush3.bf16.msra.mxu0 %v3742_v29 }
  0xe9   :  { %v3152_v26 = vpop.f32.mrf.mxu0  ;;  %3465 = vmatpush3.bf16.msra.mxu1 %v3743_v30  ;;  %3444 = vmatprep.subr.bf16.mxu0 %v3744_v31 }
  0xea   :  { %v3174_v27 = vpop.f32.mrf.mxu1  ;;  %v4527_v28 = vadd.f32 %v3172_v18, %v2233_v23  ;;  %3466 = vmatprep.subr.bf16.mxu1 %v3745_v32 }
  0xec   :  { %3445 = vmatpush3.bf16.msra.mxu0 %v3746_v33 }
  0xed   :  { %3467 = vmatpush3.bf16.msra.mxu1 %v3747_v34  ;;  %3446 = vmatprep.subr.bf16.mxu0 %v3748_v35 }
  0xee   :  { %3468 = vmatprep.subr.bf16.mxu1 %v3749_v36 }
  0xf0   :  { %3447 = vmatpush3.bf16.msra.mxu0 %v3750_v37 }
  0xf1   :  { %3469 = vmatpush3.bf16.msra.mxu1 %v3751_v38  ;;  %3448 = vmatprep.subr.bf16.mxu0 %v3752_v39 }
  0xf2   :  { %3470 = vmatprep.subr.bf16.mxu1 %v3753_v40 }
  0xf4   :  { %3449 = vmatpush3.bf16.msra.mxu0 %v3754_v41 }
  0xf5   :  { %3471 = vmatpush3.bf16.msra.mxu1 %v3755_v42  ;;  %3450 = vmatprep.subr.bf16.mxu0 %v3756_v43 }
  0xf6   :  { %3472 = vmatprep.subr.bf16.mxu1 %v3757_v44 }
  0xf8   :  { %3451 = vmatpush3.bf16.msra.mxu0 %v3758_v45 }
  0xf9   :  { %3473 = vmatpush3.bf16.msra.mxu1 %v3759_v46  ;;  %3452 = vmatprep.subr.bf16.mxu0 %v3760_v47 }
  0xfa   :  { %3474 = vmatprep.subr.bf16.mxu1 %v3761_v48 }
  0xfc   :  { %3453 = vmatpush3.bf16.msra.mxu0 %v3762_v49 }
  0xfd   :  { %3475 = vmatpush3.bf16.msra.mxu1 %v3763_v50  ;;  %3454 = vmatprep.subr.bf16.mxu0 %v3764_v51 }
  0xfe   :  { %3476 = vmatprep.subr.bf16.mxu1 %v3765_v52 }
 0x100   :  { %3455 = vmatpush3.bf16.msra.mxu0 %v3766_v53 }
 0x101   :  { %3477 = vmatpush3.bf16.msra.mxu1 %v3767_v54 }
 0x103   :  { %v3192_v57 = vpop.f32.mrf.mxu0  ;;  %2791 = vmatmul.mubr.bf16.vlgmr.msra.gmra.mxu0 %v2872_v59 }
 0x104   :  { %v3214_v58 = vpop.f32.mrf.mxu1  ;;  %2831 = vmatmul.mubr.bf16.vlgmr.msra.gmra.mxu1 %v2874_v61 }
 0x105   :  { %v3193_v63 = vpop.f32.mrf.mxu0 }
 0x106   :  { %v3215_v0 = vpop.f32.mrf.mxu1  ;;  %v3194_v1 = vadd.f32 %v3193_v63, %v3192_v57 }
 0x107   :  { %v3216_v2 = vadd.f32 %v3215_v0, %v3214_v58  ;;  %v3195_v3 = vpop.f32.mrf.mxu0 }
 0x108   :  { %v3217_v4 = vpop.f32.mrf.mxu1  ;;  %v2313_v5 = vadd.f32 %v3194_v1, %v4527_v28 }
 0x109   :  { %v3196_v6 = vpop.f32.mrf.mxu0 }
 0x10a   :  { %v3218_v7 = vpop.f32.mrf.mxu1  ;;  %v2353_v8 = vadd.f32 %v3216_v2, %v2313_v5 }
 0x123   :  { %v3236_v9 = vpop.f32.mrf.mxu0 }
 0x124   :  { %v3258_v10 = vpop.f32.mrf.mxu1 }
 0x125   :  { %v3237_v11 = vpop.f32.mrf.mxu0 }
 0x126   :  { %v3238_v12 = vadd.f32 %v3237_v11, %v3236_v9  ;;  %v3259_v13 = vpop.f32.mrf.mxu1 }
 0x127   :  { %v3260_v14 = vadd.f32 %v3259_v13, %v3258_v10  ;;  %v3239_v15 = vpop.f32.mrf.mxu0 }
 0x128   :  { %v2393_v16 = vadd.f32 %v3238_v12, %v2353_v8  ;;  %v3261_v17 = vpop.f32.mrf.mxu1 }
 0x129   :  { %v3240_v18 = vpop.f32.mrf.mxu0 }
 0x12a   :  { %v2433_v19 = vadd.f32 %v3260_v14, %v2393_v16  ;;  %v3262_v20 = vpop.f32.mrf.mxu1 }
 0x143   :  { %v3280_v21 = vpop.f32.mrf.mxu0 }
 0x144   :  { %v3302_v22 = vpop.f32.mrf.mxu1 }
 0x145   :  { %v3281_v23 = vpop.f32.mrf.mxu0 }
 0x146   :  { %v3282_v24 = vadd.f32 %v3281_v23, %v3280_v21  ;;  %v3303_v25 = vpop.f32.mrf.mxu1 }
 0x147   :  { %v3304_v26 = vadd.f32 %v3303_v25, %v3302_v22  ;;  %v3283_v27 = vpop.f32.mrf.mxu0 }
 0x148   :  { %v2473_v28 = vadd.f32 %v3282_v24, %v2433_v19  ;;  %v3305_v29 = vpop.f32.mrf.mxu1 }
 0x149   :  { %v3284_v30 = vpop.f32.mrf.mxu0 }
 0x14a   :  { %v2513_v31 = vadd.f32 %v3304_v26, %v2473_v28  ;;  %v3306_v32 = vpop.f32.mrf.mxu1 }
 0x163   :  { %v3324_v33 = vpop.f32.mrf.mxu0 }
 0x164   :  { %v3346_v34 = vpop.f32.mrf.mxu1 }
 0x165   :  { %v3325_v35 = vpop.f32.mrf.mxu0 }
 0x166   :  { %v3347_v36 = vpop.f32.mrf.mxu1  ;;  %v3326_v37 = vadd.f32 %v3325_v35, %v3324_v33 }
 0x167   :  { %v3348_v38 = vadd.f32 %v3347_v36, %v3346_v34  ;;  %v3327_v39 = vpop.f32.mrf.mxu0 }
 0x168   :  { %v3349_v40 = vpop.f32.mrf.mxu1  ;;  %v2553_v41 = vadd.f32 %v3326_v37, %v2513_v31 }
 0x169   :  { %v3328_v42 = vpop.f32.mrf.mxu0 }
 0x16a   :  { %v3350_v43 = vpop.f32.mrf.mxu1  ;;  %v2593_v44 = vadd.f32 %v3348_v38, %v2553_v41 }
 0x183   :  { %v3368_v45 = vpop.f32.mrf.mxu0 }
 0x184   :  { %v3390_v46 = vpop.f32.mrf.mxu1 }
 0x185   :  { %v3369_v47 = vpop.f32.mrf.mxu0 }
 0x186   :  { %v3391_v48 = vpop.f32.mrf.mxu1  ;;  %v3370_v61 = vadd.f32 %v3369_v47, %v3368_v45 }
 0x187   :  { %v3371_v49 = vpop.f32.mrf.mxu0  ;;  %v3392_v63 = vadd.f32 %v3391_v48, %v3390_v46 }
 0x188   :  { %v3393_v50 = vpop.f32.mrf.mxu1  ;;  %v2633_v62 = vadd.f32 %v3370_v61, %v2593_v44 }
 0x189   :  { %v3372_v51 = vpop.f32.mrf.mxu0 }
 0x18a   :  { %v3394_v52 = vpop.f32.mrf.mxu1  ;;  %v2673_v1 = vadd.f32 %v3392_v63, %v2633_v62 }
 0x1a3   :  { %v3412_v53 = vpop.f32.mrf.mxu0 }
 0x1a4   :  { %v3434_v54 = vpop.f32.mrf.mxu1 }
 0x1a5   :  { %v3413_v55 = vpop.f32.mrf.mxu0 }
 0x1a6   :  { %v3435_v56 = vpop.f32.mrf.mxu1  ;;  %v3414_v0 = vadd.f32 %v3413_v55, %v3412_v53 }
 0x1a7   :  { %v3415_v57 = vpop.f32.mrf.mxu0  ;;  %v3436_v3 = vadd.f32 %v3435_v56, %v3434_v54 }
 0x1a8   :  { %v3437_v58 = vpop.f32.mrf.mxu1  ;;  %v2713_v2 = vadd.f32 %v3414_v0, %v2673_v1 }
 0x1a9   :  { %v3416_v59 = vpop.f32.mrf.mxu0 }
 0x1aa   :  { %v3438_v60 = vpop.f32.mrf.mxu1  ;;  %v2753_v7 = vadd.f32 %v3436_v3, %v2713_v2 }
 0x1c3   :  { %v3456_v4 = vpop.f32.mrf.mxu0 }
 0x1c4   :  { %v3478_v5 = vpop.f32.mrf.mxu1 }
 0x1c5   :  { %v3457_v6 = vpop.f32.mrf.mxu0 }
 0x1c6   :  { %v3458_v8 = vadd.f32 %v3457_v6, %v3456_v4  ;;  %v3479_v9 = vpop.f32.mrf.mxu1 }
 0x1c7   :  { %v3459_v10 = vpop.f32.mrf.mxu0  ;;  %v3480_v12 = vadd.f32 %v3479_v9, %v3478_v5 }
 0x1c8   :  { %v2793_v11 = vadd.f32 %v3458_v8, %v2753_v7  ;;  %v3481_v13 = vpop.f32.mrf.mxu1 }
 0x1c9   :  { %v3460_v14 = vpop.f32.mrf.mxu0 }
 0x1ca   :  { %v2833_v15 = vadd.f32 %v3480_v12, %v2793_v11  ;;  %v3482_v16 = vpop.f32.mrf.mxu1 }
 0x1cc   :  { %2838 = vst [vmem:[%s4620_s3] sm:$0xff] %v2833_v15 }

</bundles_post_ra>
